<compile_context>
chip_gen: v7x
topology: tpu7x:2x2x1
jax: 0.10.0
libtpu: 0.0.40
codegen_flags: <defaults>
</compile_context>

<pallas_src>
import functools

import jax
import jax.numpy as jnp
from jax import lax
from jax.experimental import pallas as pl
from jax.experimental.pallas import tpu as pltpu


# Explicit scoped-VMEM limit.  The per-step working sets below are ~1-2 MiB
# (double-buffered blocks + scratch); 32 MiB leaves ample headroom while
# staying inside the scoped budget of v5e/v6e and half of v7x's 64 MiB.
_VMEM_LIMIT_BYTES = 32 * 1024 * 1024
_BN_EPS = 1e-5


def _pick_cout_tile(cout):
    """Output-channel tile: 256 on 256-wide-MXU chips (v6e/v7x), else 128 (v5e)."""
    if cout % 256 == 0:
        try:
            kind = jax.devices()[0].device_kind.lower()
            if "v5" not in kind and "v4" not in kind:
                return 256
        except Exception:
            return 256
    return 128


def _pick_row_tile(m, target=512):
    """Largest row tile <= target that divides m (keeps BN reductions exact)."""
    for tm in (target, 256, 128, 64, 32, 16, 8):
        if m % tm == 0:
            return tm
    return m


# ---------------------------------------------------------------------------
# Fused 3x3 / stride-1 / pad-1 convolution + bn1 stat partials.
# Grid: (Cout tile, image).  Weights stay resident across the inner image axis.
# ---------------------------------------------------------------------------
def _conv3x3_s1_kernel(x_ref, w_ref, y_ref, s_ref, lap_ref, acc_ref, *, H, W, Cin):
    # x_ref  : (1, H+2, W+2, Cin) bf16  zero-padded image
    # w_ref  : (3, 3*Cin, TC)     bf16  taps: w[i, j*Cin + cin, cout]
    # y_ref  : (1, H*W, TC)       bf16  conv output (f32-accumulated, cast at store)
    # s_ref  : (1, 2, TC)         f32   per-image [sum, sumsq] of y (bn1 partials)
    # lap_ref: (H+2, W, 3*Cin)    bf16  VMEM scratch: j-shifts hoisted, lane-concat
    # acc_ref: (H*W, TC)          f32   VMEM scratch accumulator
    #
    # Hoist the width (j) shift out of the tap loop: 3 sublane-shifted reads
    # total (instead of 9), stored to 128-aligned lane slots so each remaining
    # height tap i is a single K = 3*Cin MXU matmul.
    lap_ref[:, :, 0 * Cin:1 * Cin] = x_ref[0, :, 0:W, :]
    lap_ref[:, :, 1 * Cin:2 * Cin] = x_ref[0, :, 1:W + 1, :]
    lap_ref[:, :, 2 * Cin:3 * Cin] = x_ref[0, :, 2:W + 2, :]
    for i in range(3):                        # 3 unrolled MXU matmuls, f32 acc
        contrib = jnp.dot(lap_ref[i:i + H, :, :].reshape(H * W, 3 * Cin),
                          w_ref[i], preferred_element_type=jnp.float32)
        if i == 0:
            acc_ref[...] = contrib
        else:
            acc_ref[...] += contrib
    yb = acc_ref[...].astype(jnp.bfloat16)    # bf16 writeback (halves y traffic)
    y_ref[0] = yb
    yf = yb.astype(jnp.float32)               # stats on the value the tail reads
    s_ref[0] = jnp.concatenate(
        [jnp.sum(yf, axis=0, keepdims=True),
         jnp.sum(yf * yf, axis=0, keepdims=True)], axis=0)


def conv3x3_s1(xp, w_tap, *, H, W):
    """xp: (N,H+2,W+2,Cin) bf16, w_tap: (3,3*Cin,Cout) bf16 ->
    (y (N,H*W,Cout) bf16, stats (N,2,Cout) f32 per-image [sum, sumsq] of y)."""
    N, Hp2, Wp2, Cin = xp.shape
    assert Hp2 == H + 2 and Wp2 == W + 2
    _, K, Cout = w_tap.shape
    assert K == 3 * Cin and Cin % 128 == 0
    TC = _pick_cout_tile(Cout)
    assert Cout % TC == 0
    kernel = functools.partial(_conv3x3_s1_kernel, H=H, W=W, Cin=Cin)
    # Grid (Cout//TC, N): the (larger, for ResNet-style channel counts) weight
    # tile stays resident across the inner image axis; image blocks are small
    # and re-fetched only Cout//TC times.
    return pl.pallas_call(
        kernel,
        out_shape=(jax.ShapeDtypeStruct((N, H * W, Cout), jnp.bfloat16),
                   jax.ShapeDtypeStruct((N, 2, Cout), jnp.float32)),
        grid_spec=pltpu.PrefetchScalarGridSpec(
            num_scalar_prefetch=0,
            grid=(Cout // TC, N),
            in_specs=[
                pl.BlockSpec((1, H + 2, W + 2, Cin), lambda c, n: (n, 0, 0, 0)),
                pl.BlockSpec((3, 3 * Cin, TC), lambda c, n: (0, 0, c)),
            ],
            out_specs=(
                pl.BlockSpec((1, H * W, TC), lambda c, n: (n, 0, c)),
                pl.BlockSpec((1, 2, TC), lambda c, n: (n, 0, c)),
            ),
            scratch_shapes=[
                pltpu.VMEM((H + 2, W, 3 * Cin), jnp.bfloat16),
                pltpu.VMEM((H * W, TC), jnp.float32),
            ],
        ),
        compiler_params=pltpu.CompilerParams(
            dimension_semantics=("parallel", "parallel"),
            vmem_limit_bytes=_VMEM_LIMIT_BYTES,
            # let XLA fuse the wrapper-side pad + bf16 cast into this input
            # instead of paying a separate padded-activation HBM round trip.
            allow_input_fusion=[True, False]),
    )(xp, w_tap)


# ---------------------------------------------------------------------------
# Row-tiled BasicBlock tail.
# Pass 1: per-channel [sum, sumsq] of t = relu(y*a1 + c1) (bn2 batch stats).
# Pass 2: out = relu(t*a2 + c2 + residual).
# ---------------------------------------------------------------------------
def _tail_stats_kernel(y_ref, cf1_ref, o_ref):
    m = pl.program_id(1)

    @pl.when(m == 0)
    def _():
        o_ref[...] = jnp.zeros_like(o_ref)

    y = y_ref[...].astype(jnp.float32)
    t = jnp.maximum(y * cf1_ref[0:1, :] + cf1_ref[1:2, :], 0.0)
    o_ref[...] += jnp.concatenate(
        [jnp.sum(t, axis=0, keepdims=True),
         jnp.sum(t * t, axis=0, keepdims=True)], axis=0)


def tail_stats(y, cf1, *, tm):
    M, C = y.shape
    TC = 128
    assert C % TC == 0 and M % tm == 0
    return pl.pallas_call(
        _tail_stats_kernel,
        out_shape=jax.ShapeDtypeStruct((2, C), jnp.float32),
        grid_spec=pltpu.PrefetchScalarGridSpec(
            num_scalar_prefetch=0,
            grid=(C // TC, M // tm),                 # reduction (row) axis last
            in_specs=[pl.BlockSpec((tm, TC), lambda c, m: (m, c)),
                      pl.BlockSpec((2, TC), lambda c, m: (0, c))],
            out_specs=pl.BlockSpec((2, TC), lambda c, m: (0, c)),
        ),
        compiler_params=pltpu.CompilerParams(
            dimension_semantics=("parallel", "arbitrary"),
            vmem_limit_bytes=_VMEM_LIMIT_BYTES),
    )(y, cf1)


def _tail_norm_kernel(y_ref, r_ref, cf_ref, o_ref):
    y = y_ref[...].astype(jnp.float32)
    t = jnp.maximum(y * cf_ref[0:1, :] + cf_ref[1:2, :], 0.0)      # relu(bn1(y))
    z = t * cf_ref[2:3, :] + cf_ref[3:4, :]                        # bn2(t)
    o_ref[...] = jnp.maximum(z + r_ref[...].astype(jnp.float32), 0.0)


def tail_normalize(y, res, cf, *, tm):
    M, C = y.shape
    TC = 128
    assert C % TC == 0 and M % tm == 0
    return pl.pallas_call(
        _tail_norm_kernel,
        out_shape=jax.ShapeDtypeStruct((M, C), jnp.float32),
        grid_spec=pltpu.PrefetchScalarGridSpec(
            num_scalar_prefetch=0,
            grid=(M // tm, C // TC),
            in_specs=[pl.BlockSpec((tm, TC), lambda m, c: (m, c)),
                      pl.BlockSpec((tm, TC), lambda m, c: (m, c)),
                      pl.BlockSpec((4, TC), lambda m, c: (0, c))],
            out_specs=pl.BlockSpec((tm, TC), lambda m, c: (m, c)),
        ),
        compiler_params=pltpu.CompilerParams(
            dimension_semantics=("parallel", "parallel"),
            vmem_limit_bytes=_VMEM_LIMIT_BYTES),
    )(y, res, cf)


# --------------------------------------------------------------- parameters
def init_basic_block_params(key, inplanes, planes):
    # PyTorch conv3x3 weight layout (Cout, Cin, kh, kw), transposed ONCE to
    # tap-major (kh, kw*Cin, Cout) bf16 so each height tap is a single
    # K = 3*Cin MXU matmul (no per-forward transposes or padding copies).
    assert inplanes % 128 == 0 and planes % 128 == 0, \
        "lane-dense kernels require channel counts that are multiples of 128"
    # TODO(synk): C=64 stages (typical ResNet layer1) would need two channel
    # groups repacked into one 128-lane tile to avoid masked 64-lane stores.
    w = jax.random.normal(key, (planes, inplanes, 3, 3), jnp.float32) * 0.05
    w_tap = jnp.transpose(w, (2, 3, 1, 0)).reshape(3, 3 * inplanes, planes)
    return {
        'conv1_w_tap': w_tap.astype(jnp.bfloat16),
        'bn1_g': jnp.ones((planes,), jnp.float32),
        'bn1_b': jnp.zeros((planes,), jnp.float32),
        'bn2_g': jnp.ones((planes,), jnp.float32),
        'bn2_b': jnp.zeros((planes,), jnp.float32),
        # TODO(synk): the module also constructs conv2 (unused in forward) and,
        # when downsample=True, a fresh random conv1x1(planes, 2*planes, 2)+BN
        # whose output cannot be added to the main path; neither is translated.
    }


# ------------------------------------------------------------------ forward
def basic_block_forward(params, x_nchw, eps=_BN_EPS):
    """BasicBlock.forward (stride=1, downsample=False, inplanes == planes)."""
    N, C, H, W = x_nchw.shape
    assert params['conv1_w_tap'].shape == (3, 3 * C, C), \
        "identity residual requires inplanes == planes"
    M = N * H * W
    tm = _pick_row_tile(M)

    x = jnp.transpose(x_nchw, (0, 2, 3, 1)).astype(jnp.float32)     # NCHW -> NHWC
    x_b = x.astype(jnp.bfloat16)                                    # matmul / residual dtype
    xp = jnp.pad(x_b, ((0, 0), (1, 1), (1, 1), (0, 0)))

    # conv1 (+ bn1 stat partials from the epilogue: no extra pass over y)
    y, ystats = conv3x3_s1(xp, params['conv1_w_tap'], H=H, W=W)
    y2 = y.reshape(M, C)
    res = x_b.reshape(M, C)

    # bn1 train-mode (biased) batch stats -> folded per-channel affine coeffs
    m1 = jnp.sum(ystats[:, 0, :], axis=0) / M
    v1 = jnp.sum(ystats[:, 1, :], axis=0) / M - m1 * m1
    a1 = params['bn1_g'] * lax.rsqrt(v1 + eps)
    c1 = params['bn1_b'] - m1 * a1

    # bn2 stats need t = relu(bn1(y)): row-tiled pass 1 over y
    tstats = tail_stats(y2, jnp.stack([a1, c1], axis=0), tm=tm)
    m2 = tstats[0] / M
    v2 = tstats[1] / M - m2 * m2
    a2 = params['bn2_g'] * lax.rsqrt(v2 + eps)
    c2 = params['bn2_b'] - m2 * a2

    # row-tiled pass 2: normalize + residual add + relu
    cf = jnp.stack([a1, c1, a2, c2], axis=0)                        # (4, C)
    out = tail_normalize(y2, res, cf, tm=tm)                        # (M, C) f32
    return jnp.transpose(out.reshape(N, H, W, C), (0, 3, 1, 2))     # back to NCHW


# ---------------------------------------------------------------- reference
def reference_forward(params, x_nchw, eps=_BN_EPS):
    """Pure-XLA reference of the same train-mode forward.  Matches the kernel's
    dtype choices: conv input / residual and conv output y rounded through
    bf16; everything else f32."""
    x = jnp.transpose(x_nchw, (0, 2, 3, 1)).astype(jnp.float32)
    xb = x.astype(jnp.bfloat16).astype(jnp.float32)
    N, H, W, C = x.shape
    xp = jnp.pad(xb, ((0, 0), (1, 1), (1, 1), (0, 0)))
    w = params['conv1_w_tap'].astype(jnp.float32).reshape(3, 3, C, C)
    y = jnp.zeros((N, H, W, C), jnp.float32)
    for i in range(3):
        for j in range(3):
            y = y + jnp.einsum('nhwc,cd->nhwd', xp[:, i:i + H, j:j + W, :],
                               w[i, j], precision=lax.Precision.HIGHEST)
    y = y.astype(jnp.bfloat16).astype(jnp.float32)

    def bn(z, g, b):
        m = jnp.mean(z, axis=(0, 1, 2), keepdims=True)
        v = jnp.mean((z - m) ** 2, axis=(0, 1, 2), keepdims=True)  # biased (train)
        return (z - m) * lax.rsqrt(v + eps) * g + b

    t = jnp.maximum(bn(y, params['bn1_g'], params['bn1_b']), 0.0)
    z = bn(t, params['bn2_g'], params['bn2_b'])
    out = jnp.maximum(z + xb, 0.0)
    return jnp.transpose(out, (0, 3, 1, 2))


# --------------------------------------------------------------------- main
if __name__ == "__main__":
    key = jax.random.PRNGKey(0)
    k_w, k_x = jax.random.split(key)
    inplanes = planes = 128          # lane-dense channel count (multiple of 128)
    N, H, W = 2, 16, 16
    params = init_basic_block_params(k_w, inplanes, planes)
    x = jax.random.normal(k_x, (N, inplanes, H, W), jnp.float32)   # NCHW, like PyTorch

    fwd = jax.jit(basic_block_forward)
    out = jax.block_until_ready(fwd(params, x))
    assert out.shape == (N, planes, H, W)
    assert bool(jnp.all(jnp.isfinite(out)))

    ref = jax.block_until_ready(reference_forward(params, x))
    max_err = float(jnp.max(jnp.abs(out - ref)))
    assert max_err < 2e-2, f"mismatch vs reference: max abs err {max_err}"
    print("KERNEL_OK")
</pallas_src>

<mosaic_0001>
module attributes {stable_mosaic.version = 11 : i64} {
  func.func @_conv3x3_s1_kernel(%arg0: i32, %arg1: i32, %arg2: memref<1x18x18x128xbf16, #tpu.memory_space<vmem>>, %arg3: memref<3x384x128xbf16, #tpu.memory_space<vmem>>, %arg4: memref<1x256x128xbf16, #tpu.memory_space<vmem>>, %arg5: memref<1x2x128xf32, #tpu.memory_space<vmem>>, %arg6: memref<18x16x384xbf16, #tpu.memory_space<vmem>>, %arg7: memref<256x128xf32, #tpu.memory_space<vmem>>) attributes {dimension_semantics = [#tpu.dimension_semantics<parallel>, #tpu.dimension_semantics<parallel>], iteration_bounds = array<i64: 1, 2>, scalar_prefetch = 0 : i64, scratch_operands = 2 : i64, tpu.core_type = #tpu.core_type<tc>, window_params = [{transform_indices = @transform_0, window_bounds = array<i64: 1, 18, 18, 128>}, {transform_indices = @transform_1, window_bounds = array<i64: 3, 384, 128>}, {transform_indices = @transform_2, window_bounds = array<i64: 1, 256, 128>}, {transform_indices = @transform_3, window_bounds = array<i64: 1, 2, 128>}]} {
    %c0 = arith.constant 0 : index
    %c0_0 = arith.constant 0 : index
    %c0_1 = arith.constant 0 : index
    %c0_2 = arith.constant 0 : index
    %0 = vector.load %arg2[%c0, %c0_0, %c0_1, %c0_2] : memref<1x18x18x128xbf16, #tpu.memory_space<vmem>>, vector<1x18x16x128xbf16>
    %1 = vector.shape_cast %0 : vector<1x18x16x128xbf16> to vector<18x16x128xbf16>
    %c0_3 = arith.constant 0 : index
    %c0_4 = arith.constant 0 : index
    %c0_5 = arith.constant 0 : index
    %2 = vector.load %arg6[%c0_3, %c0_4, %c0_5] : memref<18x16x384xbf16, #tpu.memory_space<vmem>>, vector<18x16x128xbf16>
    tpu.vector_store %arg6[%c0_3, %c0_4, %c0_5], %1 {strides = array<i32>} : memref<18x16x384xbf16, #tpu.memory_space<vmem>>, vector<18x16x128xbf16>,
    %c0_6 = arith.constant 0 : index
    %c0_7 = arith.constant 0 : index
    %c1 = arith.constant 1 : index
    %c0_8 = arith.constant 0 : index
    %3 = vector.load %arg2[%c0_6, %c0_7, %c1, %c0_8] : memref<1x18x18x128xbf16, #tpu.memory_space<vmem>>, vector<1x18x16x128xbf16>
    %4 = vector.shape_cast %3 : vector<1x18x16x128xbf16> to vector<18x16x128xbf16>
    %c0_9 = arith.constant 0 : index
    %c0_10 = arith.constant 0 : index
    %c128 = arith.constant 128 : index
    %5 = vector.load %arg6[%c0_9, %c0_10, %c128] : memref<18x16x384xbf16, #tpu.memory_space<vmem>>, vector<18x16x128xbf16>
    tpu.vector_store %arg6[%c0_9, %c0_10, %c128], %4 {strides = array<i32>} : memref<18x16x384xbf16, #tpu.memory_space<vmem>>, vector<18x16x128xbf16>,
    %c0_11 = arith.constant 0 : index
    %c0_12 = arith.constant 0 : index
    %c2 = arith.constant 2 : index
    %c0_13 = arith.constant 0 : index
    %6 = vector.load %arg2[%c0_11, %c0_12, %c2, %c0_13] : memref<1x18x18x128xbf16, #tpu.memory_space<vmem>>, vector<1x18x16x128xbf16>
    %7 = vector.shape_cast %6 : vector<1x18x16x128xbf16> to vector<18x16x128xbf16>
    %c0_14 = arith.constant 0 : index
    %c0_15 = arith.constant 0 : index
    %c256 = arith.constant 256 : index
    %8 = vector.load %arg6[%c0_14, %c0_15, %c256] : memref<18x16x384xbf16, #tpu.memory_space<vmem>>, vector<18x16x128xbf16>
    tpu.vector_store %arg6[%c0_14, %c0_15, %c256], %7 {strides = array<i32>} : memref<18x16x384xbf16, #tpu.memory_space<vmem>>, vector<18x16x128xbf16>,
    %c0_16 = arith.constant 0 : index
    %c0_17 = arith.constant 0 : index
    %c0_18 = arith.constant 0 : index
    %9 = vector.load %arg6[%c0_16, %c0_17, %c0_18] : memref<18x16x384xbf16, #tpu.memory_space<vmem>>, vector<16x16x384xbf16>
    %10 = vector.shape_cast %9 : vector<16x16x384xbf16> to vector<256x384xbf16>
    %c0_19 = arith.constant 0 : index
    %c0_20 = arith.constant 0 : index
    %c0_21 = arith.constant 0 : index
    %11 = vector.load %arg3[%c0_19, %c0_20, %c0_21] : memref<3x384x128xbf16, #tpu.memory_space<vmem>>, vector<1x384x128xbf16>
    %12 = vector.shape_cast %11 : vector<1x384x128xbf16> to vector<384x128xbf16>
    %cst = arith.constant dense<0.000000e+00> : vector<256x128xf32>
    %13 = tpu.matmul %10, %12, %cst {dimension_numbers = #tpu.dot_dimension_numbers<[1], [0], [0], [1], [0, 0, 1, 1], [], []>} : vector<256x384xbf16>, vector<384x128xbf16>, vector<256x128xf32> -> vector<256x128xf32>
    %c0_22 = arith.constant 0 : index
    %c0_23 = arith.constant 0 : index
    %14 = vector.load %arg7[%c0_22, %c0_23] : memref<256x128xf32, #tpu.memory_space<vmem>>, vector<256x128xf32>
    tpu.vector_store %arg7[%c0_22, %c0_23], %13 {strides = array<i32>} : memref<256x128xf32, #tpu.memory_space<vmem>>, vector<256x128xf32>,
    %c1_24 = arith.constant 1 : index
    %c0_25 = arith.constant 0 : index
    %c0_26 = arith.constant 0 : index
    %15 = vector.load %arg6[%c1_24, %c0_25, %c0_26] : memref<18x16x384xbf16, #tpu.memory_space<vmem>>, vector<16x16x384xbf16>
    %16 = vector.shape_cast %15 : vector<16x16x384xbf16> to vector<256x384xbf16>
    %c1_27 = arith.constant 1 : index
    %c0_28 = arith.constant 0 : index
    %c0_29 = arith.constant 0 : index
    %17 = vector.load %arg3[%c1_27, %c0_28, %c0_29] : memref<3x384x128xbf16, #tpu.memory_space<vmem>>, vector<1x384x128xbf16>
    %18 = vector.shape_cast %17 : vector<1x384x128xbf16> to vector<384x128xbf16>
    %cst_30 = arith.constant dense<0.000000e+00> : vector<256x128xf32>
    %19 = tpu.matmul %16, %18, %cst_30 {dimension_numbers = #tpu.dot_dimension_numbers<[1], [0], [0], [1], [0, 0, 1, 1], [], []>} : vector<256x384xbf16>, vector<384x128xbf16>, vector<256x128xf32> -> vector<256x128xf32>
    %c0_31 = arith.constant 0 : index
    %c0_32 = arith.constant 0 : index
    %20 = vector.load %arg7[%c0_31, %c0_32] : memref<256x128xf32, #tpu.memory_space<vmem>>, vector<256x128xf32>
    %21 = arith.addf %20, %19 : vector<256x128xf32>
    %c0_33 = arith.constant 0 : index
    %c0_34 = arith.constant 0 : index
    %22 = vector.load %arg7[%c0_33, %c0_34] : memref<256x128xf32, #tpu.memory_space<vmem>>, vector<256x128xf32>
    tpu.vector_store %arg7[%c0_33, %c0_34], %21 {strides = array<i32>} : memref<256x128xf32, #tpu.memory_space<vmem>>, vector<256x128xf32>,
    %c2_35 = arith.constant 2 : index
    %c0_36 = arith.constant 0 : index
    %c0_37 = arith.constant 0 : index
    %23 = vector.load %arg6[%c2_35, %c0_36, %c0_37] : memref<18x16x384xbf16, #tpu.memory_space<vmem>>, vector<16x16x384xbf16>
    %24 = vector.shape_cast %23 : vector<16x16x384xbf16> to vector<256x384xbf16>
    %c2_38 = arith.constant 2 : index
    %c0_39 = arith.constant 0 : index
    %c0_40 = arith.constant 0 : index
    %25 = vector.load %arg3[%c2_38, %c0_39, %c0_40] : memref<3x384x128xbf16, #tpu.memory_space<vmem>>, vector<1x384x128xbf16>
    %26 = vector.shape_cast %25 : vector<1x384x128xbf16> to vector<384x128xbf16>
    %cst_41 = arith.constant dense<0.000000e+00> : vector<256x128xf32>
    %27 = tpu.matmul %24, %26, %cst_41 {dimension_numbers = #tpu.dot_dimension_numbers<[1], [0], [0], [1], [0, 0, 1, 1], [], []>} : vector<256x384xbf16>, vector<384x128xbf16>, vector<256x128xf32> -> vector<256x128xf32>
    %c0_42 = arith.constant 0 : index
    %c0_43 = arith.constant 0 : index
    %28 = vector.load %arg7[%c0_42, %c0_43] : memref<256x128xf32, #tpu.memory_space<vmem>>, vector<256x128xf32>
    %29 = arith.addf %28, %27 : vector<256x128xf32>
    %c0_44 = arith.constant 0 : index
    %c0_45 = arith.constant 0 : index
    %30 = vector.load %arg7[%c0_44, %c0_45] : memref<256x128xf32, #tpu.memory_space<vmem>>, vector<256x128xf32>
    tpu.vector_store %arg7[%c0_44, %c0_45], %29 {strides = array<i32>} : memref<256x128xf32, #tpu.memory_space<vmem>>, vector<256x128xf32>,
    %c0_46 = arith.constant 0 : index
    %c0_47 = arith.constant 0 : index
    %31 = vector.load %arg7[%c0_46, %c0_47] : memref<256x128xf32, #tpu.memory_space<vmem>>, vector<256x128xf32>
    %32 = arith.truncf %31 : vector<256x128xf32> to vector<256x128xbf16>
    %c0_48 = arith.constant 0 : index
    %c0_49 = arith.constant 0 : index
    %c0_50 = arith.constant 0 : index
    %33 = vector.load %arg4[%c0_48, %c0_49, %c0_50] : memref<1x256x128xbf16, #tpu.memory_space<vmem>>, vector<1x256x128xbf16>
    %34 = vector.shape_cast %33 : vector<1x256x128xbf16> to vector<256x128xbf16>
    %35 = vector.shape_cast %32 : vector<256x128xbf16> to vector<1x256x128xbf16>
    tpu.vector_store %arg4[%c0_48, %c0_49, %c0_50], %35 {strides = array<i32>} : memref<1x256x128xbf16, #tpu.memory_space<vmem>>, vector<1x256x128xbf16>,
    %36 = arith.extf %32 : vector<256x128xbf16> to vector<256x128xf32>
    %cst_51 = arith.constant dense<0.000000e+00> : vector<128xf32>
    %37 = vector.multi_reduction <add>, %36, %cst_51 [0] : vector<256x128xf32> to vector<128xf32>
    %38 = vector.shape_cast %37 : vector<128xf32> to vector<1x128xf32>
    %39 = arith.mulf %36, %36 : vector<256x128xf32>
    %cst_52 = arith.constant dense<0.000000e+00> : vector<128xf32>
    %40 = vector.multi_reduction <add>, %39, %cst_52 [0] : vector<256x128xf32> to vector<128xf32>
    %41 = vector.shape_cast %40 : vector<128xf32> to vector<1x128xf32>
    %42 = tpu.concatenate %38, %41 in 0 : vector<1x128xf32>, vector<1x128xf32> -> vector<2x128xf32>
    %c0_53 = arith.constant 0 : index
    %c0_54 = arith.constant 0 : index
    %c0_55 = arith.constant 0 : index
    %43 = vector.load %arg5[%c0_53, %c0_54, %c0_55] : memref<1x2x128xf32, #tpu.memory_space<vmem>>, vector<1x2x128xf32>
    %44 = vector.shape_cast %43 : vector<1x2x128xf32> to vector<2x128xf32>
    %45 = vector.shape_cast %42 : vector<2x128xf32> to vector<1x2x128xf32>
    tpu.vector_store %arg5[%c0_53, %c0_54, %c0_55], %45 {strides = array<i32>} : memref<1x2x128xf32, #tpu.memory_space<vmem>>, vector<1x2x128xf32>,
    return
  }
  func.func @transform_0(%arg0: i32, %arg1: i32) -> (i32, i32, i32, i32) {
    %c0_i32 = arith.constant 0 : i32
    %c0_i32_0 = arith.constant 0 : i32
    %c0_i32_1 = arith.constant 0 : i32
    %c0_i32_2 = arith.constant 0 : i32
    return %arg1, %c0_i32, %c0_i32_0, %c0_i32_1 : i32, i32, i32, i32
  }
  func.func @transform_1(%arg0: i32, %arg1: i32) -> (i32, i32, i32) {
    %c0_i32 = arith.constant 0 : i32
    %c0_i32_0 = arith.constant 0 : i32
    %c0_i32_1 = arith.constant 0 : i32
    return %c0_i32, %c0_i32_0, %arg0 : i32, i32, i32
  }
  func.func @transform_2(%arg0: i32, %arg1: i32) -> (i32, i32, i32) {
    %c0_i32 = arith.constant 0 : i32
    %c0_i32_0 = arith.constant 0 : i32
    return %arg1, %c0_i32, %arg0 : i32, i32, i32
  }
  func.func @transform_3(%arg0: i32, %arg1: i32) -> (i32, i32, i32) {
    %c0_i32 = arith.constant 0 : i32
    %c0_i32_0 = arith.constant 0 : i32
    return %arg1, %c0_i32, %arg0 : i32, i32, i32
  }
}

module attributes {stable_mosaic.version = 11 : i64} {
  func.func @_tail_stats_kernel(%arg0: i32, %arg1: i32, %arg2: memref<512x128xbf16, #tpu.memory_space<vmem>>, %arg3: memref<2x128xf32, #tpu.memory_space<vmem>>, %arg4: memref<2x128xf32, #tpu.memory_space<vmem>>) attributes {dimension_semantics = [#tpu.dimension_semantics<parallel>, #tpu.dimension_semantics<arbitrary>], iteration_bounds = array<i64: 1, 1>, scalar_prefetch = 0 : i64, scratch_operands = 0 : i64, tpu.core_type = #tpu.core_type<tc>, window_params = [{transform_indices = @transform_0, window_bounds = array<i64: 512, 128>}, {transform_indices = @transform_1, window_bounds = array<i64: 2, 128>}, {transform_indices = @transform_2, window_bounds = array<i64: 2, 128>}]} {
    %c0_i32 = arith.constant 0 : i32
    %0 = arith.cmpi eq, %arg1, %c0_i32 : i32
    %1 = arith.extui %0 : i1 to i32
    %c0_i32_0 = arith.constant 0 : i32
    %2 = arith.cmpi ne, %1, %c0_i32_0 : i32
    scf.if %2 {
      %cst_11 = arith.constant 0.000000e+00 : f32
      %22 = vector.broadcast %cst_11 : f32 to vector<2x128xf32>
      %c0_12 = arith.constant 0 : index
      %c0_13 = arith.constant 0 : index
      %23 = vector.load %arg4[%c0_12, %c0_13] : memref<2x128xf32, #tpu.memory_space<vmem>>, vector<2x128xf32>
      tpu.vector_store %arg4[%c0_12, %c0_13], %22 {strides = array<i32>} : memref<2x128xf32, #tpu.memory_space<vmem>>, vector<2x128xf32>,
    } else {
    }
    %c0 = arith.constant 0 : index
    %c0_1 = arith.constant 0 : index
    %3 = vector.load %arg2[%c0, %c0_1] : memref<512x128xbf16, #tpu.memory_space<vmem>>, vector<512x128xbf16>
    %4 = arith.extf %3 : vector<512x128xbf16> to vector<512x128xf32>
    %c0_2 = arith.constant 0 : index
    %c0_3 = arith.constant 0 : index
    %5 = vector.load %arg3[%c0_2, %c0_3] : memref<2x128xf32, #tpu.memory_space<vmem>>, vector<1x128xf32>
    %6 = vector.broadcast %5 : vector<1x128xf32> to vector<512x128xf32>
    %7 = arith.mulf %4, %6 : vector<512x128xf32>
    %c1 = arith.constant 1 : index
    %c0_4 = arith.constant 0 : index
    %8 = vector.load %arg3[%c1, %c0_4] : memref<2x128xf32, #tpu.memory_space<vmem>>, vector<1x128xf32>
    %9 = vector.broadcast %8 : vector<1x128xf32> to vector<512x128xf32>
    %10 = arith.addf %7, %9 : vector<512x128xf32>
    %cst = arith.constant 0.000000e+00 : f32
    %11 = vector.broadcast %cst : f32 to vector<512x128xf32>
    %12 = arith.maximumf %10, %11 : vector<512x128xf32>
    %c0_5 = arith.constant 0 : index
    %c0_6 = arith.constant 0 : index
    %13 = vector.load %arg4[%c0_5, %c0_6] : memref<2x128xf32, #tpu.memory_space<vmem>>, vector<2x128xf32>
    %cst_7 = arith.constant dense<0.000000e+00> : vector<128xf32>
    %14 = vector.multi_reduction <add>, %12, %cst_7 [0] : vector<512x128xf32> to vector<128xf32>
    %15 = vector.shape_cast %14 : vector<128xf32> to vector<1x128xf32>
    %16 = arith.mulf %12, %12 : vector<512x128xf32>
    %cst_8 = arith.constant dense<0.000000e+00> : vector<128xf32>
    %17 = vector.multi_reduction <add>, %16, %cst_8 [0] : vector<512x128xf32> to vector<128xf32>
    %18 = vector.shape_cast %17 : vector<128xf32> to vector<1x128xf32>
    %19 = tpu.concatenate %15, %18 in 0 : vector<1x128xf32>, vector<1x128xf32> -> vector<2x128xf32>
    %20 = arith.addf %13, %19 : vector<2x128xf32>
    %c0_9 = arith.constant 0 : index
    %c0_10 = arith.constant 0 : index
    %21 = vector.load %arg4[%c0_9, %c0_10] : memref<2x128xf32, #tpu.memory_space<vmem>>, vector<2x128xf32>
    tpu.vector_store %arg4[%c0_9, %c0_10], %20 {strides = array<i32>} : memref<2x128xf32, #tpu.memory_space<vmem>>, vector<2x128xf32>,
    return
  }
  func.func @transform_0(%arg0: i32, %arg1: i32) -> (i32, i32) {
    %c0_i32 = arith.constant 0 : i32
    return %arg1, %arg0 : i32, i32
  }
  func.func @transform_1(%arg0: i32, %arg1: i32) -> (i32, i32) {
    %c0_i32 = arith.constant 0 : i32
    %c0_i32_0 = arith.constant 0 : i32
    return %c0_i32, %arg0 : i32, i32
  }
  func.func @transform_2(%arg0: i32, %arg1: i32) -> (i32, i32) {
    %c0_i32 = arith.constant 0 : i32
    %c0_i32_0 = arith.constant 0 : i32
    return %c0_i32, %arg0 : i32, i32
  }
}

module attributes {stable_mosaic.version = 11 : i64} {
  func.func @_tail_norm_kernel(%arg0: i32, %arg1: i32, %arg2: memref<512x128xbf16, #tpu.memory_space<vmem>>, %arg3: memref<512x128xbf16, #tpu.memory_space<vmem>>, %arg4: memref<4x128xf32, #tpu.memory_space<vmem>>, %arg5: memref<512x128xf32, #tpu.memory_space<vmem>>) attributes {dimension_semantics = [#tpu.dimension_semantics<parallel>, #tpu.dimension_semantics<parallel>], iteration_bounds = array<i64: 1, 1>, scalar_prefetch = 0 : i64, scratch_operands = 0 : i64, tpu.core_type = #tpu.core_type<tc>, window_params = [{transform_indices = @transform_0, window_bounds = array<i64: 512, 128>}, {transform_indices = @transform_1, window_bounds = array<i64: 512, 128>}, {transform_indices = @transform_2, window_bounds = array<i64: 4, 128>}, {transform_indices = @transform_3, window_bounds = array<i64: 512, 128>}]} {
    %c0 = arith.constant 0 : index
    %c0_0 = arith.constant 0 : index
    %0 = vector.load %arg2[%c0, %c0_0] : memref<512x128xbf16, #tpu.memory_space<vmem>>, vector<512x128xbf16>
    %1 = arith.extf %0 : vector<512x128xbf16> to vector<512x128xf32>
    %c0_1 = arith.constant 0 : index
    %c0_2 = arith.constant 0 : index
    %2 = vector.load %arg4[%c0_1, %c0_2] : memref<4x128xf32, #tpu.memory_space<vmem>>, vector<1x128xf32>
    %3 = vector.broadcast %2 : vector<1x128xf32> to vector<512x128xf32>
    %4 = arith.mulf %1, %3 : vector<512x128xf32>
    %c1 = arith.constant 1 : index
    %c0_3 = arith.constant 0 : index
    %5 = vector.load %arg4[%c1, %c0_3] : memref<4x128xf32, #tpu.memory_space<vmem>>, vector<1x128xf32>
    %6 = vector.broadcast %5 : vector<1x128xf32> to vector<512x128xf32>
    %7 = arith.addf %4, %6 : vector<512x128xf32>
    %cst = arith.constant 0.000000e+00 : f32
    %8 = vector.broadcast %cst : f32 to vector<512x128xf32>
    %9 = arith.maximumf %7, %8 : vector<512x128xf32>
    %c2 = arith.constant 2 : index
    %c0_4 = arith.constant 0 : index
    %10 = vector.load %arg4[%c2, %c0_4] : memref<4x128xf32, #tpu.memory_space<vmem>>, vector<1x128xf32>
    %11 = vector.broadcast %10 : vector<1x128xf32> to vector<512x128xf32>
    %12 = arith.mulf %9, %11 : vector<512x128xf32>
    %c3 = arith.constant 3 : index
    %c0_5 = arith.constant 0 : index
    %13 = vector.load %arg4[%c3, %c0_5] : memref<4x128xf32, #tpu.memory_space<vmem>>, vector<1x128xf32>
    %14 = vector.broadcast %13 : vector<1x128xf32> to vector<512x128xf32>
    %15 = arith.addf %12, %14 : vector<512x128xf32>
    %c0_6 = arith.constant 0 : index
    %c0_7 = arith.constant 0 : index
    %16 = vector.load %arg3[%c0_6, %c0_7] : memref<512x128xbf16, #tpu.memory_space<vmem>>, vector<512x128xbf16>
    %17 = arith.extf %16 : vector<512x128xbf16> to vector<512x128xf32>
    %18 = arith.addf %15, %17 : vector<512x128xf32>
    %cst_8 = arith.constant 0.000000e+00 : f32
    %19 = vector.broadcast %cst_8 : f32 to vector<512x128xf32>
    %20 = arith.maximumf %18, %19 : vector<512x128xf32>
    %c0_9 = arith.constant 0 : index
    %c0_10 = arith.constant 0 : index
    %21 = vector.load %arg5[%c0_9, %c0_10] : memref<512x128xf32, #tpu.memory_space<vmem>>, vector<512x128xf32>
    tpu.vector_store %arg5[%c0_9, %c0_10], %20 {strides = array<i32>} : memref<512x128xf32, #tpu.memory_space<vmem>>, vector<512x128xf32>,
    return
  }
  func.func @transform_0(%arg0: i32, %arg1: i32) -> (i32, i32) {
    %c0_i32 = arith.constant 0 : i32
    return %arg0, %arg1 : i32, i32
  }
  func.func @transform_1(%arg0: i32, %arg1: i32) -> (i32, i32) {
    %c0_i32 = arith.constant 0 : i32
    return %arg0, %arg1 : i32, i32
  }
  func.func @transform_2(%arg0: i32, %arg1: i32) -> (i32, i32) {
    %c0_i32 = arith.constant 0 : i32
    %c0_i32_0 = arith.constant 0 : i32
    return %c0_i32, %arg1 : i32, i32
  }
  func.func @transform_3(%arg0: i32, %arg1: i32) -> (i32, i32) {
    %c0_i32 = arith.constant 0 : i32
    return %arg0, %arg1 : i32, i32
  }
}

</mosaic_0001>

<bundles_post_ra>
// kernel: basic_block_forward.4
= control target key start
LH: loop header
LB: loop body
LE: loop exit
PB: predicated region body
PF: predicated region fallthrough
CT: control target
= control target key end

     0   :  { %v719_v0 = vmov 0.0   ;;  %vm549_vm0 = vcmask 1040384   ;;  %s1075_s2 = inlined_call_operand.vmem [shape: f32[2,128], index: 2, kind: output, shape index: {}]   ;;  %s1076_s0 = inlined_call_operand.vmem [shape: bf16[512,128], index: 0, kind: input, shape index: {}]   ;;  %s1077_s1 = inlined_call_operand.vmem [shape: f32[2,128], index: 1, kind: input, shape index: {}]  }
   0x1   :  { %15 = vst [vmem:[%s1075_s2] sm:$0x3] %v719_v0  ;;  %v703_v1 = vld [vmem:[%s1076_s0 + $0x88] sm:$0xff]   ;;  %v704_v2 = vld [vmem:[%s1076_s0 + $0x90] sm:$0xff]   ;;  %v705_v3 = vld [vmem:[%s1076_s0 + $0x98] sm:$0xff]  }
   0x2   :  { %v706_v4 = vld [vmem:[%s1076_s0 + $0xa0] sm:$0xff]   ;;  %v707_v5 = vld [vmem:[%s1076_s0 + $0xa8] sm:$0xff]   ;;  %v708_v6 = vld [vmem:[%s1076_s0 + $0xb0] sm:$0xff]   ;;  %v629_v7 = vunpack.c.l.bf16 %v703_v1  ;;  %v630_v8 = vunpack.c.h.bf16 %v703_v1  ;;  %v633_v9 = vunpack.c.l.bf16 %v704_v2  ;;  %v634_v10 = vunpack.c.h.bf16 %v704_v2 }
   0x3   :  { %v709_v11 = vld [vmem:[%s1076_s0 + $0xb8] sm:$0xff]   ;;  %v710_v12 = vld [vmem:[%s1076_s0 + $0xc0] sm:$0xff]   ;;  %v637_v13 = vunpack.c.l.bf16 %v705_v3  ;;  %v638_v14 = vunpack.c.h.bf16 %v705_v3  ;;  %v641_v15 = vunpack.c.l.bf16 %v706_v4  ;;  %v642_v16 = vunpack.c.h.bf16 %v706_v4  ;;  %v711_v17 = vld [vmem:[%s1076_s0 + $0xc8] sm:$0xff]  }
   0x4   :  { %v712_v18 = vld [vmem:[%s1076_s0 + $0xd0] sm:$0xff]   ;;  %v645_v19 = vunpack.c.l.bf16 %v707_v5  ;;  %v646_v20 = vunpack.c.h.bf16 %v707_v5  ;;  %v649_v21 = vunpack.c.l.bf16 %v708_v6  ;;  %v650_v22 = vunpack.c.h.bf16 %v708_v6  ;;  %v713_v23 = vld [vmem:[%s1076_s0 + $0xd8] sm:$0xff]   ;;  %v714_v24 = vld [vmem:[%s1076_s0 + $0xe0] sm:$0xff]  }
   0x5   :  { %v653_v25 = vunpack.c.l.bf16 %v709_v11  ;;  %v654_v26 = vunpack.c.h.bf16 %v709_v11  ;;  %v657_v27 = vunpack.c.l.bf16 %v710_v12  ;;  %v658_v28 = vunpack.c.h.bf16 %v710_v12  ;;  %v715_v29 = vld [vmem:[%s1076_s0 + $0xe8] sm:$0xff]   ;;  %v716_v30 = vld [vmem:[%s1076_s0 + $0xf0] sm:$0xff]   ;;  %v717_v35 = vld [vmem:[%s1076_s0 + $0xf8] sm:$0xff]  }
   0x6   :  { %v661_v31 = vunpack.c.l.bf16 %v711_v17  ;;  %v662_v32 = vunpack.c.h.bf16 %v711_v17  ;;  %v665_v33 = vunpack.c.l.bf16 %v712_v18  ;;  %v666_v34 = vunpack.c.h.bf16 %v712_v18  ;;  %v786_v44 = vld [vmem:[%s1077_s1] ss:$0 sm:$0xff] }
   0x7   :  { %v669_v36 = vunpack.c.l.bf16 %v713_v23  ;;  %v670_v37 = vunpack.c.h.bf16 %v713_v23  ;;  %v673_v38 = vunpack.c.l.bf16 %v714_v24  ;;  %v674_v39 = vunpack.c.h.bf16 %v714_v24 }
   0x8   :  { %v677_v40 = vunpack.c.l.bf16 %v715_v29  ;;  %v678_v41 = vunpack.c.h.bf16 %v715_v29  ;;  %v681_v42 = vunpack.c.l.bf16 %v716_v30  ;;  %v682_v43 = vunpack.c.h.bf16 %v716_v30 }
   0x9   :  { %v685_v45 = vunpack.c.l.bf16 %v717_v35  ;;  %v686_v46 = vunpack.c.h.bf16 %v717_v35  ;;  %v183_v47 = vmul.f32 %v629_v7, %v786_v44  ;;  %v184_v48 = vmul.f32 %v630_v8, %v786_v44 }
   0xa   :  { %v185_v49 = vmul.f32 %v633_v9, %v786_v44  ;;  %v186_v50 = vmul.f32 %v634_v10, %v786_v44  ;;  %v187_v51 = vmul.f32 %v637_v13, %v786_v44  ;;  %v188_v52 = vmul.f32 %v638_v14, %v786_v44  ;;  %v817_v9 = vld [vmem:[%s1076_s0 + $0x80] sm:$0xff]  }
   0xb   :  { %v189_v53 = vmul.f32 %v641_v15, %v786_v44  ;;  %v190_v54 = vmul.f32 %v642_v16, %v786_v44  ;;  %v191_v55 = vmul.f32 %v645_v19, %v786_v44  ;;  %v192_v56 = vmul.f32 %v646_v20, %v786_v44  ;;  %v828_v16 = vld [vmem:[%s1077_s1 + $0x1] ss:$0 sm:$0xff] }
   0xc   :  { %v193_v57 = vmul.f32 %v649_v21, %v786_v44  ;;  %v194_v58 = vmul.f32 %v650_v22, %v786_v44  ;;  %v195_v59 = vmul.f32 %v653_v25, %v786_v44  ;;  %v196_v60 = vmul.f32 %v654_v26, %v786_v44 }
   0xd   :  { %v197_v61 = vmul.f32 %v657_v27, %v786_v44  ;;  %v198_v62 = vmul.f32 %v658_v28, %v786_v44  ;;  %v199_v63 = vmul.f32 %v661_v31, %v786_v44  ;;  %v200_v0 = vmul.f32 %v662_v32, %v786_v44 }
   0xe   :  { %v201_v1 = vmul.f32 %v665_v33, %v786_v44  ;;  %v202_v2 = vmul.f32 %v666_v34, %v786_v44  ;;  %v203_v3 = vmul.f32 %v669_v36, %v786_v44  ;;  %v204_v4 = vmul.f32 %v670_v37, %v786_v44 }
   0xf   :  { %v205_v5 = vmul.f32 %v673_v38, %v786_v44  ;;  %v206_v6 = vmul.f32 %v674_v39, %v786_v44  ;;  %v207_v7 = vmul.f32 %v677_v40, %v786_v44  ;;  %v208_v8 = vmul.f32 %v678_v41, %v786_v44 }
  0x10   :  { %v209_v10 = vmul.f32 %v681_v42, %v786_v44  ;;  %v210_v11 = vmul.f32 %v682_v43, %v786_v44  ;;  %v211_v12 = vmul.f32 %v685_v45, %v786_v44  ;;  %v212_v13 = vmul.f32 %v686_v46, %v786_v44  ;;  %v560_v45 = vld [vmem:[%s1076_s0] sm:$0xff]  }
  0x11   :  { %v626_v14 = vunpack.c.h.bf16 %v817_v9  ;;  %v834_v18 = vadd.f32 %v828_v16, %v183_v47  ;;  %v837_v19 = vadd.f32 %v828_v16, %v184_v48  ;;  %v840_v20 = vadd.f32 %v828_v16, %v185_v49 }
  0x12   :  { %v843_v21 = vadd.f32 %v828_v16, %v186_v50  ;;  %v846_v22 = vadd.f32 %v828_v16, %v187_v51  ;;  %v849_v23 = vadd.f32 %v828_v16, %v188_v52  ;;  %v852_v24 = vadd.f32 %v828_v16, %v189_v53  ;;  %v687_v50 = vld [vmem:[%s1076_s0 + $0x8] sm:$0xff]  }
  0x13   :  { %v182_v15 = vmul.f32 %v626_v14, %v786_v44  ;;  %v855_v25 = vadd.f32 %v828_v16, %v190_v54  ;;  %v858_v26 = vadd.f32 %v828_v16, %v191_v55  ;;  %v861_v27 = vadd.f32 %v828_v16, %v192_v56  ;;  %v688_v54 = vld [vmem:[%s1076_s0 + $0x10] sm:$0xff]  }
  0x14   :  { %v864_v28 = vadd.f32 %v828_v16, %v193_v57  ;;  %v867_v29 = vadd.f32 %v828_v16, %v194_v58  ;;  %v870_v30 = vadd.f32 %v828_v16, %v195_v59  ;;  %v873_v31 = vadd.f32 %v828_v16, %v196_v60  ;;  %v689_v60 = vld [vmem:[%s1076_s0 + $0x18] sm:$0xff]  }
  0x15   :  { %v831_v17 = vadd.f32 %v828_v16, %v182_v15  ;;  %v876_v32 = vadd.f32 %v828_v16, %v197_v61  ;;  %v879_v33 = vadd.f32 %v828_v16, %v198_v62  ;;  %v882_v34 = vadd.f32 %v828_v16, %v199_v63 }
  0x16   :  { %v885_v35 = vadd.f32 %v828_v16, %v200_v0  ;;  %v888_v36 = vadd.f32 %v828_v16, %v201_v1  ;;  %v891_v37 = vadd.f32 %v828_v16, %v202_v2  ;;  %v894_v38 = vadd.f32 %v828_v16, %v203_v3  ;;  %v690_v2 = vld [vmem:[%s1076_s0 + $0x20] sm:$0xff]  }
  0x17   :  { %v897_v39 = vadd.f32 %v828_v16, %v204_v4  ;;  %v900_v40 = vadd.f32 %v828_v16, %v205_v5  ;;  %v903_v41 = vadd.f32 %v828_v16, %v206_v6  ;;  %v906_v42 = vadd.f32 %v828_v16, %v207_v7 }
  0x18   :  { %v909_v43 = vadd.f32 %v828_v16, %v208_v8  ;;  %v915_v46 = vadd.f32 %v828_v16, %v209_v10  ;;  %v918_v47 = vadd.f32 %v828_v16, %v210_v11  ;;  %v921_v48 = vadd.f32 %v828_v16, %v211_v12  ;;  %v691_v12 = vld [vmem:[%s1076_s0 + $0x28] sm:$0xff]  }
  0x19   :  { %1078 = vst [vmem:[#allocation2_spill] sm:$0xff] %v903_v41  ;;  %1079 = vst [vmem:[#allocation3_spill] sm:$0xff] %v906_v42  ;;  %v924_v49 = vadd.f32 %v828_v16, %v212_v13  ;;  %v561_v51 = vunpack.c.l.bf16 %v560_v45  ;;  %v562_v52 = vunpack.c.h.bf16 %v560_v45  ;;  %v565_v53 = vunpack.c.l.bf16 %v687_v50 }
  0x1a   :  { %1080 = vst [vmem:[#allocation4_spill] sm:$0xff] %v909_v43  ;;  %1081 = vst [vmem:[#allocation5_spill] sm:$0xff] %v915_v46  ;;  %v566_v55 = vunpack.c.h.bf16 %v687_v50  ;;  %v569_v58 = vunpack.c.l.bf16 %v688_v54  ;;  %v570_v61 = vunpack.c.h.bf16 %v688_v54  ;;  %v573_v1 = vunpack.c.l.bf16 %v689_v60 }
  0x1b   :  { %1082 = vst [vmem:[#allocation6_spill] sm:$0xff] %v918_v47  ;;  %1083 = vst [vmem:[#allocation7_spill] sm:$0xff] %v921_v48  ;;  %v149_v56 = vmul.f32 %v561_v51, %v786_v44  ;;  %v150_v57 = vmul.f32 %v562_v52, %v786_v44  ;;  %v151_v59 = vmul.f32 %v565_v53, %v786_v44  ;;  %v574_v5 = vunpack.c.h.bf16 %v689_v60 }
  0x1c   :  { %1084 = vst [vmem:[#allocation8_spill] sm:$0xff] %v924_v49  ;;  %v152_v62 = vmul.f32 %v566_v55, %v786_v44  ;;  %v153_v3 = vmul.f32 %v569_v58, %v786_v44  ;;  %v154_v6 = vmul.f32 %v570_v61, %v786_v44  ;;  %v577_v11 = vunpack.c.l.bf16 %v690_v2 }
  0x1d   :  { %v218_v63 = vadd.f32 %v828_v16, %v149_v56  ;;  %v219_v0 = vadd.f32 %v828_v16, %v150_v57  ;;  %v220_v4 = vadd.f32 %v828_v16, %v151_v59  ;;  %v155_v13 = vmul.f32 %v573_v1, %v786_v44  ;;  %v692_v56 = vld [vmem:[%s1076_s0 + $0x30] sm:$0xff]  }
  0x1e   :  { %v221_v7 = vadd.f32 %v828_v16, %v152_v62  ;;  %v222_v14 = vadd.f32 %v828_v16, %v153_v3  ;;  %v578_v50 = vunpack.c.h.bf16 %v690_v2  ;;  %v156_v51 = vmul.f32 %v574_v5, %v786_v44  ;;  %v693_v3 = vld [vmem:[%s1076_s0 + $0x38] sm:$0xff]  }
  0x1f   :  { %v282_v8 = vmax.f32 %v218_v63, 0.0  ;;  %v283_v10 = vmax.f32 %v219_v0, 0.0  ;;  %v284_v15 = vmax.f32 %v220_v4, 0.0  ;;  %v223_v52 = vadd.f32 %v828_v16, %v154_v6 }
  0x20   :  { %v285_v53 = vmax.f32 %v221_v7, 0.0  ;;  %v581_v55 = vunpack.c.l.bf16 %v691_v12  ;;  %v157_v57 = vmul.f32 %v577_v11, %v786_v44  ;;  %v224_v58 = vadd.f32 %v828_v16, %v155_v13 }
  0x21   :  { %v347_v45 = vadd.f32 %v283_v10, %v282_v8  ;;  %v286_v59 = vmax.f32 %v222_v14, 0.0  ;;  %v582_v61 = vunpack.c.h.bf16 %v691_v12  ;;  %v158_v62 = vmul.f32 %v578_v50, %v786_v44 }
  0x22   :  { %v225_v63 = vadd.f32 %v828_v16, %v156_v51  ;;  %v287_v0 = vmax.f32 %v223_v52, 0.0  ;;  %v585_v2 = vunpack.c.l.bf16 %v692_v56  ;;  %v159_v4 = vmul.f32 %v581_v55, %v786_v44  ;;  %v694_v51 = vld [vmem:[%s1076_s0 + $0x40] sm:$0xff]  }
  0x23   :  { %v348_v54 = vadd.f32 %v347_v45, %v284_v15  ;;  %v226_v5 = vadd.f32 %v828_v16, %v157_v57  ;;  %v288_v6 = vmax.f32 %v224_v58, 0.0  ;;  %v586_v11 = vunpack.c.h.bf16 %v692_v56 }
  0x24   :  { %v160_v12 = vmul.f32 %v582_v61, %v786_v44  ;;  %v227_v13 = vadd.f32 %v828_v16, %v158_v62  ;;  %v289_v14 = vmax.f32 %v225_v63, 0.0  ;;  %v589_v50 = vunpack.c.l.bf16 %v693_v3 }
  0x25   :  { %v349_v60 = vadd.f32 %v348_v54, %v285_v53  ;;  %v161_v52 = vmul.f32 %v585_v2, %v786_v44  ;;  %v228_v54 = vadd.f32 %v828_v16, %v159_v4  ;;  %v290_v55 = vmax.f32 %v226_v5, 0.0  ;;  %v695_v2 = vld [vmem:[%s1076_s0 + $0x48] sm:$0xff]  }
  0x26   :  { %v590_v58 = vunpack.c.h.bf16 %v693_v3  ;;  %v162_v56 = vmul.f32 %v586_v11, %v786_v44  ;;  %v291_v61 = vmax.f32 %v227_v13, 0.0  ;;  %v416_v63 = vmul.f32 %v282_v8, %v282_v8 }
  0x27   :  { %v350_v1 = vadd.f32 %v349_v60, %v286_v59  ;;  %v229_v60 = vadd.f32 %v828_v16, %v160_v12  ;;  %v163_v49 = vmul.f32 %v589_v50, %v786_v44  ;;  %v230_v4 = vadd.f32 %v828_v16, %v161_v52  ;;  %v696_v52 = vld [vmem:[%s1076_s0 + $0x50] sm:$0xff]  }
  0x28   :  { %v292_v5 = vmax.f32 %v228_v54, 0.0  ;;  %v418_v3 = vmul.f32 %v284_v15, %v284_v15  ;;  %v594_v48 = vunpack.c.h.bf16 %v694_v51  ;;  %v164_v11 = vmul.f32 %v590_v58, %v786_v44 }
  0x29   :  { %v351_v7 = vadd.f32 %v350_v1, %v287_v0  ;;  %v417_v1 = vmul.f32 %v283_v10, %v283_v10  ;;  %v231_v12 = vadd.f32 %v828_v16, %v162_v56  ;;  %v293_v13 = vmax.f32 %v229_v60, 0.0 }
  0x2a   :  { %v419_v10 = vmul.f32 %v285_v53, %v285_v53  ;;  %v597_v47 = vunpack.c.l.bf16 %v695_v2  ;;  %v232_v46 = vadd.f32 %v828_v16, %v163_v49  ;;  %v294_v54 = vmax.f32 %v230_v4, 0.0  ;;  %v697_v4 = vld [vmem:[%s1076_s0 + $0x58] sm:$0xff]  }
  0x2b   :  { %v352_v45 = vadd.f32 %v351_v7, %v288_v6  ;;  %v593_v7 = vunpack.c.l.bf16 %v694_v51  ;;  %v420_v51 = vmul.f32 %v286_v59, %v286_v59  ;;  %v598_v58 = vunpack.c.h.bf16 %v695_v2 }
  0x2c   :  { %v166_v56 = vmul.f32 %v594_v48, %v786_v44  ;;  %v233_v60 = vadd.f32 %v828_v16, %v164_v11  ;;  %v295_v53 = vmax.f32 %v231_v12, 0.0  ;;  %v167_v49 = vmul.f32 %v597_v47, %v786_v44 }
  0x2d   :  { %v353_v57 = vadd.f32 %v352_v45, %v289_v14  ;;  %v165_v50 = vmul.f32 %v593_v7, %v786_v44  ;;  %v601_v7 = vunpack.c.l.bf16 %v696_v52  ;;  %v296_v59 = vmax.f32 %v232_v46, 0.0  ;;  %v698_v46 = vld [vmem:[%s1076_s0 + $0x60] sm:$0xff]  }
  0x2e   :  { %v422_v2 = vmul.f32 %v288_v6, %v288_v6  ;;  %v602_v48 = vunpack.c.h.bf16 %v696_v52  ;;  %v168_v11 = vmul.f32 %v598_v58, %v786_v44  ;;  %v235_v12 = vadd.f32 %v828_v16, %v166_v56 }
  0x2f   :  { %v354_v62 = vadd.f32 %v353_v57, %v290_v55  ;;  %v480_v57 = vadd.f32 %v417_v1, %v416_v63  ;;  %v421_v1 = vmul.f32 %v287_v0, %v287_v0  ;;  %v234_v43 = vadd.f32 %v828_v16, %v165_v50 }
  0x30   :  { %v297_v0 = vmax.f32 %v233_v60, 0.0  ;;  %v605_v47 = vunpack.c.l.bf16 %v697_v4  ;;  %v169_v50 = vmul.f32 %v601_v7, %v786_v44  ;;  %v424_v52 = vmul.f32 %v290_v55, %v290_v55 }
  0x31   :  { %v355_v45 = vadd.f32 %v354_v62, %v291_v61  ;;  %v481_v62 = vadd.f32 %v480_v57, %v418_v3  ;;  %v423_v57 = vmul.f32 %v289_v14, %v289_v14  ;;  %v298_v6 = vmax.f32 %v234_v43, 0.0  ;;  %v699_v43 = vld [vmem:[%s1076_s0 + $0x68] sm:$0xff]  }
  0x32   :  { %v606_v58 = vunpack.c.h.bf16 %v697_v4  ;;  %v170_v56 = vmul.f32 %v602_v48, %v786_v44  ;;  %v237_v60 = vadd.f32 %v828_v16, %v168_v11  ;;  %v299_v14 = vmax.f32 %v235_v12, 0.0 }
  0x33   :  { %v356_v8 = vadd.f32 %v355_v45, %v292_v5  ;;  %v482_v45 = vadd.f32 %v481_v62, %v419_v10  ;;  %v236_v62 = vadd.f32 %v828_v16, %v167_v49  ;;  %v609_v7 = vunpack.c.l.bf16 %v698_v46 }
  0x34   :  { %v171_v49 = vmul.f32 %v605_v47, %v786_v44  ;;  %v426_v4 = vmul.f32 %v292_v5, %v292_v5  ;;  %v610_v48 = vunpack.c.h.bf16 %v698_v46  ;;  %v172_v11 = vmul.f32 %v606_v58, %v786_v44 }
  0x35   :  { %v357_v15 = vadd.f32 %v356_v8, %v293_v13  ;;  %v483_v8 = vadd.f32 %v482_v45, %v420_v51  ;;  %v425_v45 = vmul.f32 %v291_v61, %v291_v61  ;;  %v300_v55 = vmax.f32 %v236_v62, 0.0  ;;  %v700_v62 = vld [vmem:[%s1076_s0 + $0x70] sm:$0xff]  }
  0x36   :  { %v239_v12 = vadd.f32 %v828_v16, %v170_v56  ;;  %v301_v61 = vmax.f32 %v237_v60, 0.0  ;;  %v613_v47 = vunpack.c.l.bf16 %v699_v43  ;;  %v428_v46 = vmul.f32 %v294_v54, %v294_v54 }
  0x37   :  { %v358_v63 = vadd.f32 %v357_v15, %v294_v54  ;;  %v484_v15 = vadd.f32 %v483_v8, %v421_v1  ;;  %v238_v8 = vadd.f32 %v828_v16, %v169_v50  ;;  %v173_v50 = vmul.f32 %v609_v7, %v786_v44 }
  0x38   :  { %v614_v58 = vunpack.c.h.bf16 %v699_v43  ;;  %v174_v56 = vmul.f32 %v610_v48, %v786_v44  ;;  %v241_v60 = vadd.f32 %v828_v16, %v172_v11  ;;  %v617_v7 = vunpack.c.l.bf16 %v700_v62 }
  0x39   :  { %v359_v3 = vadd.f32 %v358_v63, %v295_v53  ;;  %v485_v63 = vadd.f32 %v484_v15, %v422_v2  ;;  %v427_v15 = vmul.f32 %v293_v13, %v293_v13  ;;  %v302_v5 = vmax.f32 %v238_v8, 0.0  ;;  %v701_v8 = vld [vmem:[%s1076_s0 + $0x78] sm:$0xff]  }
  0x3a   :  { %v303_v13 = vmax.f32 %v239_v12, 0.0  ;;  %v430_v43 = vmul.f32 %v296_v59, %v296_v59  ;;  %v618_v48 = vunpack.c.h.bf16 %v700_v62  ;;  %v176_v11 = vmul.f32 %v614_v58, %v786_v44 }
  0x3b   :  { %v360_v10 = vadd.f32 %v359_v3, %v296_v59  ;;  %v486_v3 = vadd.f32 %v485_v63, %v423_v57  ;;  %v240_v63 = vadd.f32 %v828_v16, %v171_v49  ;;  %v175_v49 = vmul.f32 %v613_v47, %v786_v44 }
  0x3c   :  { %v243_v12 = vadd.f32 %v828_v16, %v174_v56  ;;  %v621_v47 = vunpack.c.l.bf16 %v701_v8  ;;  %v622_v59 = vunpack.c.h.bf16 %v701_v8  ;;  %v178_v62 = vmul.f32 %v618_v48, %v786_v44 }
  0x3d   :  { %v361_v51 = vadd.f32 %v360_v10, %v297_v0  ;;  %v487_v10 = vadd.f32 %v486_v3, %v424_v52  ;;  %v429_v3 = vmul.f32 %v295_v53, %v295_v53  ;;  %v304_v54 = vmax.f32 %v240_v63, 0.0 }
  0x3e   :  { %v305_v53 = vmax.f32 %v241_v60, 0.0  ;;  %v432_v63 = vmul.f32 %v298_v6, %v298_v6  ;;  %v307_v58 = vmax.f32 %v243_v12, 0.0  ;;  %v433_v60 = vmul.f32 %v299_v14, %v299_v14 }
  0x3f   :  { %v362_v1 = vadd.f32 %v361_v51, %v298_v6  ;;  %v488_v51 = vadd.f32 %v487_v10, %v425_v45  ;;  %v242_v10 = vadd.f32 %v828_v16, %v173_v50  ;;  %v177_v50 = vmul.f32 %v617_v7, %v786_v44 }
  0x40   :  { %v180_v8 = vmul.f32 %v622_v59, %v786_v44 }
  0x41   :  { %v363_v2 = vadd.f32 %v362_v1, %v299_v14  ;;  %v489_v1 = vadd.f32 %v488_v51, %v426_v4  ;;  %v431_v51 = vmul.f32 %v297_v0, %v297_v0  ;;  %v306_v42 = vmax.f32 %v242_v10, 0.0 }
  0x42   :  { %v625_v0 = vunpack.c.l.bf16 %v817_v9  ;;  %v246_v7 = vadd.f32 %v828_v16, %v177_v50 }
  0x43   :  { %v364_v57 = vadd.f32 %v363_v2, %v300_v55  ;;  %v490_v2 = vadd.f32 %v489_v1, %v427_v15  ;;  %v244_v1 = vadd.f32 %v828_v16, %v175_v49 }
  0x44   :  { %v181_v14 = vmul.f32 %v625_v0, %v786_v44  ;;  %v310_v12 = vmax.f32 %v246_v7, 0.0 }
  0x45   :  { %v365_v52 = vadd.f32 %v364_v57, %v301_v61  ;;  %v491_v57 = vadd.f32 %v490_v2, %v428_v46  ;;  %v245_v46 = vadd.f32 %v828_v16, %v176_v11  ;;  %v308_v49 = vmax.f32 %v244_v1, 0.0 }
  0x46   :  { %v435_v11 = vmul.f32 %v301_v61, %v301_v61  ;;  %v437_v1 = vmul.f32 %v303_v13, %v303_v13  ;;  %v438_v61 = vmul.f32 %v304_v54, %v304_v54 }
  0x47   :  { %v366_v45 = vadd.f32 %v365_v52, %v302_v5  ;;  %v492_v52 = vadd.f32 %v491_v57, %v429_v3  ;;  %v179_v3 = vmul.f32 %v621_v47, %v786_v44  ;;  %v309_v57 = vmax.f32 %v245_v46, 0.0 }
  0x48   :  { %v249_v47 = vadd.f32 %v828_v16, %v180_v8  ;;  %v316_v8 = vmax.f32 %v834_v18, 0.0  ;;  %v320_v18 = vmax.f32 %v846_v22, 0.0  ;;  %v324_v22 = vmax.f32 %v858_v26, 0.0 }
  0x49   :  { %v367_v4 = vadd.f32 %v366_v45, %v303_v13  ;;  %v493_v45 = vadd.f32 %v492_v52, %v430_v43  ;;  %v247_v43 = vadd.f32 %v828_v16, %v178_v62  ;;  %v248_v9 = vadd.f32 %v828_v16, %v179_v3 }
  0x4a   :  { %v328_v26 = vmax.f32 %v870_v30, 0.0  ;;  %v332_v30 = vmax.f32 %v882_v34, 0.0  ;;  %v336_v34 = vmax.f32 %v894_v38, 0.0 }
  0x4b   :  { %v368_v15 = vadd.f32 %v367_v4, %v304_v54  ;;  %v494_v2 = vadd.f32 %v493_v45, %v431_v51  ;;  %v434_v4 = vmul.f32 %v300_v55, %v300_v55  ;;  %v436_v51 = vmul.f32 %v302_v5, %v302_v5 }
  0x4c   :  { %v311_v55 = vmax.f32 %v247_v43, 0.0  ;;  %v250_v45 = vadd.f32 %v828_v16, %v181_v14  ;;  %v312_v59 = vmax.f32 %v248_v9, 0.0  ;;  %v440_v5 = vmul.f32 %v306_v42, %v306_v42 }
  0x4d   :  { %v369_v41 = vadd.f32 %v368_v15, %v305_v53  ;;  %v495_v6 = vadd.f32 %v494_v2, %v432_v63  ;;  %v442_v43 = vmul.f32 %v308_v49, %v308_v49  ;;  %v317_v54 = vmax.f32 %v837_v19, 0.0 }
  0x4e   :  { %v314_v0 = vmax.f32 %v250_v45, 0.0  ;;  %v318_v14 = vmax.f32 %v840_v20, 0.0  ;;  %v321_v19 = vmax.f32 %v849_v23, 0.0  ;;  %v322_v20 = vmax.f32 %v852_v24, 0.0 }
  0x4f   :  { %v370_v56 = vadd.f32 %v369_v41, %v306_v42  ;;  %v496_v41 = vadd.f32 %v495_v6, %v433_v60  ;;  %v439_v60 = vmul.f32 %v305_v53, %v305_v53  ;;  %v441_v6 = vmul.f32 %v307_v58, %v307_v58 }
  0x50   :  { %v444_v42 = vmul.f32 %v310_v12, %v310_v12  ;;  %v325_v23 = vmax.f32 %v861_v27, 0.0  ;;  %v326_v24 = vmax.f32 %v864_v28, 0.0  ;;  %v329_v27 = vmax.f32 %v873_v31, 0.0 }
  0x51   :  { %v371_v10 = vadd.f32 %v370_v56, %v307_v58  ;;  %v497_v52 = vadd.f32 %v496_v41, %v434_v4  ;;  %v313_v56 = vmax.f32 %v249_v47, 0.0  ;;  %v443_v41 = vmul.f32 %v309_v57, %v309_v57 }
  0x52   :  { %v445_v58 = vmul.f32 %v311_v55, %v311_v55  ;;  %v330_v28 = vmax.f32 %v876_v32, 0.0  ;;  %v333_v31 = vmax.f32 %v885_v35, 0.0  ;;  %v334_v32 = vmax.f32 %v888_v36, 0.0 }
  0x53   :  { %v372_v48 = vadd.f32 %v371_v10, %v308_v49  ;;  %v498_v63 = vadd.f32 %v497_v52, %v435_v11  ;;  %v315_v10 = vmax.f32 %v831_v17, 0.0  ;;  %v319_v17 = vmax.f32 %v843_v21, 0.0 }
  0x54   :  { %v446_v49 = vmul.f32 %v312_v59, %v312_v59  ;;  %v323_v21 = vmax.f32 %v855_v25, 0.0  ;;  %v327_v25 = vmax.f32 %v867_v29, 0.0  ;;  %v331_v29 = vmax.f32 %v879_v33, 0.0 }
  0x55   :  { %v373_v15 = vadd.f32 %v372_v48, %v309_v57  ;;  %v499_v46 = vadd.f32 %v498_v63, %v436_v51  ;;  %v447_v57 = vmul.f32 %v313_v56, %v313_v56  ;;  %v335_v33 = vmax.f32 %v891_v37, 0.0 }
  0x56   :  { %v337_v35 = vmax.f32 %v897_v39, 0.0  ;;  %v338_v36 = vmax.f32 %v900_v40, 0.0 }
  0x57   :  { %v374_v50 = vadd.f32 %v373_v15, %v310_v12  ;;  %v500_v2 = vadd.f32 %v499_v46, %v437_v1  ;;  %v448_v12 = vmul.f32 %v314_v0, %v314_v0 }
  0x59   :  { %v375_v62 = vadd.f32 %v374_v50, %v311_v55  ;;  %v501_v7 = vadd.f32 %v500_v2, %v438_v61  ;;  %v449_v55 = vmul.f32 %v315_v10, %v315_v10 }
  0x5b   :  { %v376_v44 = vadd.f32 %v375_v62, %v312_v59  ;;  %v502_v13 = vadd.f32 %v501_v7, %v439_v60  ;;  %v450_v59 = vmul.f32 %v316_v8, %v316_v8 }
  0x5d   :  { %v377_v3 = vadd.f32 %v376_v44, %v313_v56  ;;  %v503_v48 = vadd.f32 %v502_v13, %v440_v5  ;;  %v451_v56 = vmul.f32 %v317_v54, %v317_v54 }
  0x5f   :  { %v378_v4 = vadd.f32 %v377_v3, %v314_v0  ;;  %v504_v53 = vadd.f32 %v503_v48, %v441_v6  ;;  %v452_v0 = vmul.f32 %v318_v14, %v318_v14  ;;  %v455_v48 = vmul.f32 %v321_v19, %v321_v19 }
  0x61   :  { %v379_v16 = vadd.f32 %v378_v4, %v315_v10  ;;  %v505_v15 = vadd.f32 %v504_v53, %v442_v43  ;;  %v453_v10 = vmul.f32 %v319_v17, %v319_v17 }
  0x63   :  { %v380_v11 = vadd.f32 %v379_v16, %v316_v8  ;;  %v506_v52 = vadd.f32 %v505_v15, %v443_v41  ;;  %v454_v8 = vmul.f32 %v320_v18, %v320_v18  ;;  %v456_v41 = vmul.f32 %v322_v20, %v322_v20 }
  0x65   :  { %v381_v9 = vadd.f32 %v380_v11, %v317_v54  ;;  %v507_v50 = vadd.f32 %v506_v52, %v444_v42  ;;  %v459_v52 = vmul.f32 %v325_v23, %v325_v23 }
  0x67   :  { %v382_v51 = vadd.f32 %v381_v9, %v318_v14  ;;  %v508_v63 = vadd.f32 %v507_v50, %v445_v58  ;;  %v457_v9 = vmul.f32 %v323_v21, %v323_v21 }
  0x69   :  { %v383_v47 = vadd.f32 %v382_v51, %v319_v17  ;;  %v509_v62 = vadd.f32 %v508_v63, %v446_v49  ;;  %v458_v17 = vmul.f32 %v324_v22, %v324_v22  ;;  %v460_v49 = vmul.f32 %v326_v24, %v326_v24 }
  0x6b   :  { %v384_v1 = vadd.f32 %v383_v47, %v320_v18  ;;  %v510_v46 = vadd.f32 %v509_v62, %v447_v57  ;;  %v463_v62 = vmul.f32 %v329_v27, %v329_v27 }
  0x6d   :  { %v385_v45 = vadd.f32 %v384_v1, %v321_v19  ;;  %v511_v60 = vadd.f32 %v510_v46, %v448_v12  ;;  %v461_v1 = vmul.f32 %v327_v25, %v327_v25 }
  0x6f   :  { %v386_v61 = vadd.f32 %v385_v45, %v322_v20  ;;  %v512_v3 = vadd.f32 %v511_v60, %v449_v55  ;;  %v462_v20 = vmul.f32 %v328_v26, %v328_v26  ;;  %v464_v55 = vmul.f32 %v330_v28, %v330_v28 }
  0x71   :  { %v387_v44 = vadd.f32 %v386_v61, %v323_v21  ;;  %v513_v7 = vadd.f32 %v512_v3, %v450_v59  ;;  %v465_v59 = vmul.f32 %v331_v29, %v331_v29 }
  0x73   :  { %v388_v2 = vadd.f32 %v387_v44, %v324_v22  ;;  %v514_v6 = vadd.f32 %v513_v7, %v451_v56  ;;  %v1085_v22 = vld [vmem:[#allocation2_spill] sm:$0xff]  ;;  %v466_v56 = vmul.f32 %v332_v30, %v332_v30 }
  0x74   :  { %v339_v37 = vmax.f32 %v1085_v22, 0.0 }
  0x75   :  { %v389_v5 = vadd.f32 %v388_v2, %v325_v23  ;;  %v515_v16 = vadd.f32 %v514_v6, %v452_v0  ;;  %v1086_v23 = vld [vmem:[#allocation3_spill] sm:$0xff]  ;;  %v467_v0 = vmul.f32 %v333_v31, %v333_v31 }
  0x76   :  { %v340_v38 = vmax.f32 %v1086_v23, 0.0 }
  0x77   :  { %v390_v4 = vadd.f32 %v389_v5, %v326_v24  ;;  %v516_v54 = vadd.f32 %v515_v16, %v453_v10  ;;  %v1087_v24 = vld [vmem:[#allocation4_spill] sm:$0xff]  ;;  %v468_v10 = vmul.f32 %v334_v32, %v334_v32  ;;  %v469_v16 = vmul.f32 %v335_v33, %v335_v33 }
  0x78   :  { %v341_v39 = vmax.f32 %v1087_v24, 0.0 }
  0x79   :  { %v391_v13 = vadd.f32 %v390_v4, %v327_v25  ;;  %v517_v53 = vadd.f32 %v516_v54, %v454_v8  ;;  %v1088_v25 = vld [vmem:[#allocation5_spill] sm:$0xff] }
  0x7a   :  { %v342_v40 = vmax.f32 %v1088_v25, 0.0 }
  0x7b   :  { %v392_v43 = vadd.f32 %v391_v13, %v328_v26  ;;  %v518_v42 = vadd.f32 %v517_v53, %v455_v48  ;;  %v1089_v26 = vld [vmem:[#allocation6_spill] sm:$0xff] }
  0x7c   :  { %v343_v13 = vmax.f32 %v1089_v26, 0.0 }
  0x7d   :  { %v393_v11 = vadd.f32 %v392_v43, %v329_v27  ;;  %v519_v51 = vadd.f32 %v518_v42, %v456_v41  ;;  %v1090_v43 = vld [vmem:[#allocation7_spill] sm:$0xff]  ;;  %v1091_v41 = vld [vmem:[#allocation8_spill] sm:$0xff] }
  0x7e   :  { %v344_v48 = vmax.f32 %v1090_v43, 0.0  ;;  %v345_v53 = vmax.f32 %v1091_v41, 0.0 }
  0x7f   :  { %v394_v14 = vadd.f32 %v393_v11, %v330_v28  ;;  %v520_v18 = vadd.f32 %v519_v51, %v457_v9  ;;  %v470_v28 = vmul.f32 %v336_v34, %v336_v34 }
  0x81   :  { %v395_v15 = vadd.f32 %v394_v14, %v331_v29  ;;  %v521_v50 = vadd.f32 %v520_v18, %v458_v17  ;;  %v471_v14 = vmul.f32 %v337_v35, %v337_v35  ;;  %v473_v17 = vmul.f32 %v339_v37, %v339_v37 }
  0x83   :  { %v396_v58 = vadd.f32 %v395_v15, %v332_v30  ;;  %v522_v57 = vadd.f32 %v521_v50, %v459_v52  ;;  %v472_v30 = vmul.f32 %v338_v36, %v338_v36  ;;  %v475_v52 = vmul.f32 %v341_v39, %v341_v39 }
  0x84   :  { %v477_v50 = vmul.f32 %v343_v13, %v343_v13 }
  0x85   :  { %v397_v47 = vadd.f32 %v396_v58, %v333_v31  ;;  %v523_v45 = vadd.f32 %v522_v57, %v460_v49  ;;  %v474_v31 = vmul.f32 %v340_v38, %v340_v38 }
  0x87   :  { %v398_v19 = vadd.f32 %v397_v47, %v334_v32  ;;  %v524_v21 = vadd.f32 %v523_v45, %v461_v1  ;;  %v476_v47 = vmul.f32 %v342_v40, %v342_v40  ;;  %v478_v1 = vmul.f32 %v344_v48, %v344_v48 }
  0x89   :  { %v399_v63 = vadd.f32 %v398_v19, %v335_v33  ;;  %v525_v46 = vadd.f32 %v524_v21, %v462_v20 }
  0x8b   :  { %v400_v12 = vadd.f32 %v399_v63, %v336_v34  ;;  %v526_v60 = vadd.f32 %v525_v46, %v463_v62  ;;  %v479_v34 = vmul.f32 %v345_v53, %v345_v53 }
  0x8d   :  { %v401_v61 = vadd.f32 %v400_v12, %v337_v35  ;;  %v527_v3 = vadd.f32 %v526_v60, %v464_v55 }
  0x8f   :  { %v402_v44 = vadd.f32 %v401_v61, %v338_v36  ;;  %v528_v7 = vadd.f32 %v527_v3, %v465_v59 }
  0x91   :  { %v403_v2 = vadd.f32 %v402_v44, %v339_v37  ;;  %v529_v6 = vadd.f32 %v528_v7, %v466_v56  ;;  %v346_v37 = vld [vmem:[%s1075_s2] sm:$0x3] }
  0x93   :  { %v404_v5 = vadd.f32 %v403_v2, %v340_v38  ;;  %v530_v27 = vadd.f32 %v529_v6, %v467_v0 }
  0x95   :  { %v405_v4 = vadd.f32 %v404_v5, %v341_v39  ;;  %v531_v11 = vadd.f32 %v530_v27, %v468_v10 }
  0x97   :  { %v406_v8 = vadd.f32 %v405_v4, %v342_v40  ;;  %v532_v9 = vadd.f32 %v531_v11, %v469_v16 }
  0x99   :  { %v407_v54 = vadd.f32 %v406_v8, %v343_v13  ;;  %v533_v15 = vadd.f32 %v532_v9, %v470_v28 }
  0x9b   :  { %v408_v29 = vadd.f32 %v407_v54, %v344_v48  ;;  %v534_v51 = vadd.f32 %v533_v15, %v471_v14 }
  0x9d   :  { %v409_v42 = vadd.f32 %v408_v29, %v345_v53  ;;  %v535_v58 = vadd.f32 %v534_v51, %v472_v30 }
  0x9f   :  { %v536_v18 = vadd.f32 %v535_v58, %v473_v17  ;;  %v410_v32 = vrot.slane %v409_v42, 4 }
  0xa1   :  { %v537_v49 = vadd.f32 %v536_v18, %v474_v31  ;;  %v411_v19 = vadd.f32 %v410_v32, %v409_v42 }
  0xa3   :  { %v538_v33 = vadd.f32 %v537_v49, %v475_v52  ;;  %v412_v20 = vrot.slane %v411_v19, 2 }
  0xa5   :  { %v539_v57 = vadd.f32 %v538_v33, %v476_v47  ;;  %v413_v12 = vadd.f32 %v412_v20, %v411_v19 }
  0xa7   :  { %v540_v63 = vadd.f32 %v539_v57, %v477_v50  ;;  %v414_v36 = vrot.slane %v413_v12, 1 }
  0xa9   :  { %v541_v45 = vadd.f32 %v540_v63, %v478_v1  ;;  %v415_v46 = vadd.f32 %v414_v36, %v413_v12 }
  0xab   :  { %v542_v35 = vadd.f32 %v541_v45, %v479_v34 }
  0xad   :  { %v543_v62 = vrot.slane %v542_v35, 4 }
  0xaf   :  { %v544_v21 = vadd.f32 %v543_v62, %v542_v35 }
  0xb1   :  { %v545_v61 = vrot.slane %v544_v21, 2 }
  0xb3   :  { %v546_v55 = vadd.f32 %v545_v61, %v544_v21 }
  0xb5   :  { %v547_v22 = vrot.slane %v546_v55, 1 }
  0xb7   :  { %v548_v44 = vadd.f32 %v547_v22, %v546_v55 }
  0xb9   :  { %v550_v59 = vsel %vm549_vm0, %v415_v46, %v548_v44 }
  0xba   :  { %v551_v60 = vadd.f32 %v550_v59, %v346_v37 }
  0xbc   :  { %552 = vst [vmem:[%s1075_s2] sm:$0x3] %v551_v60 }

// kernel: basic_block_forward.5
= control target key start
LH: loop header
LB: loop body
LE: loop exit
PB: predicated region body
PF: predicated region fallthrough
CT: control target
= control target key end

     0   :  { %s1719_s0 = inlined_call_operand.vmem [shape: bf16[512,128], index: 0, kind: input, shape index: {}]   ;;  %s1720_s1 = inlined_call_operand.vmem [shape: bf16[512,128], index: 1, kind: input, shape index: {}]   ;;  %s1721_s2 = inlined_call_operand.vmem [shape: f32[4,128], index: 2, kind: input, shape index: {}]   ;;  %s1722_s3 = inlined_call_operand.hbm [shape: f32[512,128], index: 3, kind: output, shape index: {}]  }
   0x1   :  { %v824_v0 = vld [vmem:[%s1719_s0] sm:$0xff]   ;;  %v1079_v8 = vld [vmem:[%s1719_s0 + $0x8] sm:$0xff]   ;;  %v1080_v10 = vld [vmem:[%s1719_s0 + $0x10] sm:$0xff]  }
   0x2   :  { %v1201_v1 = vld [vmem:[%s1721_s2] ss:$0 sm:$0xff]  ;;  %v825_v2 = vunpack.c.l.bf16 %v824_v0  ;;  %v1206_v3 = vld [vmem:[%s1721_s2 + $0x1] ss:$0 sm:$0xff]  ;;  %v826_v5 = vunpack.c.h.bf16 %v824_v0  ;;  %v1110_v9 = vld [vmem:[%s1720_s1 + $0x8] sm:$0xff]   ;;  %v829_v13 = vunpack.c.l.bf16 %v1079_v8  ;;  %v830_v17 = vunpack.c.h.bf16 %v1079_v8 }
   0x3   :  { %v952_v4 = vld [vmem:[%s1720_s1] sm:$0xff]   ;;  %v957_v14 = vunpack.c.l.bf16 %v1110_v9  ;;  %v1111_v15 = vld [vmem:[%s1720_s1 + $0x10] sm:$0xff]   ;;  %v1081_v16 = vld [vmem:[%s1719_s0 + $0x18] sm:$0xff]   ;;  %v958_v18 = vunpack.c.h.bf16 %v1110_v9  ;;  %v833_v19 = vunpack.c.l.bf16 %v1080_v10  ;;  %v834_v24 = vunpack.c.h.bf16 %v1080_v10 }
   0x4   :  { %v953_v6 = vunpack.c.l.bf16 %v952_v4  ;;  %v954_v7 = vunpack.c.h.bf16 %v952_v4  ;;  %v148_v11 = vmul.f32 %v825_v2, %v1201_v1  ;;  %v149_v12 = vmul.f32 %v826_v5, %v1201_v1  ;;  %v1234_v25 = vld [vmem:[%s1720_s1 + $0x18] sm:$0xff]   ;;  %v1239_v26 = vld [vmem:[%s1721_s2 + $0x2] ss:$0 sm:$0xff]  ;;  %v1248_v35 = vld [vmem:[%s1721_s2 + $0x3] ss:$0 sm:$0xff] }
   0x5   :  { %v961_v20 = vunpack.c.l.bf16 %v1111_v15  ;;  %v150_v23 = vmul.f32 %v829_v13, %v1201_v1  ;;  %v151_v27 = vmul.f32 %v830_v17, %v1201_v1  ;;  %v152_v28 = vmul.f32 %v833_v19, %v1201_v1  ;;  %v1082_v0 = vld [vmem:[%s1719_s0 + $0x20] sm:$0xff]  }
   0x6   :  { %v217_v21 = vadd.f32 %v1206_v3, %v148_v11  ;;  %v218_v22 = vadd.f32 %v1206_v3, %v149_v12  ;;  %v962_v29 = vunpack.c.h.bf16 %v1111_v15  ;;  %v837_v30 = vunpack.c.l.bf16 %v1081_v16 }
   0x7   :  { %v219_v33 = vadd.f32 %v1206_v3, %v150_v23  ;;  %v153_v34 = vmul.f32 %v834_v24, %v1201_v1  ;;  %v220_v36 = vadd.f32 %v1206_v3, %v151_v27  ;;  %v221_v37 = vadd.f32 %v1206_v3, %v152_v28  ;;  %v1289_v24 = vld [vmem:[%s1720_s1 + $0x28] sm:$0xff]  }
   0x8   :  { %v281_v31 = vmax.f32 %v217_v21, 0.0  ;;  %v282_v32 = vmax.f32 %v218_v22, 0.0  ;;  %v154_v38 = vmul.f32 %v837_v30, %v1201_v1  ;;  %v965_v39 = vunpack.c.l.bf16 %v1234_v25 }
   0x9   :  { %v283_v42 = vmax.f32 %v219_v33, 0.0  ;;  %v222_v43 = vadd.f32 %v1206_v3, %v153_v34  ;;  %v284_v44 = vmax.f32 %v220_v36, 0.0  ;;  %v285_v45 = vmax.f32 %v221_v37, 0.0 }
   0xa   :  { %v350_v40 = vmul.f32 %v1239_v26, %v281_v31  ;;  %v351_v41 = vmul.f32 %v1239_v26, %v282_v32  ;;  %v223_v46 = vadd.f32 %v1206_v3, %v154_v38  ;;  %v838_v47 = vunpack.c.h.bf16 %v1081_v16  ;;  %v1279_v16 = vld [vmem:[%s1720_s1 + $0x20] sm:$0xff]  }
   0xb   :  { %v352_v50 = vmul.f32 %v1239_v26, %v283_v42  ;;  %v286_v51 = vmax.f32 %v222_v43, 0.0  ;;  %v353_v52 = vmul.f32 %v1239_v26, %v284_v44  ;;  %v354_v53 = vmul.f32 %v1239_v26, %v285_v45 }
   0xc   :  { %v419_v48 = vadd.f32 %v1248_v35, %v350_v40  ;;  %v420_v49 = vadd.f32 %v1248_v35, %v351_v41  ;;  %v287_v54 = vmax.f32 %v223_v46, 0.0  ;;  %v155_v55 = vmul.f32 %v838_v47, %v1201_v1  ;;  %v1304_v40 = vld [vmem:[%s1720_s1 + $0x30] sm:$0xff]  }
   0xd   :  { %v421_v58 = vadd.f32 %v1248_v35, %v352_v50  ;;  %v355_v59 = vmul.f32 %v1239_v26, %v286_v51  ;;  %v422_v60 = vadd.f32 %v1248_v35, %v353_v52  ;;  %v423_v61 = vadd.f32 %v1248_v35, %v354_v53 }
   0xe   :  { %v611_v56 = vadd.f32 %v953_v6, %v419_v48  ;;  %v612_v57 = vadd.f32 %v954_v7, %v420_v49  ;;  %v356_v62 = vmul.f32 %v1239_v26, %v287_v54  ;;  %v224_v63 = vadd.f32 %v1206_v3, %v155_v55 }
   0xf   :  { %v613_v5 = vadd.f32 %v957_v14, %v421_v58  ;;  %v424_v6 = vadd.f32 %v1248_v35, %v355_v59  ;;  %v614_v7 = vadd.f32 %v958_v18, %v422_v60  ;;  %v615_v8 = vadd.f32 %v961_v20, %v423_v61  ;;  %v1083_v14 = vld [vmem:[%s1719_s0 + $0x28] sm:$0xff]  }
  0x10   :  { %v675_v2 = vmax.f32 %v611_v56, 0.0  ;;  %v676_v4 = vmax.f32 %v612_v57, 0.0  ;;  %v425_v9 = vadd.f32 %v1248_v35, %v356_v62  ;;  %v288_v10 = vmax.f32 %v224_v63, 0.0 }
  0x11   :  { %v677_v11 = vmax.f32 %v613_v5, 0.0  ;;  %v616_v12 = vadd.f32 %v962_v29, %v424_v6  ;;  %v966_v13 = vunpack.c.h.bf16 %v1234_v25  ;;  %v841_v15 = vunpack.c.l.bf16 %v1082_v0  ;;  %v1084_v25 = vld [vmem:[%s1719_s0 + $0x30] sm:$0xff]  }
  0x12   :  { %739 = vst [vmem:[#allocation2] sm:$0xff] %v675_v2  ;;  %740 = vst [vmem:[#allocation2 + $0x8] sm:$0xff] %v676_v4  ;;  %v678_v17 = vmax.f32 %v614_v7, 0.0  ;;  %v679_v18 = vmax.f32 %v615_v8, 0.0  ;;  %v617_v19 = vadd.f32 %v965_v39, %v425_v9  ;;  %v357_v20 = vmul.f32 %v1239_v26, %v288_v10 }
  0x13   :  { %741 = vst [vmem:[#allocation2 + $0x10] sm:$0xff] %v677_v11  ;;  %v680_v21 = vmax.f32 %v616_v12, 0.0  ;;  %v156_v22 = vmul.f32 %v841_v15, %v1201_v1  ;;  %v842_v23 = vunpack.c.h.bf16 %v1082_v0  ;;  %v969_v29 = vunpack.c.l.bf16 %v1279_v16 }
  0x14   :  { %742 = vst [vmem:[#allocation2 + $0x18] sm:$0xff] %v678_v17  ;;  %743 = vst [vmem:[#allocation2 + $0x20] sm:$0xff] %v679_v18  ;;  %v681_v27 = vmax.f32 %v617_v19, 0.0  ;;  %v426_v28 = vadd.f32 %v1248_v35, %v357_v20  ;;  %v845_v30 = vunpack.c.l.bf16 %v1083_v14  ;;  %v970_v33 = vunpack.c.h.bf16 %v1279_v16 }
  0x15   :  { %744 = vst [vmem:[#allocation2 + $0x28] sm:$0xff] %v680_v21  ;;  %v225_v31 = vadd.f32 %v1206_v3, %v156_v22  ;;  %v157_v32 = vmul.f32 %v842_v23, %v1201_v1  ;;  %v846_v34 = vunpack.c.h.bf16 %v1083_v14  ;;  %v973_v38 = vunpack.c.l.bf16 %v1289_v24 }
  0x16   :  { %745 = vst [vmem:[#allocation2 + $0x30] sm:$0xff] %v681_v27  ;;  %v618_v36 = vadd.f32 %v966_v13, %v426_v28  ;;  %v158_v37 = vmul.f32 %v845_v30, %v1201_v1  ;;  %v849_v39 = vunpack.c.l.bf16 %v1084_v25 }
  0x17   :  { %8 = vsyncpa [#allocation3], 0  ;;  %v289_v41 = vmax.f32 %v225_v31, 0.0  ;;  %v226_v42 = vadd.f32 %v1206_v3, %v157_v32  ;;  %v159_v43 = vmul.f32 %v846_v34, %v1201_v1  ;;  %v974_v44 = vunpack.c.h.bf16 %v1289_v24  ;;  %v1085_v45 = vld [vmem:[%s1719_s0 + $0x38] sm:$0xff]   ;;  %v1086_v21 = vld [vmem:[%s1719_s0 + $0x40] sm:$0xff]  }
  0x18   :  { %v682_v46 = vmax.f32 %v618_v36, 0.0  ;;  %v227_v47 = vadd.f32 %v1206_v3, %v158_v37  ;;  %v160_v48 = vmul.f32 %v849_v39, %v1201_v1  ;;  %v850_v49 = vunpack.c.h.bf16 %v1084_v25  ;;  %v1116_v12 = vld [vmem:[%s1720_s1 + $0x38] sm:$0xff]   ;;  %v1346_v31 = vld [vmem:[%s1720_s1 + $0x40] sm:$0xff]   ;;  %v1087_v32 = vld [vmem:[%s1719_s0 + $0x48] sm:$0xff]  }
  0x19   :  { %v358_v50 = vmul.f32 %v1239_v26, %v289_v41  ;;  %v290_v51 = vmax.f32 %v226_v42, 0.0  ;;  %v228_v52 = vadd.f32 %v1206_v3, %v159_v43  ;;  %v977_v53 = vunpack.c.l.bf16 %v1304_v40 }
  0x1a   :  { %746 = vst [vmem:[#allocation2 + $0x38] sm:$0xff] %v682_v46  ;;  %v291_v54 = vmax.f32 %v227_v47, 0.0  ;;  %v229_v55 = vadd.f32 %v1206_v3, %v160_v48  ;;  %v161_v56 = vmul.f32 %v850_v49, %v1201_v1  ;;  %v853_v57 = vunpack.c.l.bf16 %v1085_v45  ;;  %v1358_v46 = vld [vmem:[%s1720_s1 + $0x48] sm:$0xff]   ;;  %v1088_v47 = vld [vmem:[%s1719_s0 + $0x50] sm:$0xff]  }
  0x1b   :  { %v427_v58 = vadd.f32 %v1248_v35, %v358_v50  ;;  %v359_v59 = vmul.f32 %v1239_v26, %v290_v51  ;;  %v292_v60 = vmax.f32 %v228_v52, 0.0  ;;  %v978_v61 = vunpack.c.h.bf16 %v1304_v40 }
  0x1c   :  { %v360_v62 = vmul.f32 %v1239_v26, %v291_v54  ;;  %v293_v63 = vmax.f32 %v229_v55, 0.0  ;;  %v230_v0 = vadd.f32 %v1206_v3, %v161_v56  ;;  %v162_v2 = vmul.f32 %v853_v57, %v1201_v1 }
  0x1d   :  { %v619_v4 = vadd.f32 %v969_v29, %v427_v58  ;;  %v428_v5 = vadd.f32 %v1248_v35, %v359_v59  ;;  %v361_v6 = vmul.f32 %v1239_v26, %v292_v60  ;;  %v854_v7 = vunpack.c.h.bf16 %v1085_v45 }
  0x1e   :  { %v429_v8 = vadd.f32 %v1248_v35, %v360_v62  ;;  %v362_v9 = vmul.f32 %v1239_v26, %v293_v63  ;;  %v294_v10 = vmax.f32 %v230_v0, 0.0  ;;  %v231_v11 = vadd.f32 %v1206_v3, %v162_v2  ;;  %v1119_v0 = vld [vmem:[%s1720_s1 + $0x50] sm:$0xff]  }
  0x1f   :  { %v683_v13 = vmax.f32 %v619_v4, 0.0  ;;  %v620_v15 = vadd.f32 %v970_v33, %v428_v5  ;;  %v430_v16 = vadd.f32 %v1248_v35, %v361_v6  ;;  %v163_v14 = vmul.f32 %v854_v7, %v1201_v1  ;;  %v1089_v7 = vld [vmem:[%s1719_s0 + $0x58] sm:$0xff]  }
  0x20   :  { %v621_v17 = vadd.f32 %v973_v38, %v429_v8  ;;  %v431_v18 = vadd.f32 %v1248_v35, %v362_v9  ;;  %v363_v19 = vmul.f32 %v1239_v26, %v294_v10  ;;  %v295_v20 = vmax.f32 %v231_v11, 0.0 }
  0x21   :  { %747 = vst [vmem:[#allocation2 + $0x40] sm:$0xff] %v683_v13  ;;  %v684_v22 = vmax.f32 %v620_v15, 0.0  ;;  %v622_v23 = vadd.f32 %v974_v44, %v430_v16  ;;  %v981_v24 = vunpack.c.l.bf16 %v1116_v12  ;;  %v232_v25 = vadd.f32 %v1206_v3, %v163_v14 }
  0x22   :  { %v685_v27 = vmax.f32 %v621_v17, 0.0  ;;  %v623_v28 = vadd.f32 %v977_v53, %v431_v18  ;;  %v432_v29 = vadd.f32 %v1248_v35, %v363_v19  ;;  %v364_v30 = vmul.f32 %v1239_v26, %v295_v20 }
  0x23   :  { %748 = vst [vmem:[#allocation2 + $0x48] sm:$0xff] %v684_v22  ;;  %v686_v33 = vmax.f32 %v622_v23, 0.0  ;;  %v296_v34 = vmax.f32 %v232_v25, 0.0  ;;  %v982_v36 = vunpack.c.h.bf16 %v1116_v12  ;;  %v857_v37 = vunpack.c.l.bf16 %v1086_v21 }
  0x24   :  { %749 = vst [vmem:[#allocation2 + $0x50] sm:$0xff] %v685_v27  ;;  %v687_v38 = vmax.f32 %v623_v28, 0.0  ;;  %v624_v39 = vadd.f32 %v978_v61, %v432_v29  ;;  %v433_v40 = vadd.f32 %v1248_v35, %v364_v30  ;;  %v858_v41 = vunpack.c.h.bf16 %v1086_v21 }
  0x25   :  { %750 = vst [vmem:[#allocation2 + $0x58] sm:$0xff] %v686_v33  ;;  %v365_v42 = vmul.f32 %v1239_v26, %v296_v34  ;;  %v164_v43 = vmul.f32 %v857_v37, %v1201_v1  ;;  %v985_v44 = vunpack.c.l.bf16 %v1346_v31  ;;  %v861_v45 = vunpack.c.l.bf16 %v1087_v32 }
  0x26   :  { %751 = vst [vmem:[#allocation2 + $0x60] sm:$0xff] %v687_v38  ;;  %v688_v48 = vmax.f32 %v624_v39, 0.0  ;;  %v625_v49 = vadd.f32 %v981_v24, %v433_v40  ;;  %v165_v50 = vmul.f32 %v858_v41, %v1201_v1  ;;  %v986_v51 = vunpack.c.h.bf16 %v1346_v31  ;;  %v1090_v38 = vld [vmem:[%s1719_s0 + $0x60] sm:$0xff]  }
  0x27   :  { %v434_v52 = vadd.f32 %v1248_v35, %v365_v42  ;;  %v233_v53 = vadd.f32 %v1206_v3, %v164_v43  ;;  %v166_v54 = vmul.f32 %v861_v45, %v1201_v1  ;;  %v862_v55 = vunpack.c.h.bf16 %v1087_v32  ;;  %v1120_v42 = vld [vmem:[%s1720_s1 + $0x58] sm:$0xff]  }
  0x28   :  { %752 = vst [vmem:[#allocation2 + $0x68] sm:$0xff] %v688_v48  ;;  %v689_v56 = vmax.f32 %v625_v49, 0.0  ;;  %v234_v57 = vadd.f32 %v1206_v3, %v165_v50  ;;  %v989_v58 = vunpack.c.l.bf16 %v1358_v46  ;;  %v865_v59 = vunpack.c.l.bf16 %v1088_v47 }
  0x29   :  { %v626_v60 = vadd.f32 %v982_v36, %v434_v52  ;;  %v297_v61 = vmax.f32 %v233_v53, 0.0  ;;  %v235_v62 = vadd.f32 %v1206_v3, %v166_v54  ;;  %v167_v63 = vmul.f32 %v862_v55, %v1201_v1  ;;  %v1121_v55 = vld [vmem:[%s1720_s1 + $0x60] sm:$0xff]  }
  0x2a   :  { %753 = vst [vmem:[#allocation2 + $0x70] sm:$0xff] %v689_v56  ;;  %v298_v2 = vmax.f32 %v234_v57, 0.0  ;;  %v990_v4 = vunpack.c.h.bf16 %v1358_v46  ;;  %v168_v5 = vmul.f32 %v865_v59, %v1201_v1  ;;  %v866_v6 = vunpack.c.h.bf16 %v1088_v47 }
  0x2b   :  { %v690_v8 = vmax.f32 %v626_v60, 0.0  ;;  %v366_v9 = vmul.f32 %v1239_v26, %v297_v61  ;;  %v299_v10 = vmax.f32 %v235_v62, 0.0  ;;  %v236_v11 = vadd.f32 %v1206_v3, %v167_v63 }
  0x2c   :  { %v367_v12 = vmul.f32 %v1239_v26, %v298_v2  ;;  %v237_v13 = vadd.f32 %v1206_v3, %v168_v5  ;;  %v993_v15 = vunpack.c.l.bf16 %v1119_v0  ;;  %v169_v16 = vmul.f32 %v866_v6, %v1201_v1  ;;  %v1092_v2 = vld [vmem:[%s1719_s0 + $0x70] sm:$0xff]  }
  0x2d   :  { %754 = vst [vmem:[#allocation2 + $0x78] sm:$0xff] %v690_v8  ;;  %v435_v14 = vadd.f32 %v1248_v35, %v366_v9  ;;  %v368_v17 = vmul.f32 %v1239_v26, %v299_v10  ;;  %v300_v18 = vmax.f32 %v236_v11, 0.0  ;;  %v869_v19 = vunpack.c.l.bf16 %v1089_v7  ;;  %v1122_v11 = vld [vmem:[%s1720_s1 + $0x68] sm:$0xff]  }
  0x2e   :  { %v436_v20 = vadd.f32 %v1248_v35, %v367_v12  ;;  %v301_v21 = vmax.f32 %v237_v13, 0.0  ;;  %v238_v22 = vadd.f32 %v1206_v3, %v169_v16  ;;  %v994_v23 = vunpack.c.h.bf16 %v1119_v0 }
  0x2f   :  { %v627_v24 = vadd.f32 %v985_v44, %v435_v14  ;;  %v437_v25 = vadd.f32 %v1248_v35, %v368_v17  ;;  %v369_v27 = vmul.f32 %v1239_v26, %v300_v18  ;;  %v170_v28 = vmul.f32 %v869_v19, %v1201_v1 }
  0x30   :  { %v628_v29 = vadd.f32 %v986_v51, %v436_v20  ;;  %v370_v30 = vmul.f32 %v1239_v26, %v301_v21  ;;  %v302_v31 = vmax.f32 %v238_v22, 0.0  ;;  %v870_v32 = vunpack.c.h.bf16 %v1089_v7  ;;  %v1091_v51 = vld [vmem:[%s1719_s0 + $0x68] sm:$0xff]  }
  0x31   :  { %v691_v33 = vmax.f32 %v627_v24, 0.0  ;;  %v629_v34 = vadd.f32 %v989_v58, %v437_v25  ;;  %v438_v36 = vadd.f32 %v1248_v35, %v369_v27  ;;  %v239_v37 = vadd.f32 %v1206_v3, %v170_v28 }
  0x32   :  { %v692_v39 = vmax.f32 %v628_v29, 0.0  ;;  %v439_v40 = vadd.f32 %v1248_v35, %v370_v30  ;;  %v371_v41 = vmul.f32 %v1239_v26, %v302_v31  ;;  %v171_v43 = vmul.f32 %v870_v32, %v1201_v1  ;;  %v1123_v29 = vld [vmem:[%s1720_s1 + $0x70] sm:$0xff]   ;;  %v1093_v31 = vld [vmem:[%s1719_s0 + $0x78] sm:$0xff]  }
  0x33   :  { %755 = vst [vmem:[#allocation2 + $0x80] sm:$0xff] %v691_v33  ;;  %v693_v44 = vmax.f32 %v629_v34, 0.0  ;;  %v630_v45 = vadd.f32 %v990_v4, %v438_v36  ;;  %v303_v46 = vmax.f32 %v239_v37, 0.0  ;;  %v873_v50 = vunpack.c.l.bf16 %v1090_v38 }
  0x34   :  { %756 = vst [vmem:[#allocation2 + $0x88] sm:$0xff] %v692_v39  ;;  %v631_v47 = vadd.f32 %v993_v15, %v439_v40  ;;  %v440_v48 = vadd.f32 %v1248_v35, %v371_v41  ;;  %v240_v49 = vadd.f32 %v1206_v3, %v171_v43  ;;  %v997_v54 = vunpack.c.l.bf16 %v1120_v42 }
  0x35   :  { %757 = vst [vmem:[#allocation2 + $0x90] sm:$0xff] %v693_v44  ;;  %v694_v52 = vmax.f32 %v630_v45, 0.0  ;;  %v372_v53 = vmul.f32 %v1239_v26, %v303_v46  ;;  %v874_v56 = vunpack.c.h.bf16 %v1090_v38  ;;  %v172_v60 = vmul.f32 %v873_v50, %v1201_v1 }
  0x36   :  { %v695_v57 = vmax.f32 %v631_v47, 0.0  ;;  %v632_v58 = vadd.f32 %v994_v23, %v440_v48  ;;  %v304_v59 = vmax.f32 %v240_v49, 0.0  ;;  %v998_v62 = vunpack.c.h.bf16 %v1120_v42 }
  0x37   :  { %758 = vst [vmem:[#allocation2 + $0x98] sm:$0xff] %v694_v52  ;;  %v441_v61 = vadd.f32 %v1248_v35, %v372_v53  ;;  %v173_v63 = vmul.f32 %v874_v56, %v1201_v1  ;;  %v877_v0 = vunpack.c.l.bf16 %v1091_v51  ;;  %v241_v6 = vadd.f32 %v1206_v3, %v172_v60  ;;  %v1094_v53 = vld [vmem:[%s1719_s0 + $0x80] sm:$0xff]  }
  0x38   :  { %759 = vst [vmem:[#allocation2 + $0xa0] sm:$0xff] %v695_v57  ;;  %v696_v4 = vmax.f32 %v632_v58, 0.0  ;;  %v373_v5 = vmul.f32 %v1239_v26, %v304_v59  ;;  %v1001_v7 = vunpack.c.l.bf16 %v1121_v55  ;;  %v878_v12 = vunpack.c.h.bf16 %v1091_v51 }
  0x39   :  { %v633_v8 = vadd.f32 %v997_v54, %v441_v61  ;;  %v242_v9 = vadd.f32 %v1206_v3, %v173_v63  ;;  %v174_v10 = vmul.f32 %v877_v0, %v1201_v1  ;;  %v305_v15 = vmax.f32 %v241_v6, 0.0 }
  0x3a   :  { %760 = vst [vmem:[#allocation2 + $0xa8] sm:$0xff] %v696_v4  ;;  %v442_v13 = vadd.f32 %v1248_v35, %v373_v5  ;;  %v1002_v16 = vunpack.c.h.bf16 %v1121_v55  ;;  %v881_v14 = vunpack.c.l.bf16 %v1092_v2  ;;  %v175_v20 = vmul.f32 %v878_v12, %v1201_v1 }
  0x3b   :  { %v697_v17 = vmax.f32 %v633_v8, 0.0  ;;  %v306_v18 = vmax.f32 %v242_v9, 0.0  ;;  %v243_v19 = vadd.f32 %v1206_v3, %v174_v10  ;;  %v374_v22 = vmul.f32 %v1239_v26, %v305_v15  ;;  %v1095_v8 = vld [vmem:[%s1719_s0 + $0x88] sm:$0xff]  }
  0x3c   :  { %v634_v21 = vadd.f32 %v998_v62, %v442_v13  ;;  %v1005_v23 = vunpack.c.l.bf16 %v1122_v11  ;;  %v176_v24 = vmul.f32 %v881_v14, %v1201_v1  ;;  %v244_v28 = vadd.f32 %v1206_v3, %v175_v20 }
  0x3d   :  { %761 = vst [vmem:[#allocation2 + $0xb0] sm:$0xff] %v697_v17  ;;  %v375_v25 = vmul.f32 %v1239_v26, %v306_v18  ;;  %v307_v27 = vmax.f32 %v243_v19, 0.0  ;;  %v882_v30 = vunpack.c.h.bf16 %v1092_v2  ;;  %v443_v33 = vadd.f32 %v1248_v35, %v374_v22  ;;  %v1124_v2 = vld [vmem:[%s1720_s1 + $0x78] sm:$0xff]   ;;  %v1125_v19 = vld [vmem:[%s1720_s1 + $0x80] sm:$0xff]  }
  0x3e   :  { %v698_v32 = vmax.f32 %v634_v21, 0.0  ;;  %v1006_v34 = vunpack.c.h.bf16 %v1122_v11  ;;  %v245_v36 = vadd.f32 %v1206_v3, %v176_v24  ;;  %v308_v39 = vmax.f32 %v244_v28, 0.0 }
  0x3f   :  { %v444_v37 = vadd.f32 %v1248_v35, %v375_v25  ;;  %v376_v38 = vmul.f32 %v1239_v26, %v307_v27  ;;  %v177_v40 = vmul.f32 %v882_v30, %v1201_v1  ;;  %v635_v41 = vadd.f32 %v1001_v7, %v443_v33  ;;  %v1096_v27 = vld [vmem:[%s1719_s0 + $0x90] sm:$0xff]  }
  0x40   :  { %762 = vst [vmem:[#allocation2 + $0xb8] sm:$0xff] %v698_v32  ;;  %v309_v42 = vmax.f32 %v245_v36, 0.0  ;;  %v1009_v43 = vunpack.c.l.bf16 %v1123_v29  ;;  %v885_v44 = vunpack.c.l.bf16 %v1093_v31  ;;  %v377_v47 = vmul.f32 %v1239_v26, %v308_v39 }
  0x41   :  { %v636_v45 = vadd.f32 %v1002_v16, %v444_v37  ;;  %v445_v46 = vadd.f32 %v1248_v35, %v376_v38  ;;  %v246_v48 = vadd.f32 %v1206_v3, %v177_v40  ;;  %v699_v49 = vmax.f32 %v635_v41, 0.0  ;;  %v1126_v40 = vld [vmem:[%s1720_s1 + $0x88] sm:$0xff]  }
  0x42   :  { %v378_v50 = vmul.f32 %v1239_v26, %v309_v42  ;;  %v178_v51 = vmul.f32 %v885_v44, %v1201_v1  ;;  %v886_v52 = vunpack.c.h.bf16 %v1093_v31  ;;  %v446_v56 = vadd.f32 %v1248_v35, %v377_v47 }
  0x43   :  { %v700_v54 = vmax.f32 %v636_v45, 0.0  ;;  %v637_v55 = vadd.f32 %v1005_v23, %v445_v46  ;;  %v310_v57 = vmax.f32 %v246_v48, 0.0  ;;  %763 = vst [vmem:[#allocation2 + $0xc0] sm:$0xff] %v699_v49  ;;  %v1010_v59 = vunpack.c.h.bf16 %v1123_v29 }
  0x44   :  { %v447_v58 = vadd.f32 %v1248_v35, %v378_v50  ;;  %v247_v60 = vadd.f32 %v1206_v3, %v178_v51  ;;  %v179_v61 = vmul.f32 %v886_v52, %v1201_v1  ;;  %v638_v63 = vadd.f32 %v1006_v34, %v446_v56  ;;  %v1097_v50 = vld [vmem:[%s1719_s0 + $0x98] sm:$0xff]  }
  0x45   :  { %764 = vst [vmem:[#allocation2 + $0xc8] sm:$0xff] %v700_v54  ;;  %v701_v62 = vmax.f32 %v637_v55, 0.0  ;;  %v379_v0 = vmul.f32 %v1239_v26, %v310_v57  ;;  %v889_v4 = vunpack.c.l.bf16 %v1094_v53  ;;  %v890_v12 = vunpack.c.h.bf16 %v1094_v53 }
  0x46   :  { %v639_v5 = vadd.f32 %v1009_v43, %v447_v58  ;;  %v311_v6 = vmax.f32 %v247_v60, 0.0  ;;  %v248_v7 = vadd.f32 %v1206_v3, %v179_v61  ;;  %v702_v9 = vmax.f32 %v638_v63, 0.0  ;;  %v1127_v61 = vld [vmem:[%s1720_s1 + $0x90] sm:$0xff]  }
  0x47   :  { %765 = vst [vmem:[#allocation2 + $0xd0] sm:$0xff] %v701_v62  ;;  %v448_v10 = vadd.f32 %v1248_v35, %v379_v0  ;;  %v180_v11 = vmul.f32 %v889_v4, %v1201_v1  ;;  %v1013_v16 = vunpack.c.l.bf16 %v1124_v2  ;;  %v181_v20 = vmul.f32 %v890_v12, %v1201_v1 }
  0x48   :  { %v703_v13 = vmax.f32 %v639_v5, 0.0  ;;  %v380_v15 = vmul.f32 %v1239_v26, %v311_v6  ;;  %v312_v14 = vmax.f32 %v248_v7, 0.0  ;;  %766 = vst [vmem:[#allocation2 + $0xd8] sm:$0xff] %v702_v9  ;;  %v893_v21 = vunpack.c.l.bf16 %v1095_v8 }
  0x49   :  { %v640_v17 = vadd.f32 %v1010_v59, %v448_v10  ;;  %v249_v18 = vadd.f32 %v1206_v3, %v180_v11  ;;  %v1014_v24 = vunpack.c.h.bf16 %v1124_v2  ;;  %v894_v25 = vunpack.c.h.bf16 %v1095_v8  ;;  %v1098_v10 = vld [vmem:[%s1719_s0 + $0xa0] sm:$0xff]  }
  0x4a   :  { %767 = vst [vmem:[#allocation2 + $0xe0] sm:$0xff] %v703_v13  ;;  %v449_v22 = vadd.f32 %v1248_v35, %v380_v15  ;;  %v381_v23 = vmul.f32 %v1239_v26, %v312_v14  ;;  %v250_v30 = vadd.f32 %v1206_v3, %v181_v20  ;;  %v182_v31 = vmul.f32 %v893_v21, %v1201_v1 }
  0x4b   :  { %v704_v28 = vmax.f32 %v640_v17, 0.0  ;;  %v313_v29 = vmax.f32 %v249_v18, 0.0  ;;  %v1017_v34 = vunpack.c.l.bf16 %v1125_v19  ;;  %v183_v36 = vmul.f32 %v894_v25, %v1201_v1  ;;  %v1128_v18 = vld [vmem:[%s1720_s1 + $0x98] sm:$0xff]  }
  0x4c   :  { %v641_v32 = vadd.f32 %v1013_v16, %v449_v22  ;;  %v450_v33 = vadd.f32 %v1248_v35, %v381_v23  ;;  %v314_v38 = vmax.f32 %v250_v30, 0.0  ;;  %v251_v39 = vadd.f32 %v1206_v3, %v182_v31 }
  0x4d   :  { %768 = vst [vmem:[#allocation2 + $0xe8] sm:$0xff] %v704_v28  ;;  %v382_v37 = vmul.f32 %v1239_v26, %v313_v29  ;;  %v897_v41 = vunpack.c.l.bf16 %v1096_v27  ;;  %v1018_v44 = vunpack.c.h.bf16 %v1125_v19  ;;  %v252_v45 = vadd.f32 %v1206_v3, %v183_v36 }
  0x4e   :  { %v705_v42 = vmax.f32 %v641_v32, 0.0  ;;  %v642_v43 = vadd.f32 %v1014_v24, %v450_v33  ;;  %v383_v47 = vmul.f32 %v1239_v26, %v314_v38  ;;  %v315_v48 = vmax.f32 %v251_v39, 0.0  ;;  %v1099_v24 = vld [vmem:[%s1719_s0 + $0xa8] sm:$0xff]   ;;  %v1129_v38 = vld [vmem:[%s1720_s1 + $0xa0] sm:$0xff]  }
  0x4f   :  { %v451_v46 = vadd.f32 %v1248_v35, %v382_v37  ;;  %v184_v49 = vmul.f32 %v897_v41, %v1201_v1  ;;  %v1021_v52 = vunpack.c.l.bf16 %v1126_v40  ;;  %v316_v53 = vmax.f32 %v252_v45, 0.0 }
  0x50   :  { %769 = vst [vmem:[#allocation2 + $0xf0] sm:$0xff] %v705_v42  ;;  %v706_v51 = vmax.f32 %v642_v43, 0.0  ;;  %v898_v54 = vunpack.c.h.bf16 %v1096_v27  ;;  %v452_v56 = vadd.f32 %v1248_v35, %v383_v47  ;;  %v384_v57 = vmul.f32 %v1239_v26, %v315_v48  ;;  %v1100_v48 = vld [vmem:[%s1719_s0 + $0xb0] sm:$0xff]  }
  0x51   :  { %v643_v55 = vadd.f32 %v1017_v34, %v451_v46  ;;  %v253_v58 = vadd.f32 %v1206_v3, %v184_v49  ;;  %v385_v59 = vmul.f32 %v1239_v26, %v316_v53  ;;  %v1022_v60 = vunpack.c.h.bf16 %v1126_v40 }
  0x52   :  { %770 = vst [vmem:[#allocation2 + $0xf8] sm:$0xff] %v706_v51  ;;  %v185_v62 = vmul.f32 %v898_v54, %v1201_v1  ;;  %v901_v63 = vunpack.c.l.bf16 %v1097_v50  ;;  %v644_v2 = vadd.f32 %v1018_v44, %v452_v56  ;;  %v453_v4 = vadd.f32 %v1248_v35, %v384_v57 }
  0x53   :  { %v707_v0 = vmax.f32 %v643_v55, 0.0  ;;  %v317_v5 = vmax.f32 %v253_v58, 0.0  ;;  %v454_v6 = vadd.f32 %v1248_v35, %v385_v59  ;;  %v902_v9 = vunpack.c.h.bf16 %v1097_v50  ;;  %v1130_v59 = vld [vmem:[%s1720_s1 + $0xa8] sm:$0xff]  }
  0x54   :  { %v254_v7 = vadd.f32 %v1206_v3, %v185_v62  ;;  %v186_v8 = vmul.f32 %v901_v63, %v1201_v1  ;;  %v708_v11 = vmax.f32 %v644_v2, 0.0  ;;  %v645_v12 = vadd.f32 %v1021_v52, %v453_v4 }
  0x55   :  { %771 = vst [vmem:[#allocation2 + $0x100] sm:$0xff] %v707_v0  ;;  %v386_v13 = vmul.f32 %v1239_v26, %v317_v5  ;;  %v1025_v15 = vunpack.c.l.bf16 %v1127_v61  ;;  %v646_v16 = vadd.f32 %v1022_v60, %v454_v6  ;;  %v187_v19 = vmul.f32 %v902_v9, %v1201_v1 }
  0x56   :  { %v318_v14 = vmax.f32 %v254_v7, 0.0  ;;  %v255_v17 = vadd.f32 %v1206_v3, %v186_v8  ;;  %772 = vst [vmem:[#allocation2 + $0x108] sm:$0xff] %v708_v11  ;;  %v709_v20 = vmax.f32 %v645_v12, 0.0  ;;  %v1026_v22 = vunpack.c.h.bf16 %v1127_v61  ;;  %v1101_v8 = vld [vmem:[%s1719_s0 + $0xb8] sm:$0xff]  }
  0x57   :  { %v455_v21 = vadd.f32 %v1248_v35, %v386_v13  ;;  %v905_v23 = vunpack.c.l.bf16 %v1098_v10  ;;  %v710_v25 = vmax.f32 %v646_v16, 0.0  ;;  %v256_v29 = vadd.f32 %v1206_v3, %v187_v19  ;;  %v1131_v19 = vld [vmem:[%s1720_s1 + $0xb0] sm:$0xff]  }
  0x58   :  { %v387_v27 = vmul.f32 %v1239_v26, %v318_v14  ;;  %v319_v28 = vmax.f32 %v255_v17, 0.0  ;;  %773 = vst [vmem:[#allocation2 + $0x110] sm:$0xff] %v709_v20  ;;  %v1029_v31 = vunpack.c.l.bf16 %v1128_v18  ;;  %v906_v33 = vunpack.c.h.bf16 %v1098_v10 }
  0x59   :  { %v647_v30 = vadd.f32 %v1025_v15, %v455_v21  ;;  %v188_v32 = vmul.f32 %v905_v23, %v1201_v1  ;;  %774 = vst [vmem:[#allocation2 + $0x118] sm:$0xff] %v710_v25  ;;  %v320_v37 = vmax.f32 %v256_v29, 0.0  ;;  %v909_v39 = vunpack.c.l.bf16 %v1099_v24 }
  0x5a   :  { %v456_v34 = vadd.f32 %v1248_v35, %v387_v27  ;;  %v388_v36 = vmul.f32 %v1239_v26, %v319_v28  ;;  %v1030_v41 = vunpack.c.h.bf16 %v1128_v18  ;;  %v189_v43 = vmul.f32 %v906_v33, %v1201_v1 }
  0x5b   :  { %v711_v40 = vmax.f32 %v647_v30, 0.0  ;;  %v257_v42 = vadd.f32 %v1206_v3, %v188_v32  ;;  %v389_v46 = vmul.f32 %v1239_v26, %v320_v37  ;;  %v190_v47 = vmul.f32 %v909_v39, %v1201_v1 }
  0x5c   :  { %v648_v44 = vadd.f32 %v1026_v22, %v456_v34  ;;  %v457_v45 = vadd.f32 %v1248_v35, %v388_v36  ;;  %v1033_v50 = vunpack.c.l.bf16 %v1129_v38  ;;  %v258_v51 = vadd.f32 %v1206_v3, %v189_v43 }
  0x5d   :  { %775 = vst [vmem:[#allocation2 + $0x120] sm:$0xff] %v711_v40  ;;  %v321_v49 = vmax.f32 %v257_v42, 0.0  ;;  %v910_v52 = vunpack.c.h.bf16 %v1099_v24  ;;  %v458_v55 = vadd.f32 %v1248_v35, %v389_v46  ;;  %v259_v56 = vadd.f32 %v1206_v3, %v190_v47  ;;  %v1132_v40 = vld [vmem:[%s1720_s1 + $0xb8] sm:$0xff]  }
  0x5e   :  { %v712_v53 = vmax.f32 %v648_v44, 0.0  ;;  %v649_v54 = vadd.f32 %v1029_v31, %v457_v45  ;;  %v322_v58 = vmax.f32 %v258_v51, 0.0  ;;  %v913_v61 = vunpack.c.l.bf16 %v1100_v48  ;;  %v1102_v31 = vld [vmem:[%s1719_s0 + $0xc0] sm:$0xff]  }
  0x5f   :  { %v390_v57 = vmul.f32 %v1239_v26, %v321_v49  ;;  %v191_v60 = vmul.f32 %v910_v52, %v1201_v1  ;;  %v650_v63 = vadd.f32 %v1030_v41, %v458_v55  ;;  %v1034_v0 = vunpack.c.h.bf16 %v1129_v38 }
  0x60   :  { %776 = vst [vmem:[#allocation2 + $0x128] sm:$0xff] %v712_v53  ;;  %v713_v62 = vmax.f32 %v649_v54, 0.0  ;;  %v323_v2 = vmax.f32 %v259_v56, 0.0  ;;  %v391_v5 = vmul.f32 %v1239_v26, %v322_v58  ;;  %v192_v7 = vmul.f32 %v913_v61, %v1201_v1  ;;  %v1579_v53 = vld [vmem:[%s1721_s2] ss:$0 sm:$0xff] }
  0x61   :  { %v459_v4 = vadd.f32 %v1248_v35, %v390_v57  ;;  %v260_v6 = vadd.f32 %v1206_v3, %v191_v60  ;;  %v714_v9 = vmax.f32 %v650_v63, 0.0  ;;  %v1037_v11 = vunpack.c.l.bf16 %v1130_v59  ;;  %v1133_v57 = vld [vmem:[%s1720_s1 + $0xc0] sm:$0xff]  }
  0x62   :  { %777 = vst [vmem:[#allocation2 + $0x130] sm:$0xff] %v713_v62  ;;  %v392_v10 = vmul.f32 %v1239_v26, %v323_v2  ;;  %v914_v12 = vunpack.c.h.bf16 %v1100_v48  ;;  %v460_v15 = vadd.f32 %v1248_v35, %v391_v5  ;;  %v261_v14 = vadd.f32 %v1206_v3, %v192_v7  ;;  %v1591_v61 = vld [vmem:[%s1721_s2 + $0x1] ss:$0 sm:$0xff] }
  0x63   :  { %v651_v13 = vadd.f32 %v1033_v50, %v459_v4  ;;  %v324_v16 = vmax.f32 %v260_v6, 0.0  ;;  %778 = vst [vmem:[#allocation2 + $0x138] sm:$0xff] %v714_v9  ;;  %v1038_v18 = vunpack.c.h.bf16 %v1130_v59  ;;  %v917_v21 = vunpack.c.l.bf16 %v1101_v8  ;;  %v1103_v50 = vld [vmem:[%s1719_s0 + $0xc8] sm:$0xff]   ;;  %v1104_v6 = vld [vmem:[%s1719_s0 + $0xd0] sm:$0xff]  }
  0x64   :  { %v461_v17 = vadd.f32 %v1248_v35, %v392_v10  ;;  %v193_v20 = vmul.f32 %v914_v12, %v1201_v1  ;;  %v652_v23 = vadd.f32 %v1034_v0, %v460_v15  ;;  %v325_v25 = vmax.f32 %v261_v14, 0.0 }
  0x65   :  { %v715_v22 = vmax.f32 %v651_v13, 0.0  ;;  %v393_v24 = vmul.f32 %v1239_v26, %v324_v16  ;;  %v194_v29 = vmul.f32 %v917_v21, %v1201_v1  ;;  %v918_v30 = vunpack.c.h.bf16 %v1101_v8 }
  0x66   :  { %v653_v27 = vadd.f32 %v1037_v11, %v461_v17  ;;  %v262_v28 = vadd.f32 %v1206_v3, %v193_v20  ;;  %v716_v32 = vmax.f32 %v652_v23, 0.0  ;;  %v394_v34 = vmul.f32 %v1239_v26, %v325_v25  ;;  %v1134_v17 = vld [vmem:[%s1720_s1 + $0xc8] sm:$0xff]   ;;  %v1617_v23 = vld [vmem:[%s1721_s2 + $0x3] ss:$0 sm:$0xff] }
  0x67   :  { %779 = vst [vmem:[#allocation2 + $0x140] sm:$0xff] %v715_v22  ;;  %v462_v33 = vadd.f32 %v1248_v35, %v393_v24  ;;  %v1041_v36 = vunpack.c.l.bf16 %v1131_v19  ;;  %v263_v39 = vadd.f32 %v1206_v3, %v194_v29  ;;  %v195_v41 = vmul.f32 %v918_v30, %v1201_v1  ;;  %v1105_v29 = vld [vmem:[%s1719_s0 + $0xd8] sm:$0xff]  }
  0x68   :  { %v717_v37 = vmax.f32 %v653_v27, 0.0  ;;  %v326_v38 = vmax.f32 %v262_v28, 0.0  ;;  %780 = vst [vmem:[#allocation2 + $0x148] sm:$0xff] %v716_v32  ;;  %v463_v43 = vadd.f32 %v1248_v35, %v394_v34  ;;  %v1042_v44 = vunpack.c.h.bf16 %v1131_v19 }
  0x69   :  { %v654_v42 = vadd.f32 %v1038_v18, %v462_v33  ;;  %v921_v45 = vunpack.c.l.bf16 %v1102_v31  ;;  %v327_v47 = vmax.f32 %v263_v39, 0.0  ;;  %v264_v48 = vadd.f32 %v1206_v3, %v195_v41  ;;  %v1135_v41 = vld [vmem:[%s1720_s1 + $0xd0] sm:$0xff]  }
  0x6a   :  { %781 = vst [vmem:[#allocation2 + $0x150] sm:$0xff] %v717_v37  ;;  %v395_v46 = vmul.f32 %v1239_v26, %v326_v38  ;;  %v922_v49 = vunpack.c.h.bf16 %v1102_v31  ;;  %v655_v52 = vadd.f32 %v1041_v36, %v463_v43  ;;  %v1045_v1 = vunpack.c.l.bf16 %v1132_v40 }
  0x6b   :  { %v718_v51 = vmax.f32 %v654_v42, 0.0  ;;  %v196_v54 = vmul.f32 %v1579_v53, %v921_v45  ;;  %v396_v56 = vmul.f32 %v1239_v26, %v327_v47  ;;  %v328_v3 = vmax.f32 %v264_v48, 0.0  ;;  %v1106_v48 = vld [vmem:[%s1719_s0 + $0xe0] sm:$0xff]  }
  0x6c   :  { %v464_v55 = vadd.f32 %v1248_v35, %v395_v46  ;;  %v197_v58 = vmul.f32 %v1579_v53, %v922_v49  ;;  %v719_v59 = vmax.f32 %v655_v52, 0.0  ;;  %v1046_v60 = vunpack.c.h.bf16 %v1132_v40 }
  0x6d   :  { %782 = vst [vmem:[#allocation2 + $0x158] sm:$0xff] %v718_v51  ;;  %v265_v62 = vadd.f32 %v1591_v61, %v196_v54  ;;  %v925_v63 = vunpack.c.l.bf16 %v1103_v50  ;;  %v465_v2 = vadd.f32 %v1248_v35, %v396_v56  ;;  %v397_v4 = vmul.f32 %v1239_v26, %v328_v3  ;;  %v1605_v26 = vld [vmem:[%s1721_s2 + $0x2] ss:$0 sm:$0xff] }
  0x6e   :  { %v656_v0 = vadd.f32 %v1042_v44, %v464_v55  ;;  %v266_v5 = vadd.f32 %v1591_v61, %v197_v58  ;;  %783 = vst [vmem:[#allocation2 + $0x160] sm:$0xff] %v719_v59  ;;  %v1049_v8 = vunpack.c.l.bf16 %v1133_v57  ;;  %v926_v10 = vunpack.c.h.bf16 %v1103_v50  ;;  %v1136_v58 = vld [vmem:[%s1720_s1 + $0xd8] sm:$0xff]  }
  0x6f   :  { %v329_v7 = vmax.f32 %v265_v62, 0.0  ;;  %v198_v9 = vmul.f32 %v1579_v53, %v925_v63  ;;  %v657_v12 = vadd.f32 %v1045_v1, %v465_v2  ;;  %v466_v13 = vadd.f32 %v1248_v35, %v397_v4 }
  0x70   :  { %v720_v11 = vmax.f32 %v656_v0, 0.0  ;;  %v330_v15 = vmax.f32 %v266_v5, 0.0  ;;  %v199_v18 = vmul.f32 %v1579_v53, %v926_v10  ;;  %v929_v19 = vunpack.c.l.bf16 %v1104_v6 }
  0x71   :  { %v398_v16 = vmul.f32 %v1605_v26, %v329_v7  ;;  %v267_v14 = vadd.f32 %v1591_v61, %v198_v9  ;;  %v721_v20 = vmax.f32 %v657_v12, 0.0  ;;  %v658_v35 = vadd.f32 %v1046_v60, %v466_v13 }
  0x72   :  { %784 = vst [vmem:[#allocation2 + $0x168] sm:$0xff] %v720_v11  ;;  %v399_v21 = vmul.f32 %v1605_v26, %v330_v15  ;;  %v1050_v22 = vunpack.c.h.bf16 %v1133_v57  ;;  %v268_v27 = vadd.f32 %v1591_v61, %v199_v18  ;;  %v200_v28 = vmul.f32 %v1579_v53, %v929_v19 }
  0x73   :  { %v467_v24 = vadd.f32 %v1617_v23, %v398_v16  ;;  %v331_v25 = vmax.f32 %v267_v14, 0.0  ;;  %785 = vst [vmem:[#allocation2 + $0x170] sm:$0xff] %v721_v20  ;;  %v722_v30 = vmax.f32 %v658_v35, 0.0  ;;  %v1053_v32 = vunpack.c.l.bf16 %v1134_v17 }
  0x74   :  { %v468_v31 = vadd.f32 %v1617_v23, %v399_v21  ;;  %v930_v33 = vunpack.c.h.bf16 %v1104_v6  ;;  %v332_v37 = vmax.f32 %v268_v27, 0.0  ;;  %v269_v38 = vadd.f32 %v1591_v61, %v200_v28  ;;  %v1108_v27 = vld [vmem:[%s1719_s0 + $0xf0] sm:$0xff]  }
  0x75   :  { %v659_v34 = vadd.f32 %v1049_v8, %v467_v24  ;;  %v400_v36 = vmul.f32 %v1605_v26, %v331_v25  ;;  %786 = vst [vmem:[#allocation2 + $0x178] sm:$0xff] %v722_v30  ;;  %v1054_v40 = vunpack.c.h.bf16 %v1134_v17  ;;  %v933_v43 = vunpack.c.l.bf16 %v1105_v29  ;;  %v1107_v8 = vld [vmem:[%s1719_s0 + $0xe8] sm:$0xff]   ;;  %v1137_v17 = vld [vmem:[%s1720_s1 + $0xe0] sm:$0xff]  }
  0x76   :  { %v660_v39 = vadd.f32 %v1050_v22, %v468_v31  ;;  %v201_v42 = vmul.f32 %v1579_v53, %v930_v33  ;;  %v401_v46 = vmul.f32 %v1605_v26, %v332_v37  ;;  %v333_v47 = vmax.f32 %v269_v38, 0.0 }
  0x77   :  { %v723_v44 = vmax.f32 %v659_v34, 0.0  ;;  %v469_v45 = vadd.f32 %v1617_v23, %v400_v36  ;;  %v202_v51 = vmul.f32 %v1579_v53, %v933_v43  ;;  %v934_v52 = vunpack.c.h.bf16 %v1105_v29 }
  0x78   :  { %v724_v49 = vmax.f32 %v660_v39, 0.0  ;;  %v270_v50 = vadd.f32 %v1591_v61, %v201_v42  ;;  %v470_v54 = vadd.f32 %v1617_v23, %v401_v46  ;;  %v402_v55 = vmul.f32 %v1605_v26, %v333_v47  ;;  %v1138_v39 = vld [vmem:[%s1720_s1 + $0xe8] sm:$0xff]  }
  0x79   :  { %787 = vst [vmem:[#allocation2 + $0x180] sm:$0xff] %v723_v44  ;;  %v661_v1 = vadd.f32 %v1053_v32, %v469_v45  ;;  %v1057_v56 = vunpack.c.l.bf16 %v1135_v41  ;;  %v271_v57 = vadd.f32 %v1591_v61, %v202_v51  ;;  %v203_v59 = vmul.f32 %v1579_v53, %v934_v52 }
  0x7a   :  { %788 = vst [vmem:[#allocation2 + $0x188] sm:$0xff] %v724_v49  ;;  %v334_v3 = vmax.f32 %v270_v50, 0.0  ;;  %v937_v60 = vunpack.c.l.bf16 %v1106_v48  ;;  %v662_v63 = vadd.f32 %v1054_v40, %v470_v54  ;;  %v471_v0 = vadd.f32 %v1617_v23, %v402_v55  ;;  %v1109_v50 = vld [vmem:[%s1719_s0 + $0xf8] sm:$0xff]  }
  0x7b   :  { %v725_v62 = vmax.f32 %v661_v1, 0.0  ;;  %v1058_v2 = vunpack.c.h.bf16 %v1135_v41  ;;  %v335_v5 = vmax.f32 %v271_v57, 0.0  ;;  %v272_v6 = vadd.f32 %v1591_v61, %v203_v59 }
  0x7c   :  { %v403_v4 = vmul.f32 %v1605_v26, %v334_v3  ;;  %v204_v7 = vmul.f32 %v1579_v53, %v937_v60  ;;  %v726_v9 = vmax.f32 %v662_v63, 0.0  ;;  %v663_v10 = vadd.f32 %v1057_v56, %v471_v0 }
  0x7d   :  { %789 = vst [vmem:[#allocation2 + $0x190] sm:$0xff] %v725_v62  ;;  %v1061_v11 = vunpack.c.l.bf16 %v1136_v58  ;;  %v938_v12 = vunpack.c.h.bf16 %v1106_v48  ;;  %v404_v15 = vmul.f32 %v1605_v26, %v335_v5  ;;  %v336_v16 = vmax.f32 %v272_v6, 0.0 }
  0x7e   :  { %v472_v13 = vadd.f32 %v1617_v23, %v403_v4  ;;  %v273_v14 = vadd.f32 %v1591_v61, %v204_v7  ;;  %790 = vst [vmem:[#allocation2 + $0x198] sm:$0xff] %v726_v9  ;;  %v727_v18 = vmax.f32 %v663_v10, 0.0  ;;  %v1062_v19 = vunpack.c.h.bf16 %v1136_v58  ;;  %v1139_v58 = vld [vmem:[%s1720_s1 + $0xf0] sm:$0xff]  }
  0x7f   :  { %v205_v20 = vmul.f32 %v1579_v53, %v938_v12  ;;  %v941_v35 = vunpack.c.l.bf16 %v1107_v8  ;;  %v473_v22 = vadd.f32 %v1617_v23, %v404_v15  ;;  %v405_v24 = vmul.f32 %v1605_v26, %v336_v16 }
  0x80   :  { %v664_v21 = vadd.f32 %v1058_v2, %v472_v13  ;;  %v337_v25 = vmax.f32 %v273_v14, 0.0  ;;  %791 = vst [vmem:[#allocation2 + $0x1a0] sm:$0xff] %v727_v18  ;;  %v1065_v28 = vunpack.c.l.bf16 %v1137_v17  ;;  %v942_v31 = vunpack.c.h.bf16 %v1107_v8 }
  0x81   :  { %v274_v29 = vadd.f32 %v1591_v61, %v205_v20  ;;  %v206_v30 = vmul.f32 %v1579_v53, %v941_v35  ;;  %v665_v33 = vadd.f32 %v1061_v11, %v473_v22  ;;  %v474_v34 = vadd.f32 %v1617_v23, %v405_v24  ;;  %v1140_v20 = vld [vmem:[%s1720_s1 + $0xf8] sm:$0xff]   ;;  %s1172_s1 = smov [#allocation2]  }
  0x82   :  { %v728_v32 = vmax.f32 %v664_v21, 0.0  ;;  %v406_v36 = vmul.f32 %v1605_v26, %v337_v25  ;;  %v207_v40 = vmul.f32 %v1579_v53, %v942_v31  ;;  %v945_v41 = vunpack.c.l.bf16 %v1108_v27  ;;  %s808_s19 = sshll.u32 %s1172_s1, 4  ;;  %s809_s19 = int_to_ptr.vmem [resolvable:$true] %s808_s19 }
  0x83   :  { %v338_v37 = vmax.f32 %v274_v29, 0.0  ;;  %v275_v38 = vadd.f32 %v1591_v61, %v206_v30  ;;  %v729_v42 = vmax.f32 %v665_v33, 0.0  ;;  %v666_v43 = vadd.f32 %v1062_v19, %v474_v34  ;;  %s1148_s20 = scalar_lea.vmem %s809_s19, 8192  ;;  %p1153_p1 = scmp.lt.s32.totalorder %s809_s19, %s809_s19 }
  0x84   :  { %792 = vst [vmem:[#allocation2 + $0x1a8] sm:$0xff] %v728_v32  ;;  %v475_v44 = vadd.f32 %v1617_v23, %v406_v36  ;;  %v1066_v45 = vunpack.c.h.bf16 %v1137_v17  ;;  %v276_v48 = vadd.f32 %v1591_v61, %v207_v40  ;;  %v208_v49 = vmul.f32 %v1579_v53, %v945_v41  ;;  %p1149_p0 = scmp.ne.s32.totalorder %s809_s19, %s1148_s20  ;;  %p1154_p2 = scmp.lt.s32.totalorder %s1148_s20, %s1148_s20 }
  0x85   :  { %v407_v46 = vmul.f32 %v1605_v26, %v338_v37  ;;  %v339_v47 = vmax.f32 %v275_v38, 0.0  ;;  %793 = vst [vmem:[#allocation2 + $0x1b0] sm:$0xff] %v729_v42  ;;  %v730_v51 = vmax.f32 %v666_v43, 0.0  ;;  %v1069_v1 = vunpack.c.l.bf16 %v1138_v39 }
  0x86   :  { %v667_v52 = vadd.f32 %v1065_v28, %v475_v44  ;;  %v946_v54 = vunpack.c.h.bf16 %v1108_v27  ;;  %v340_v3 = vmax.f32 %v276_v48, 0.0  ;;  %v277_v57 = vadd.f32 %v1591_v61, %v208_v49  ;;  %p1155_p3 = por %p1154_p2, %p1153_p1 }
  0x87   :  { %v476_v55 = vadd.f32 %v1617_v23, %v407_v46  ;;  %v408_v56 = vmul.f32 %v1605_v26, %v339_v47  ;;  %794 = vst [vmem:[#allocation2 + $0x1b8] sm:$0xff] %v730_v51  ;;  %v1070_v60 = vunpack.c.h.bf16 %v1138_v39  ;;  %v949_v63 = vunpack.c.l.bf16 %v1109_v50 }
  0x88   :  { %v731_v59 = vmax.f32 %v667_v52, 0.0  ;;  %v209_v62 = vmul.f32 %v1579_v53, %v946_v54  ;;  %v409_v4 = vmul.f32 %v1605_v26, %v340_v3  ;;  %v341_v5 = vmax.f32 %v277_v57, 0.0  ;;  %p1156_p4 = pnand %p1155_p3, %p1149_p0 }
  0x89   :  { %v668_v0 = vadd.f32 %v1066_v45, %v476_v55  ;;  %v477_v2 = vadd.f32 %v1617_v23, %v408_v56  ;;  %v1073_v6 = vunpack.c.l.bf16 %v1139_v58  ;;  %v210_v8 = vmul.f32 %v1579_v53, %v949_v63 }
  0x8a   :  { %795 = vst [vmem:[#allocation2 + $0x1c0] sm:$0xff] %v731_v59  ;;  %v278_v7 = vadd.f32 %v1591_v61, %v209_v62  ;;  %v950_v9 = vunpack.c.h.bf16 %v1109_v50  ;;  %v478_v12 = vadd.f32 %v1617_v23, %v409_v4  ;;  %v410_v13 = vmul.f32 %v1605_v26, %v341_v5 }
  0x8b   :  { %v732_v10 = vmax.f32 %v668_v0, 0.0  ;;  %v669_v11 = vadd.f32 %v1069_v1, %v477_v2  ;;  %v279_v16 = vadd.f32 %v1591_v61, %v210_v8  ;;  %v1074_v21 = vunpack.c.h.bf16 %v1139_v58 }
  0x8c   :  { %v342_v15 = vmax.f32 %v278_v7, 0.0  ;;  %v211_v14 = vmul.f32 %v1579_v53, %v950_v9  ;;  %v670_v18 = vadd.f32 %v1070_v60, %v478_v12  ;;  %v479_v19 = vadd.f32 %v1617_v23, %v410_v13 }
  0x8d   :  { %796 = vst [vmem:[#allocation2 + $0x1c8] sm:$0xff] %v732_v10  ;;  %v733_v17 = vmax.f32 %v669_v11, 0.0  ;;  %v343_v22 = vmax.f32 %v279_v16, 0.0  ;;  %v1077_v29 = vunpack.c.l.bf16 %v1140_v20  ;;  %v1078_v36 = vunpack.c.h.bf16 %v1140_v20 }
  0x8e   :  { %v411_v35 = vmul.f32 %v1605_v26, %v342_v15  ;;  %v280_v24 = vadd.f32 %v1591_v61, %v211_v14  ;;  %v734_v25 = vmax.f32 %v670_v18, 0.0  ;;  %v671_v27 = vadd.f32 %v1073_v6, %v479_v19 }
  0x8f   :  { %797 = vst [vmem:[#allocation2 + $0x1d0] sm:$0xff] %v733_v17  ;;  %v412_v28 = vmul.f32 %v1605_v26, %v343_v22 }
  0x90   :  { %v480_v53 = vadd.f32 %v1617_v23, %v411_v35  ;;  %v344_v30 = vmax.f32 %v280_v24, 0.0  ;;  %798 = vst [vmem:[#allocation2 + $0x1d8] sm:$0xff] %v734_v25  ;;  %v735_v31 = vmax.f32 %v671_v27, 0.0 }
  0x91   :  { %v481_v33 = vadd.f32 %v1617_v23, %v412_v28 }
  0x92   :  { %v672_v32 = vadd.f32 %v1074_v21, %v480_v53  ;;  %v413_v34 = vmul.f32 %v1605_v26, %v344_v30  ;;  %799 = vst [vmem:[#allocation2 + $0x1e0] sm:$0xff] %v735_v31 }
  0x93   :  { %v673_v61 = vadd.f32 %v1077_v29, %v481_v33 }
  0x94   :  { %v736_v37 = vmax.f32 %v672_v32, 0.0  ;;  %v482_v38 = vadd.f32 %v1617_v23, %v413_v34 }
  0x95   :  { %v737_v39 = vmax.f32 %v673_v61, 0.0 }
  0x96   :  { %800 = vst [vmem:[#allocation2 + $0x1e8] sm:$0xff] %v736_v37  ;;  %v674_v40 = vadd.f32 %v1078_v36, %v482_v38 }
  0x97   :  { %801 = vst [vmem:[#allocation2 + $0x1f0] sm:$0xff] %v737_v39 }
  0x98   :  { %v738_v41 = vmax.f32 %v674_v40, 0.0 }
  0x9a   :  { %802 = vst [vmem:[#allocation2 + $0x1f8] sm:$0xff] %v738_v41 }
  0x9b   :  { %1159 = shalt.err (!%p1156_p4)
}
  0x9c   :  { %s1160_s23 = scalar_lea.hbm %s1722_s3, 8192 }
  0x9d   :  { %p1161_p5 = scmp.ne.s32.totalorder %s1722_s3, %s1160_s23  ;;  %p1164_p6 = scmp.lt.u32.totalorder %s1160_s23, %s1722_s3 }
  0x9f   :  { %p1166_p7 = pnand %p1164_p6, %p1161_p5 }
  0xa1   :  { %1169 = shalt.err (!%p1166_p7)
}
  0xa2   :  { %s1173_s2 = smov 128   ;;  %s1174_s28 = smov 8  }
  0xa3   :  { %814 = dma.vmem_to_hbm [thread:$0]  %s809_s19, 8192, %s1722_s3, [#allocation3], %s1173_s2, %s1173_s2, %s1174_s28  }
  0xa4   :  { %1170 = dma.done.wait [#allocation3], 8192  }
  0xa5   :  { %1171 = vsyncadd [#allocation3], 4294959104 }
  0xa6   :  { %818 = vsyncpa [#allocation3], 1 }

// kernel: basic_block_forward.6
= control target key start
LH: loop header
LB: loop body
LE: loop exit
PB: predicated region body
PF: predicated region fallthrough
CT: control target
= control target key end

     0   :  { %s6029_s17 = smov 0   ;;  %s6031_s18 = smov 0   ;;  %s7033_s0 = inlined_call_operand.vmem [shape: bf16[3,384,128], index: 0, kind: input, shape index: {}]   ;;  %s7034_s1 = inlined_call_operand.vmem [shape: bf16[2,16,16,128], index: 1, kind: input, shape index: {}]   ;;  %s7035_s2 = inlined_call_operand.<no memory space> [shape: bf16[], index: 2, kind: input, shape index: {}]   ;;  %s7036_s3 = inlined_call_operand.vmem [shape: bf16[2,256,128], index: 3, kind: output, shape index: {0}]   ;;  %s7037_s4 = inlined_call_operand.vmem [shape: f32[2,2,128], index: 4, kind: output, shape index: {1}]  }
   0x1   :  { %v10_v0 = vstv %s7035_s2  ;;  %s6033_s19 = smov 0  }
   0x2   :  { %v6027_v1 = vunpack.i.l.bf16 %v10_v0 }
   0x4   :  { %7039 = vst [vmem:[#allocation10_spill] sm:$0xff] %v6027_v1 }
   0x5 LB: > { %s29_s2 = sadd.s32 1, %s5992_s18  ;;  %p4582_p0 = scmp.ge.s32.totalorder %s5996_s19, 1  ;;  %s5988_s17 = sphi %s6029_s17, %s7041_s17   ;;  %s5996_s19 = sphi %s6033_s19, %s20_s19   ;;  %s5992_s18 = sphi %s6031_s18, %s7042_s18  }
   0x6   : > { %p30_p1 = scmp.ge.s32.totalorder %s29_s2, 2  ;;  %p172_p2 = scmp.lt.s32.totalorder %s5996_s19, 3 }
   0x8   : > { %s7044_s2 = smov (%p30_p1, %s29_s2), 0  ;;  %p173_p3 = pnand %p4582_p0, %p172_p2 }
   0xa   : > { %176 = sbr.rel (%p173_p3) target bundleno = 599 (0x257), region = 28 }
   0xb   : > { %v7040_v1 = vld [vmem:[#allocation10_spill] sm:$0xff] }
  0x11   : > { %v5810_v2 = vld [vmem:[%s7033_s0 + $0x40] sm:$0xff]   ;;  %v4950_v3 = vpack.c.bf16 %v7040_v1, %v7040_v1  ;;  %v5998_v5 = vmov 0.0   ;;  %v5813_v8 = vld [vmem:[%s7033_s0 + $0x48] sm:$0xff]   ;;  %v5816_v11 = vld [vmem:[%s7033_s0 + $0x50] sm:$0xff]   ;;  %p211_p4 = scmp.lt.s32.totalorder %s5988_s17, 1  ;;  %vm307_vm1 = vcmask 1046528  }
  0x12   : > { %v6057_v4 = vld [vmem:[%s7033_s0 + $0x80] sm:$0xff]   ;;  %v279_v6 = vpack.c.bf16 %v5998_v5, %v7040_v1  ;;  %5057 = vmatprep.subr.bf16.mxu0 %v5810_v2  ;;  %v6072_v9 = vld [vmem:[%s7033_s0 + $0x88] sm:$0xff]   ;;  %v6084_v12 = vld [vmem:[%s7033_s0 + $0x90] sm:$0xff]   ;;  %vm1599_vm0 = vsmask.f32 7424  ;;  %vm4385_vm2 = vcmask 1040384  }
  0x13   : > { %v5812_v7 = vld [vmem:[%s7033_s0] sm:$0xff]   ;;  %4951 = vst [vmem:[#allocation9] sm:$0xff] %v4950_v3   ;;  %4961 = vst [vmem:[#allocation9 + $0xd0] sm:$0xff] %v4950_v3   ;;  %5609 = vmatprep.subr.bf16.mxu1 %v6057_v4  ;;  %v5815_v10 = vld [vmem:[%s7033_s0 + $0x8] sm:$0xff]   ;;  %s7046_s17 = smov (!%p211_p4, %s5988_s17), 1 }
  0x14   : > { %281 = vst [vmem:[#allocation9 + $0x8] sm:$0xf] %v279_v6  ;;  %5058 = vmatpush3.bf16.msra.mxu0 %v5812_v7  ;;  %5617 = vmatpush3.bf16.msra.mxu1 %v6057_v4  ;;  %v5818_v13 = vld [vmem:[%s7033_s0 + $0x10] sm:$0xff]   ;;  %v5819_v14 = vld [vmem:[%s7033_s0 + $0x58] sm:$0xff]   ;;  %v5822_v17 = vld [vmem:[%s7033_s0 + $0x60] sm:$0xff]   ;;  %s4913_s9 = sshll.u32 %s7046_s17, 7 }
  0x15   : > { %5059 = vmatprep.subr.bf16.mxu0 %v5813_v8  ;;  %5610 = vmatprep.subr.bf16.mxu1 %v6072_v9  ;;  %v6097_v15 = vld [vmem:[%s7033_s0 + $0x98] sm:$0xff]   ;;  %v6111_v18 = vld [vmem:[%s7033_s0 + $0xa0] sm:$0xff]   ;;  %v5825_v20 = vld [vmem:[%s7033_s0 + $0x68] sm:$0xff]   ;;  %s6159_s23 = scalar_lea.vmem %s7034_s1, %s4913_s9  ;;  %s6959_s12 = scalar_lea.vmem %s7036_s3, %s4913_s9 }
  0x16   : > { %v5821_v16 = vld [vmem:[%s7033_s0 + $0x18] sm:$0xff]   ;;  %v5824_v19 = vld [vmem:[%s7033_s0 + $0x20] sm:$0xff]   ;;  %v6127_v21 = vld [vmem:[%s7033_s0 + $0xa8] sm:$0xff]   ;;  %s4587_s9 = sshll.u32 %s7046_s17, 1 }
  0x17   : > { %v5827_v22 = vld [vmem:[%s7033_s0 + $0x28] sm:$0xff]   ;;  %v5828_v23 = vld [vmem:[%s7033_s0 + $0x70] sm:$0xff]   ;;  %v5831_v26 = vld [vmem:[%s7033_s0 + $0x78] sm:$0xff]   ;;  %s235_s15 = scalar_lea.vmem %s7037_s4, %s4587_s9 }
  0x18   : > { %5060 = vmatpush3.bf16.msra.mxu0 %v5815_v10  ;;  %5618 = vmatpush3.bf16.msra.mxu1 %v6072_v9  ;;  %v6141_v24 = vld [vmem:[%s7033_s0 + $0xb0] sm:$0xff]   ;;  %v6152_v27 = vld [vmem:[%s7033_s0 + $0xb8] sm:$0xff]   ;;  %v4605_v36 = vld [vmem:[%s6159_s23 + $0x40] sm:$0xff]  }
  0x19   : > { %5061 = vmatprep.subr.bf16.mxu0 %v5816_v11  ;;  %5611 = vmatprep.subr.bf16.mxu1 %v6084_v12  ;;  %v5830_v25 = vld [vmem:[%s7033_s0 + $0x30] sm:$0xff]   ;;  %v4603_v30 = vld [vmem:[%s6159_s23 + $0x38] sm:$0xff]   ;;  %v777_v38 = vunpack.c.l.bf16 %v4605_v36  ;;  %v797_v39 = vunpack.c.h.bf16 %v4605_v36  ;;  %v5841_v48 = vld [vmem:[%s7033_s0 + $0x100] sm:$0xff]  }
  0x1a   : > { %v5834_v28 = vld [vmem:[#allocation9] sm:$0xff]   ;;  %v5833_v31 = vld [vmem:[%s7033_s0 + $0x38] sm:$0xff]   ;;  %v718_v35 = vunpack.c.l.bf16 %v4603_v30  ;;  %v738_v37 = vunpack.c.h.bf16 %v4603_v30  ;;  %v4589_v53 = vld [vmem:[%s6159_s23] sm:$0xff]  }
  0x1b   : > { %v5835_v29 = vld [vmem:[#allocation9 + $0x8] ss:$0 sps:$4 sm:$0x11]   ;;  %v1601_v32 = vshrl.u32 %v5834_v28, 16  ;;  %v1603_v33 = vshll.u32 %v5834_v28, 16  ;;  %v5838_v43 = vld [vmem:[#allocation9] sm:$0xff]   ;;  %v780_v47 = vsel %vm307_vm1, %v777_v38, %v7040_v1  ;;  %v800_v55 = vsel %vm307_vm1, %v797_v39, %v777_v38 }
  0x1c   : > { %5062 = vmatpush3.bf16.msra.mxu0 %v5818_v13  ;;  %5619 = vmatpush3.bf16.msra.mxu1 %v6084_v12  ;;  %v1608_v34 = vshll.u32 %v5835_v29, 16  ;;  %v721_v42 = vsel %vm307_vm1, %v718_v35, %v7040_v1  ;;  %v741_v45 = vsel %vm307_vm1, %v738_v37, %v718_v35  ;;  %v748_v46 = vsel %vm307_vm1, %v7040_v1, %v738_v37  ;;  %v4607_v58 = vld [vmem:[%s6159_s23 + $0x48] sm:$0xff]   ;;  %v4609_v59 = vld [vmem:[%s6159_s23 + $0x50] sm:$0xff]   ;;  %v6212_v30 = vld [vmem:[%s6159_s23 + $0x58] sm:$0xff]  }
  0x1d   : > { %5063 = vmatprep.subr.bf16.mxu0 %v5819_v14  ;;  %5612 = vmatprep.subr.bf16.mxu1 %v6097_v15  ;;  %v1605_v40 = vrot.slane %v1603_v33, 1  ;;  %v722_v44 = vrot.slane %v721_v42, 7  ;;  %v742_v50 = vrot.slane %v741_v45, 7  ;;  %v749_v51 = vrot.slane %v748_v46, 7 }
  0x1e   : > { %v1610_v41 = vrot.slane %v1608_v34, 1  ;;  %v781_v52 = vrot.slane %v780_v47, 7  ;;  %v807_v56 = vsel %vm307_vm1, %v7040_v1, %v797_v39  ;;  %v305_v57 = vunpack.c.l.bf16 %v4589_v53 }
  0x1f   : > { %v1606_v49 = vor.u32 %v1605_v40, %v1601_v32  ;;  %v724_v54 = vpack.c.bf16 %v5998_v5, %v722_v44  ;;  %v744_v61 = vpack.c.bf16 %v5998_v5, %v742_v50  ;;  %v751_v62 = vpack.c.bf16 %v5998_v5, %v749_v51 }
  0x20   : > { %5064 = vmatpush3.bf16.msra.mxu0 %v5821_v16  ;;  %5620 = vmatpush3.bf16.msra.mxu1 %v6097_v15  ;;  %v783_v63 = vpack.c.bf16 %v5998_v5, %v781_v52  ;;  %v801_v0 = vrot.slane %v800_v55, 7  ;;  %v808_v2 = vrot.slane %v807_v56, 7  ;;  %v308_v3 = vsel %vm307_vm1, %v305_v57, %v7040_v1  ;;  %v4613_v52 = vld [vmem:[%s6159_s23 + $0x60] sm:$0xff]  }
  0x21   : > { %5065 = vmatprep.subr.bf16.mxu0 %v5822_v17  ;;  %5613 = vmatprep.subr.bf16.mxu1 %v6111_v18  ;;  %v1611_v60 = vsel %vm1599_vm0, %v1606_v49, %v1610_v41  ;;  %726 = vst [vmem:[#allocation9 + $0x60] sm:$0xf] %v724_v54  ;;  %v325_v6 = vunpack.c.h.bf16 %v4589_v53  ;;  %746 = vst [vmem:[#allocation9 + $0x64] sm:$0xf] %v744_v61  ;;  %v309_v7 = vrot.slane %v308_v3, 7  ;;  %v836_v8 = vunpack.c.l.bf16 %v4607_v58 }
  0x22   : > { %2413 = vmatprep.mubr.bf16.mxu0 %v1611_v60  ;;  %753 = vst [vmem:[#allocation9 + $0x68] sm:$0xf] %v751_v62  ;;  %785 = vst [vmem:[#allocation9 + $0x6c] sm:$0xf] %v783_v63  ;;  %v856_v10 = vunpack.c.h.bf16 %v4607_v58  ;;  %v895_v11 = vunpack.c.l.bf16 %v4609_v59  ;;  %v803_v13 = vpack.c.bf16 %v5998_v5, %v801_v0  ;;  %v810_v14 = vpack.c.bf16 %v5998_v5, %v808_v2  ;;  %v5842_v63 = vld [vmem:[%s7033_s0 + $0xc0] sm:$0xff]  }
  0x23   : > { %v328_v16 = vsel %vm307_vm1, %v325_v6, %v305_v57  ;;  %v335_v17 = vsel %vm307_vm1, %v7040_v1, %v325_v6  ;;  %v915_v37 = vunpack.c.h.bf16 %v4609_v59  ;;  %v954_v42 = vunpack.c.l.bf16 %v6212_v30 }
  0x24   : > { %5066 = vmatpush3.bf16.msra.mxu0 %v5824_v19  ;;  %5621 = vmatpush3.bf16.msra.mxu1 %v6111_v18  ;;  %v311_v19 = vpack.c.bf16 %v5998_v5, %v309_v7  ;;  %805 = vst [vmem:[#allocation9 + $0x70] sm:$0xf] %v803_v13  ;;  %812 = vst [vmem:[#allocation9 + $0x74] sm:$0xf] %v810_v14  ;;  %v866_v28 = vsel %vm307_vm1, %v7040_v1, %v856_v10  ;;  %v974_v60 = vunpack.c.h.bf16 %v6212_v30  ;;  %v5843_v7 = vld [vmem:[%s7033_s0 + $0x108] sm:$0xff]  }
  0x25   : > { %5067 = vmatprep.subr.bf16.mxu0 %v5825_v20  ;;  %5614 = vmatprep.subr.bf16.mxu1 %v6127_v21  ;;  %v329_v20 = vrot.slane %v328_v16, 7  ;;  %v898_v29 = vsel %vm307_vm1, %v895_v11, %v7040_v1  ;;  %v867_v34 = vrot.slane %v866_v28, 7  ;;  %v918_v45 = vsel %vm307_vm1, %v915_v37, %v895_v11 }
  0x26   : > { %313 = vst [vmem:[#allocation9 + $0xc] sm:$0xf] %v311_v19  ;;  %v899_v36 = vrot.slane %v898_v29, 7  ;;  %v957_v51 = vsel %vm307_vm1, %v954_v42, %v7040_v1  ;;  %v1013_v14 = vunpack.c.l.bf16 %v4613_v52  ;;  %v1033_v19 = vunpack.c.h.bf16 %v4613_v52 }
  0x27   : > { %v869_v40 = vpack.c.bf16 %v5998_v5, %v867_v34  ;;  %v958_v3 = vrot.slane %v957_v51, 7 }
  0x28   : > { %5068 = vmatpush3.bf16.msra.mxu0 %v5827_v22  ;;  %5622 = vmatpush3.bf16.msra.mxu1 %v6127_v21  ;;  %v336_v22 = vrot.slane %v335_v17, 7  ;;  %v901_v44 = vpack.c.bf16 %v5998_v5, %v899_v36  ;;  %v1016_v30 = vsel %vm307_vm1, %v1013_v14, %v7040_v1  ;;  %v1043_v34 = vsel %vm307_vm1, %v7040_v1, %v1033_v19 }
  0x29   : > { %5069 = vmatprep.subr.bf16.mxu0 %v5828_v23  ;;  %5615 = vmatprep.subr.bf16.mxu1 %v6141_v24  ;;  %v839_v23 = vsel %vm307_vm1, %v836_v8, %v7040_v1  ;;  %v5837_v47 = vld [vmem:[#allocation9 + $0x68] ss:$0 sps:$4 sm:$0x11]   ;;  %871 = vst [vmem:[#allocation9 + $0x80] sm:$0xf] %v869_v40  ;;  %v960_v13 = vpack.c.bf16 %v5998_v5, %v958_v3 }
  0x2a   : > { %v338_v32 = vpack.c.bf16 %v5998_v5, %v336_v22  ;;  %903 = vst [vmem:[#allocation9 + $0x84] sm:$0xf] %v901_v44  ;;  %v2076_v57 = vrot.slane %v5837_v47, 1  ;;  %v5844_v22 = vld [vmem:[%s7033_s0 + $0xc8] sm:$0xff]   ;;  %v4593_v40 = vld [vmem:[%s6159_s23 + $0x10] sm:$0xff]   ;;  %v1017_v44 = vrot.slane %v1016_v30, 7 }
  0x2b   : > { %v5839_v61 = vld [vmem:[#allocation9 + $0x6c] sm:$0xfe]   ;;  %v5840_v62 = vld [vmem:[#allocation9 + $0x74] ss:$0 sps:$4 sm:$0x11]   ;;  %v5864_v30 = vld [vmem:[%s7033_s0 + $0xe0] sm:$0xff]  }
  0x2c   : > { %5070 = vmatpush3.bf16.msra.mxu0 %v5830_v25  ;;  %5623 = vmatpush3.bf16.msra.mxu1 %v6141_v24  ;;  %v4591_v25 = vld [vmem:[%s6159_s23 + $0x8] sm:$0xff]   ;;  %340 = vst [vmem:[#allocation9 + $0x14] sm:$0xf] %v338_v32  ;;  %v2079_v11 = vrot.slane %v5840_v62, 1  ;;  %962 = vst [vmem:[#allocation9 + $0x90] sm:$0xf] %v960_v13 }
  0x2d   : > { %5071 = vmatprep.subr.bf16.mxu0 %v5831_v26  ;;  %5616 = vmatprep.subr.bf16.mxu1 %v6152_v27  ;;  %v840_v26 = vrot.slane %v839_v23, 7  ;;  %v364_v38 = vunpack.c.l.bf16 %v4591_v25  ;;  %v384_v41 = vunpack.c.h.bf16 %v4591_v25  ;;  %v977_v25 = vsel %vm307_vm1, %v974_v60, %v954_v42  ;;  %v5852_v32 = vld [vmem:[%s7033_s0 + $0x110] sm:$0xff]  }
  0x2f   : > { %v842_v35 = vpack.c.bf16 %v5998_v5, %v840_v26  ;;  %v367_v46 = vsel %vm307_vm1, %v364_v38, %v7040_v1  ;;  %v387_v49 = vsel %vm307_vm1, %v384_v41, %v364_v38  ;;  %v394_v50 = vsel %vm307_vm1, %v7040_v1, %v384_v41  ;;  %v6278_v41 = vld [vmem:[%s6159_s23 + $0x68] sm:$0xff]  }
  0x30   : > { %5072 = vmatpush3.bf16.msra.mxu0 %v5833_v31  ;;  %5624 = vmatpush3.bf16.msra.mxu1 %v6152_v27  ;;  %v331_v31 = vpack.c.bf16 %v5998_v5, %v329_v20  ;;  %v368_v55 = vrot.slane %v367_v46, 7  ;;  %v388_v56 = vrot.slane %v387_v49, 7  ;;  %v395_v59 = vrot.slane %v394_v50, 7  ;;  %v5848_v29 = vld [vmem:[#allocation9 + $0x80] ss:$0 sps:$4 sm:$0x11]  }
  0x31   : > { %5465 = vmatprep.subr.bf16.mxu0 %v6057_v4  ;;  %5193 = vmatprep.subr.bf16.mxu1 %v5841_v48  ;;  %844 = vst [vmem:[#allocation9 + $0x78] sm:$0xf] %v842_v35  ;;  %v919_v48 = vrot.slane %v918_v45, 7  ;;  %v423_v45 = vunpack.c.l.bf16 %v4593_v40  ;;  %v1072_v51 = vunpack.c.l.bf16 %v6278_v41 }
  0x32   : > { %333 = vst [vmem:[#allocation9 + $0x10] sm:$0xf] %v331_v31  ;;  %v370_v2 = vpack.c.bf16 %v5998_v5, %v368_v55  ;;  %v1019_v55 = vpack.c.bf16 %v5998_v5, %v1017_v44 }
  0x33   : > { %2414 = vmatmul.mubr.bf16.vlgmr.msra.gmra.mrb[0].mxu0 %v5838_v43  ;;  %v5836_v43 = vld [vmem:[#allocation9 + $0x60] sm:$0xfe]   ;;  %v921_v58 = vpack.c.bf16 %v5998_v5, %v919_v48  ;;  %v5846_v17 = vld [vmem:[#allocation9 + $0x14] ss:$0 sps:$4 sm:$0x11]   ;;  %v5853_v48 = vld [vmem:[%s7033_s0 + $0xd0] sm:$0xff]  }
  0x34   : > { %5466 = vmatpush3.bf16.msra.mxu0 %v6057_v4  ;;  %v859_v4 = vsel %vm307_vm1, %v856_v10, %v836_v8  ;;  %v2075_v53 = vrot.slane %v5836_v43, 1  ;;  %v397_v8 = vpack.c.bf16 %v5998_v5, %v395_v59  ;;  %v2078_v10 = vrot.slane %v5839_v61, 1  ;;  %372 = vst [vmem:[#allocation9 + $0x18] sm:$0xf] %v370_v2  ;;  %1021 = vst [vmem:[#allocation9 + $0x9c] sm:$0xf] %v1019_v55 }
  0x35   : > { %5467 = vmatprep.subr.bf16.mxu0 %v6072_v9  ;;  %v860_v33 = vrot.slane %v859_v4, 7  ;;  %923 = vst [vmem:[#allocation9 + $0x88] sm:$0xf] %v921_v58  ;;  %v1620_v28 = vshll.u32 %v5846_v17, 16  ;;  %v1092_v2 = vunpack.c.h.bf16 %v6278_v41  ;;  %v5865_v41 = vld [vmem:[%s7033_s0 + $0x128] sm:$0xff]  }
  0x36   : > { %v6245_v6 = vsel %vm307_vm1, %v2075_v53, %v2076_v57  ;;  %399 = vst [vmem:[#allocation9 + $0x20] sm:$0xf] %v397_v8  ;;  %v6256_v20 = vsel %vm307_vm1, %v2078_v10, %v2079_v11  ;;  %v5854_v53 = vld [vmem:[%s7033_s0 + $0x118] sm:$0xff]   ;;  %v4617_v8 = vld [vmem:[%s6159_s23 + $0x70] sm:$0xff]  }
  0x37   : > { %v862_v39 = vpack.c.bf16 %v5998_v5, %v860_v33  ;;  %5497 = vmatprep.mubr.bf16.mxu1 %v6245_v6  ;;  %v1036_v33 = vsel %vm307_vm1, %v1033_v19, %v1013_v14  ;;  %v1622_v36 = vrot.slane %v1620_v28, 1 }
  0x38   : > { %5468 = vmatpush3.bf16.msra.mxu0 %v6072_v9  ;;  %v925_v9 = vsel %vm307_vm1, %v7040_v1, %v915_v37  ;;  %5498 = vmatmul.mubr.bf16.vlgmr.msra.gmra.mrb[0].mxu1 %v6256_v20  ;;  %v2082_v37 = vrot.slane %v5848_v29, 1 }
  0x39   : > { %5469 = vmatprep.subr.bf16.mxu0 %v6084_v12  ;;  %864 = vst [vmem:[#allocation9 + $0x7c] sm:$0xf] %v862_v39  ;;  %v926_v54 = vrot.slane %v925_v9, 7  ;;  %v5845_v16 = vld [vmem:[#allocation9 + $0xc] sm:$0xff]   ;;  %5194 = vmatpush3.bf16.msra.mxu1 %v5842_v63  ;;  %v978_v39 = vrot.slane %v977_v25, 7  ;;  %v443_v9 = vunpack.c.h.bf16 %v4593_v40 }
  0x3a   : > { %v1613_v26 = vshrl.u32 %v5845_v16, 16  ;;  %v1615_v4 = vshll.u32 %v5845_v16, 16  ;;  %5195 = vmatprep.subr.bf16.mxu1 %v5843_v7  ;;  %v6274_v38 = vld [vmem:[#allocation9 + $0xc] sm:$0xff]   ;;  %v1044_v7 = vrot.slane %v1043_v34, 7 }
  0x3b   : > { %v928_v0 = vpack.c.bf16 %v5998_v5, %v926_v54  ;;  %v980_v50 = vpack.c.bf16 %v5998_v5, %v978_v39  ;;  %v453_v61 = vsel %vm307_vm1, %v7040_v1, %v443_v9  ;;  %v5855_v16 = vld [vmem:[%s7033_s0 + $0xd8] sm:$0xff]   ;;  %v1151_v39 = vunpack.c.h.bf16 %v4617_v8 }
  0x3c   : > { %5470 = vmatpush3.bf16.msra.mxu0 %v6084_v12  ;;  %v390_v12 = vpack.c.bf16 %v5998_v5, %v388_v56  ;;  %v1617_v35 = vrot.slane %v1615_v4, 1  ;;  %v5850_v42 = vld [vmem:[#allocation9 + $0x84] sm:$0xfe]   ;;  %v426_v56 = vsel %vm307_vm1, %v423_v45, %v7040_v1  ;;  %v454_v14 = vrot.slane %v453_v61, 7 }
  0x3d   : > { %5471 = vmatprep.subr.bf16.mxu0 %v6097_v15  ;;  %930 = vst [vmem:[#allocation9 + $0x8c] sm:$0xf] %v928_v0  ;;  %5196 = vmatpush3.bf16.msra.mxu1 %v5844_v22  ;;  %v2084_v52 = vrot.slane %v5850_v42, 1  ;;  %v5857_v59 = vld [vmem:[#allocation9 + $0x20] ss:$0 sps:$4 sm:$0x11]   ;;  %v1075_v0 = vsel %vm307_vm1, %v1072_v51, %v7040_v1  ;;  %v1046_v22 = vpack.c.bf16 %v5998_v5, %v1044_v7 }
  0x3e   : > { %392 = vst [vmem:[#allocation9 + $0x1c] sm:$0xf] %v390_v12  ;;  %v1618_v46 = vor.u32 %v1617_v35, %v1613_v26  ;;  %5197 = vmatprep.subr.bf16.mxu1 %v5852_v32  ;;  %982 = vst [vmem:[#allocation9 + $0x94] sm:$0xf] %v980_v50  ;;  %v1632_v3 = vshll.u32 %v5857_v59, 16  ;;  %v427_v11 = vrot.slane %v426_v56, 7  ;;  %v456_v28 = vpack.c.bf16 %v5998_v5, %v454_v14 }
  0x3f   : > { %v1076_v25 = vrot.slane %v1075_v0, 7  ;;  %1048 = vst [vmem:[#allocation9 + $0xa4] sm:$0xf] %v1046_v22  ;;  %v1102_v32 = vsel %vm307_vm1, %v7040_v1, %v1092_v2  ;;  %v5866_v50 = vld [vmem:[%s7033_s0 + $0xe8] sm:$0xff]  }
  0x40   : > { %5472 = vmatpush3.bf16.msra.mxu0 %v6097_v15  ;;  %v5847_v23 = vld [vmem:[#allocation9 + $0x78] sm:$0xfe]   ;;  %v984_v15 = vsel %vm307_vm1, %v7040_v1, %v974_v60  ;;  %v6298_v57 = vsel %vm1599_vm0, %v1618_v46, %v1622_v36  ;;  %v446_v60 = vsel %vm307_vm1, %v443_v9, %v423_v45  ;;  %v1634_v17 = vrot.slane %v1632_v3, 1  ;;  %458 = vst [vmem:[#allocation9 + $0x2c] sm:$0xf] %v456_v28  ;;  %v4599_v59 = vld [vmem:[%s6159_s23 + $0x28] sm:$0xff]  }
  0x41   : > { %5473 = vmatprep.subr.bf16.mxu0 %v6111_v18  ;;  %v2081_v31 = vrot.slane %v5847_v23, 1  ;;  %v985_v43 = vrot.slane %v984_v15, 7  ;;  %2421 = vmatprep.mubr.bf16.mxu0 %v6298_v57  ;;  %v447_v13 = vrot.slane %v446_v60, 7  ;;  %v5863_v23 = vld [vmem:[%s7033_s0 + $0x120] sm:$0xff]   ;;  %v429_v26 = vpack.c.bf16 %v5998_v5, %v427_v11 }
  0x42   : > { %2422 = vmatmul.mubr.bf16.gmra.mrb[4].mxu0 %v6274_v38  ;;  %5198 = vmatpush3.bf16.msra.mxu1 %v5853_v48  ;;  %v1161_v48 = vsel %vm307_vm1, %v7040_v1, %v1151_v39  ;;  %v620_v11 = vunpack.c.h.bf16 %v4599_v59 }
  0x43   : > { %v987_v54 = vpack.c.bf16 %v5998_v5, %v985_v43  ;;  %5199 = vmatprep.subr.bf16.mxu1 %v5854_v53  ;;  %v449_v4 = vpack.c.bf16 %v5998_v5, %v447_v13  ;;  %431 = vst [vmem:[#allocation9 + $0x24] sm:$0xf] %v429_v26  ;;  %v5874_v53 = vld [vmem:[%s7033_s0 + $0x130] sm:$0xff]  }
  0x44   : > { %5474 = vmatpush3.bf16.msra.mxu0 %v6111_v18  ;;  %v6282_v18 = vsel %vm307_vm1, %v2081_v31, %v2082_v37  ;;  %v5851_v47 = vld [vmem:[#allocation9 + $0x8c] ss:$0 sps:$4 sm:$0x11]   ;;  %v1078_v31 = vpack.c.bf16 %v5998_v5, %v1076_v25  ;;  %v1103_v37 = vrot.slane %v1102_v32, 7 }
  0x45   : > { %5475 = vmatprep.subr.bf16.mxu0 %v6127_v21  ;;  %v5856_v49 = vld [vmem:[#allocation9 + $0x18] sm:$0xff]   ;;  %5501 = vmatprep.mubr.bf16.mxu1 %v6282_v18  ;;  %v2085_v58 = vrot.slane %v5851_v47, 1  ;;  %989 = vst [vmem:[#allocation9 + $0x98] sm:$0xf] %v987_v54  ;;  %v5858_v35 = vld [vmem:[#allocation9 + $0x90] sm:$0xfe]  }
  0x46   : > { %v1625_v62 = vshrl.u32 %v5856_v49, 16  ;;  %v1627_v63 = vshll.u32 %v5856_v49, 16  ;;  %v6327_v29 = vld [vmem:[#allocation9 + $0x18] sm:$0xff]   ;;  %451 = vst [vmem:[#allocation9 + $0x28] sm:$0xf] %v449_v4  ;;  %5200 = vmatpush3.bf16.msra.mxu1 %v5855_v16  ;;  %v2087_v43 = vrot.slane %v5858_v35, 1  ;;  %v1105_v45 = vpack.c.bf16 %v5998_v5, %v1103_v37 }
  0x47   : > { %v6311_v12 = vsel %vm307_vm1, %v2084_v52, %v2085_v58  ;;  %1080 = vst [vmem:[#allocation9 + $0xa8] sm:$0xf] %v1078_v31  ;;  %5201 = vmatprep.subr.bf16.mxu1 %v5863_v23  ;;  %v4595_v49 = vld [vmem:[%s6159_s23 + $0x18] sm:$0xff]   ;;  %v4597_v54 = vld [vmem:[%s6159_s23 + $0x20] sm:$0xff]  }
  0x48   : > { %5476 = vmatpush3.bf16.msra.mxu0 %v6127_v21  ;;  %v1037_v21 = vrot.slane %v1036_v33, 7  ;;  %5502 = vmatmul.mubr.bf16.gmra.mrb[4].mxu1 %v6311_v12  ;;  %v1629_v10 = vrot.slane %v1627_v63, 1  ;;  %v1131_v33 = vunpack.c.l.bf16 %v4617_v8  ;;  %1107 = vst [vmem:[#allocation9 + $0xb0] sm:$0xf] %v1105_v45  ;;  %v482_v56 = vunpack.c.l.bf16 %v4595_v49  ;;  %v5876_v8 = vld [vmem:[%s7033_s0 + $0x138] sm:$0xff]  }
  0x49   : > { %5477 = vmatprep.subr.bf16.mxu0 %v6141_v24  ;;  %v502_v58 = vunpack.c.h.bf16 %v4595_v49  ;;  %v541_v63 = vunpack.c.l.bf16 %v4597_v54  ;;  %v561_v0 = vunpack.c.h.bf16 %v4597_v54  ;;  %v5868_v14 = vld [vmem:[#allocation9 + $0x2c] ss:$0 sps:$4 sm:$0x11]  }
  0x4a   : > { %v1039_v19 = vpack.c.bf16 %v5998_v5, %v1037_v21  ;;  %v1630_v15 = vor.u32 %v1629_v10, %v1625_v62  ;;  %v1134_v42 = vsel %vm307_vm1, %v1131_v33, %v7040_v1  ;;  %v1154_v47 = vsel %vm307_vm1, %v1151_v39, %v1131_v33  ;;  %5202 = vmatpush3.bf16.msra.mxu1 %v5864_v30  ;;  %v5875_v21 = vld [vmem:[%s7033_s0 + $0xf0] sm:$0xff]   ;;  %v5877_v33 = vld [vmem:[%s7033_s0 + $0xf8] sm:$0xff]  }
  0x4b   : > { %v1135_v9 = vrot.slane %v1134_v42, 7  ;;  %v1155_v52 = vrot.slane %v1154_v47, 7  ;;  %5203 = vmatprep.subr.bf16.mxu1 %v5865_v41  ;;  %v600_v10 = vunpack.c.l.bf16 %v4599_v59  ;;  %v505_v22 = vsel %vm307_vm1, %v502_v58, %v482_v56  ;;  %v6404_v47 = vld [vmem:[%s7033_s0 + $0x140] sm:$0xff]  }
  0x4c   : > { %5478 = vmatpush3.bf16.msra.mxu0 %v6141_v24  ;;  %1041 = vst [vmem:[#allocation9 + $0xa0] sm:$0xf] %v1039_v19  ;;  %v1095_v24 = vsel %vm307_vm1, %v1092_v2, %v1072_v51  ;;  %v6338_v34 = vsel %vm1599_vm0, %v1630_v15, %v1634_v17  ;;  %v5859_v40 = vld [vmem:[#allocation9 + $0x98] ss:$0 sps:$4 sm:$0x11]   ;;  %v485_v19 = vsel %vm307_vm1, %v482_v56, %v7040_v1  ;;  %v1644_v28 = vshll.u32 %v5868_v14, 16 }
  0x4d   : > { %5479 = vmatprep.subr.bf16.mxu0 %v6152_v27  ;;  %v1096_v36 = vrot.slane %v1095_v24, 7  ;;  %2429 = vmatprep.mubr.bf16.mxu0 %v6338_v34  ;;  %v2088_v46 = vrot.slane %v5859_v40, 1  ;;  %v1137_v51 = vpack.c.bf16 %v5998_v5, %v1135_v9  ;;  %v1157_v61 = vpack.c.bf16 %v5998_v5, %v1155_v52  ;;  %v5862_v2 = vld [vmem:[#allocation9 + $0xa4] ss:$0 sps:$4 sm:$0x11]  }
  0x4e   : > { %2430 = vmatmul.mubr.bf16.gmra.mrb[8].mxu0 %v6327_v29  ;;  %v5867_v3 = vld [vmem:[#allocation9 + $0x24] sm:$0xff]   ;;  %v2091_v13 = vrot.slane %v5862_v2, 1  ;;  %5204 = vmatpush3.bf16.msra.mxu1 %v5866_v50  ;;  %v512_v23 = vsel %vm307_vm1, %v7040_v1, %v502_v58  ;;  %v544_v25 = vsel %vm307_vm1, %v541_v63, %v7040_v1  ;;  %v564_v15 = vsel %vm307_vm1, %v561_v0, %v541_v63 }
  0x4f   : > { %v1098_v44 = vpack.c.bf16 %v5998_v5, %v1096_v36  ;;  %v6363_v55 = vsel %vm307_vm1, %v2087_v43, %v2088_v46  ;;  %1139 = vst [vmem:[#allocation9 + $0xb4] sm:$0xf] %v1137_v51  ;;  %1159 = vst [vmem:[#allocation9 + $0xb8] sm:$0xf] %v1157_v61  ;;  %v1637_v16 = vshrl.u32 %v5867_v3, 16  ;;  %v1639_v17 = vshll.u32 %v5867_v3, 16  ;;  %5205 = vmatprep.subr.bf16.mxu1 %v5874_v53 }
  0x50   : > { %5480 = vmatpush3.bf16.msra.mxu0 %v6152_v27  ;;  %v1162_v27 = vrot.slane %v1161_v48, 7  ;;  %5505 = vmatprep.mubr.bf16.mxu1 %v6363_v55  ;;  %v6386_v30 = vld [vmem:[#allocation9 + $0x24] sm:$0xff]   ;;  %v571_v31 = vsel %vm307_vm1, %v7040_v1, %v561_v0  ;;  %v5870_v32 = vld [vmem:[#allocation9 + $0xb0] ss:$0 sps:$4 sm:$0x11]   ;;  %v486_v35 = vrot.slane %v485_v19, 7  ;;  %v603_v36 = vsel %vm307_vm1, %v600_v10, %v7040_v1 }
  0x51   : > { %1100 = vst [vmem:[#allocation9 + $0xac] sm:$0xf] %v1098_v44  ;;  %v1641_v4 = vrot.slane %v1639_v17, 1  ;;  %v623_v37 = vsel %vm307_vm1, %v620_v11, %v600_v10  ;;  %v630_v39 = vsel %vm307_vm1, %v7040_v1, %v620_v11  ;;  %v1646_v41 = vrot.slane %v1644_v28, 1  ;;  %v4601_v44 = vld [vmem:[%s6159_s23 + $0x30] sm:$0xff]  }
  0x52   : > { %v1164_v62 = vpack.c.bf16 %v5998_v5, %v1162_v27  ;;  %5206 = vmatpush3.bf16.msra.mxu1 %v5875_v21  ;;  %v506_v42 = vrot.slane %v505_v22, 7  ;;  %v513_v43 = vrot.slane %v512_v23, 7  ;;  %v2094_v9 = vrot.slane %v5870_v32, 1 }
  0x53   : > { %v5861_v60 = vld [vmem:[#allocation9 + $0x9c] sm:$0xfe]   ;;  %v1642_v40 = vor.u32 %v1641_v4, %v1637_v16  ;;  %5207 = vmatprep.subr.bf16.mxu1 %v5876_v8  ;;  %v488_v46 = vpack.c.bf16 %v5998_v5, %v486_v35  ;;  %v545_v48 = vrot.slane %v544_v25, 7  ;;  %v659_v27 = vunpack.c.l.bf16 %v4601_v44 }
  0x54   : > { %v2090_v7 = vrot.slane %v5861_v60, 1  ;;  %1166 = vst [vmem:[#allocation9 + $0xbc] sm:$0xf] %v1164_v62  ;;  %v508_v51 = vpack.c.bf16 %v5998_v5, %v506_v42  ;;  %v515_v52 = vpack.c.bf16 %v5998_v5, %v513_v43  ;;  %v565_v58 = vrot.slane %v564_v15, 7  ;;  %v5888_v4 = vld [vmem:[%s7033_s0 + $0x148] sm:$0xff]   ;;  %v5895_v42 = vld [vmem:[%s7033_s0 + $0x150] sm:$0xff]  }
  0x55   : > { %v6407_v49 = vsel %vm1599_vm0, %v1642_v40, %v1646_v41  ;;  %490 = vst [vmem:[#allocation9 + $0x30] sm:$0xf] %v488_v46  ;;  %v547_v56 = vpack.c.bf16 %v5998_v5, %v545_v48  ;;  %v572_v59 = vrot.slane %v571_v31, 7  ;;  %v604_v61 = vrot.slane %v603_v36, 7 }
  0x56   : > { %v6384_v26 = vsel %vm307_vm1, %v2090_v7, %v2091_v13  ;;  %v5872_v50 = vld [vmem:[#allocation9 + $0xb4] sm:$0xfe]   ;;  %2437 = vmatprep.mubr.bf16.mxu0 %v6407_v49  ;;  %510 = vst [vmem:[#allocation9 + $0x34] sm:$0xf] %v508_v51  ;;  %517 = vst [vmem:[#allocation9 + $0x38] sm:$0xf] %v515_v52  ;;  %5208 = vmatpush3.bf16.msra.mxu1 %v5877_v33  ;;  %v567_v2 = vpack.c.bf16 %v5998_v5, %v565_v58  ;;  %v679_v14 = vunpack.c.h.bf16 %v4601_v44 }
  0x57   : > { %5506 = vmatmul.mubr.bf16.gmra.mrb[8].mxu1 %v6384_v26  ;;  %2438 = vmatmul.mubr.bf16.gmra.mrb[12].mxu0 %v6386_v30  ;;  %v2096_v60 = vrot.slane %v5872_v50, 1  ;;  %v624_v62 = vrot.slane %v623_v37, 7  ;;  %v631_v63 = vrot.slane %v630_v39, 7  ;;  %549 = vst [vmem:[#allocation9 + $0x3c] sm:$0xf] %v547_v56  ;;  %v574_v3 = vpack.c.bf16 %v5998_v5, %v572_v59 }
  0x58   : > { %v5869_v24 = vld [vmem:[#allocation9 + $0xa8] sm:$0xfe]   ;;  %v662_v21 = vsel %vm307_vm1, %v659_v27, %v7040_v1  ;;  %5513 = vmatprep.subr.bf16.mxu1 %v6404_v47  ;;  %v606_v7 = vpack.c.bf16 %v5998_v5, %v604_v61  ;;  %569 = vst [vmem:[#allocation9 + $0x40] sm:$0xf] %v567_v2  ;;  %v682_v17 = vsel %vm307_vm1, %v679_v14, %v659_v27 }
  0x59   : > { %v2093_v45 = vrot.slane %v5869_v24, 1  ;;  %v626_v8 = vpack.c.bf16 %v5998_v5, %v624_v62  ;;  %v633_v10 = vpack.c.bf16 %v5998_v5, %v631_v63  ;;  %v663_v11 = vrot.slane %v662_v21, 7  ;;  %576 = vst [vmem:[#allocation9 + $0x44] sm:$0xf] %v574_v3  ;;  %v5892_v21 = vld [vmem:[#allocation9 + $0x60] sm:$0xff]  }
  0x5a   : > { %608 = vst [vmem:[#allocation9 + $0x48] sm:$0xf] %v606_v7  ;;  %v689_v19 = vsel %vm307_vm1, %v7040_v1, %v679_v14  ;;  %v683_v22 = vrot.slane %v682_v17, 7  ;;  %v5893_v7 = vld [vmem:[#allocation9 + $0x68] ss:$0 sps:$4 sm:$0x11]  }
  0x5b   : > { %v6413_v53 = vsel %vm307_vm1, %v2093_v45, %v2094_v9  ;;  %v5873_v54 = vld [vmem:[#allocation9 + $0xbc] ss:$0 sps:$4 sm:$0x11]   ;;  %628 = vst [vmem:[#allocation9 + $0x4c] sm:$0xf] %v626_v8  ;;  %v665_v16 = vpack.c.bf16 %v5998_v5, %v663_v11  ;;  %v690_v23 = vrot.slane %v689_v19, 7 }
  0x5c   : > { %5509 = vmatprep.mubr.bf16.mxu1 %v6413_v53  ;;  %v2097_v0 = vrot.slane %v5873_v54, 1  ;;  %635 = vst [vmem:[#allocation9 + $0x50] sm:$0xf] %v633_v10  ;;  %v685_v28 = vpack.c.bf16 %v5998_v5, %v683_v22  ;;  %v5902_v8 = vld [vmem:[%s7033_s0 + $0x158] sm:$0xff]   ;;  %v1699_v11 = vshll.u32 %v5892_v21, 16  ;;  %v1704_v17 = vshll.u32 %v5893_v7, 16 }
  0x5d   : > { %667 = vst [vmem:[#allocation9 + $0x54] sm:$0xf] %v665_v16  ;;  %v5878_v25 = vld [vmem:[#allocation9 + $0x30] sm:$0xff]   ;;  %v5879_v15 = vld [vmem:[#allocation9 + $0x38] ss:$0 sps:$4 sm:$0x11]   ;;  %v692_v31 = vpack.c.bf16 %v5998_v5, %v690_v23 }
  0x5e   : > { %v6427_v13 = vsel %vm307_vm1, %v2096_v60, %v2097_v0  ;;  %v1649_v24 = vshrl.u32 %v5878_v25, 16  ;;  %v1656_v32 = vshll.u32 %v5879_v15, 16  ;;  %687 = vst [vmem:[#allocation9 + $0x58] sm:$0xf] %v685_v28  ;;  %v6440_v39 = vld [vmem:[#allocation9 + $0x30] sm:$0xff]   ;;  %v1697_v16 = vshrl.u32 %v5892_v21, 16 }
  0x5f   : > { %5510 = vmatmul.mubr.bf16.gmra.mrb[12].mxu1 %v6427_v13  ;;  %v5882_v33 = vld [vmem:[#allocation9 + $0x3c] sm:$0xff]   ;;  %694 = vst [vmem:[#allocation9 + $0x5c] sm:$0xf] %v692_v31  ;;  %v1701_v22 = vrot.slane %v1699_v11, 1  ;;  %v5896_v23 = vld [vmem:[#allocation9 + $0x6c] sm:$0xff]  }
  0x60   : > { %3009 = vmatprep.mubr.bf16.mxu1 %v6298_v57  ;;  %v1651_v57 = vshll.u32 %v5878_v25, 16  ;;  %v5883_v36 = vld [vmem:[#allocation9 + $0x44] ss:$0 sps:$4 sm:$0x11]   ;;  %v1658_v37 = vrot.slane %v1656_v32, 1  ;;  %v1661_v40 = vshrl.u32 %v5882_v33, 16 }
  0x61   : > { %v1663_v41 = vshll.u32 %v5882_v33, 16  ;;  %v1668_v44 = vshll.u32 %v5883_v36, 16  ;;  %v6458_v62 = vld [vmem:[#allocation9 + $0x3c] sm:$0xff]   ;;  %v1702_v15 = vor.u32 %v1701_v22, %v1697_v16  ;;  %v1711_v28 = vshll.u32 %v5896_v23, 16  ;;  %v5941_v16 = vld [vmem:[%s7033_s0 + $0x178] sm:$0xff]  }
  0x62   : > { %v1653_v35 = vrot.slane %v1651_v57, 1  ;;  %v5885_v45 = vld [vmem:[#allocation9 + $0x48] sm:$0xff]   ;;  %v5909_v25 = vld [vmem:[%s7033_s0 + $0x160] sm:$0xff]   ;;  %v5916_v36 = vld [vmem:[%s7033_s0 + $0x168] sm:$0xff]  }
  0x63   : > { %v1665_v9 = vrot.slane %v1663_v41, 1  ;;  %v5886_v46 = vld [vmem:[#allocation9 + $0x50] ss:$0 sps:$4 sm:$0x11]   ;;  %v1673_v50 = vshrl.u32 %v5885_v45, 16  ;;  %v1675_v51 = vshll.u32 %v5885_v45, 16 }
  0x64   : > { %v1654_v43 = vor.u32 %v1653_v35, %v1649_v24  ;;  %v1680_v27 = vshll.u32 %v5886_v46, 16  ;;  %v6470_v14 = vld [vmem:[#allocation9 + $0x48] sm:$0xff]   ;;  %v1709_v24 = vshrl.u32 %v5896_v23, 16  ;;  %v1713_v33 = vrot.slane %v1711_v28, 1  ;;  %v5899_v35 = vld [vmem:[#allocation9 + $0x78] sm:$0xff]   ;;  %v6500_v45 = vld [vmem:[#allocation9 + $0x60] sm:$0xff]  }
  0x65   : > { %v1666_v52 = vor.u32 %v1665_v9, %v1661_v40  ;;  %v5889_v54 = vld [vmem:[#allocation9 + $0x54] sm:$0xff]   ;;  %v5903_v46 = vld [vmem:[#allocation9 + $0x84] sm:$0xff]   ;;  %v5910_v23 = vld [vmem:[#allocation9 + $0x9c] sm:$0xff]  }
  0x66   : > { %v6449_v48 = vsel %vm1599_vm0, %v1654_v43, %v1658_v37  ;;  %v1682_v58 = vrot.slane %v1680_v27, 1  ;;  %v5890_v60 = vld [vmem:[#allocation9 + $0x5c] ss:$0 sps:$4 sm:$0x11]   ;;  %v1687_v61 = vshll.u32 %v5889_v54, 16  ;;  %v1685_v0 = vshrl.u32 %v5889_v54, 16 }
  0x67   : > { %3010 = vmatmul.mubr.bf16.vlgmr.msra.gmra.mrb[16].mxu1 %v6274_v38  ;;  %v1670_v38 = vrot.slane %v1668_v44, 1  ;;  %2445 = vmatprep.mubr.bf16.mxu0 %v6449_v48  ;;  %v1692_v3 = vshll.u32 %v5890_v60, 16  ;;  %v6481_v31 = vld [vmem:[#allocation9 + $0x54] sm:$0xff]   ;;  %v5900_v37 = vld [vmem:[#allocation9 + $0x80] ss:$0 sps:$4 sm:$0x11]   ;;  %v1714_v40 = vor.u32 %v1713_v33, %v1709_v24 }
  0x68   : > { %5514 = vmatpush3.bf16.msra.mxu1 %v6404_v47  ;;  %3017 = vmatprep.mubr.bf16.mxu1 %v6338_v34  ;;  %v1677_v47 = vrot.slane %v1675_v51, 1  ;;  %v1689_v2 = vrot.slane %v1687_v61, 1  ;;  %v5924_v43 = vld [vmem:[%s7033_s0 + $0x170] sm:$0xff]   ;;  %v5925_v44 = vld [vmem:[%s7033_s0 + $0x1c0] sm:$0xff]   ;;  %v1728_v9 = vshll.u32 %v5900_v37, 16  ;;  %v4619_v37 = vld [vmem:[%s6159_s23 + $0x78] sm:$0xff]  }
  0x69   : > { %5515 = vmatprep.subr.bf16.mxu1 %v5888_v4  ;;  %2446 = vmatmul.mubr.bf16.gmra.mrb[16].mxu0 %v6440_v39  ;;  %v6454_v56 = vsel %vm1599_vm0, %v1666_v52, %v1670_v38  ;;  %v1694_v10 = vrot.slane %v1692_v3, 1  ;;  %v5904_v52 = vld [vmem:[#allocation9 + $0x8c] ss:$0 sps:$4 sm:$0x11]   ;;  %v6529_v28 = vld [vmem:[#allocation9 + $0x84] sm:$0xff]  }
  0x6a   : > { %2453 = vmatprep.mubr.bf16.mxu0 %v6454_v56  ;;  %v1678_v59 = vor.u32 %v1677_v47, %v1673_v50  ;;  %5329 = vmatprep.subr.bf16.mxu0 %v5925_v44  ;;  %v1721_v50 = vshrl.u32 %v5899_v35, 16  ;;  %v1730_v27 = vrot.slane %v1728_v9, 1  ;;  %v1735_v47 = vshll.u32 %v5903_v46, 16  ;;  %v5907_v3 = vld [vmem:[#allocation9 + $0x98] ss:$0 sps:$4 sm:$0x11]  }
  0x6b   : > { %v1740_v61 = vshll.u32 %v5904_v52, 16  ;;  %v1752_v11 = vshll.u32 %v5907_v3, 16 }
  0x6c   : > { %5516 = vmatpush3.bf16.msra.mxu1 %v5888_v4  ;;  %v6462_v63 = vsel %vm1599_vm0, %v1678_v59, %v1682_v58  ;;  %v1706_v4 = vrot.slane %v1704_v17, 1  ;;  %v6508_v58 = vld [vmem:[#allocation9 + $0x6c] sm:$0xff]   ;;  %v1733_v59 = vshrl.u32 %v5903_v46, 16  ;;  %v1737_v60 = vrot.slane %v1735_v47, 1 }
  0x6d   : > { %5517 = vmatprep.subr.bf16.mxu1 %v5895_v42  ;;  %v1742_v7 = vrot.slane %v1740_v61, 1 }
  0x6e   : > { %v6486_v32 = vsel %vm1599_vm0, %v1702_v15, %v1706_v4  ;;  %v1738_v21 = vor.u32 %v1737_v60, %v1733_v59  ;;  %v1754_v15 = vrot.slane %v1752_v11, 1  ;;  %v1759_v4 = vshll.u32 %v5910_v23, 16  ;;  %v5918_v11 = vld [vmem:[#allocation9 + $0xbc] ss:$0 sps:$4 sm:$0x11]  }
  0x6f   : > { %3018 = vmatmul.mubr.bf16.gmra.mrb[20].mxu1 %v6327_v29  ;;  %v1690_v29 = vor.u32 %v1689_v2, %v1685_v0  ;;  %v5906_v0 = vld [vmem:[#allocation9 + $0x90] sm:$0xff]  }
  0x70   : > { %3025 = vmatprep.mubr.bf16.mxu1 %v6407_v49  ;;  %5518 = vmatpush3.bf16.msra.mxu1 %v5895_v42  ;;  %v1723_v42 = vshll.u32 %v5899_v35, 16  ;;  %v6525_v17 = vsel %vm1599_vm0, %v1738_v21, %v1742_v7  ;;  %v1757_v35 = vshrl.u32 %v5910_v23, 16  ;;  %v5917_v21 = vld [vmem:[#allocation9 + $0xb4] sm:$0xff]   ;;  %v6563_v23 = vld [vmem:[#allocation9 + $0x9c] sm:$0xff]  }
  0x71   : > { %2454 = vmatmul.mubr.bf16.gmra.mrb[20].mxu0 %v6458_v62  ;;  %5519 = vmatprep.subr.bf16.mxu1 %v5902_v8  ;;  %v6474_v19 = vsel %vm1599_vm0, %v1690_v29, %v1694_v10  ;;  %v6518_v29 = vld [vmem:[#allocation9 + $0x78] sm:$0xff]   ;;  %v1745_v10 = vshrl.u32 %v5906_v0, 16 }
  0x72   : > { %2461 = vmatprep.mubr.bf16.mxu0 %v6462_v63  ;;  %v1725_v51 = vrot.slane %v1723_v42, 1 }
  0x74   : > { %5520 = vmatpush3.bf16.msra.mxu1 %v5902_v8  ;;  %v1726_v54 = vor.u32 %v1725_v51, %v1721_v50  ;;  %v1747_v8 = vshll.u32 %v5906_v0, 16 }
  0x75   : > { %5521 = vmatprep.subr.bf16.mxu1 %v5909_v25 }
  0x76   : > { %v6513_v2 = vsel %vm1599_vm0, %v1726_v54, %v1730_v27  ;;  %v1749_v22 = vrot.slane %v1747_v8, 1  ;;  %v6545_v54 = vld [vmem:[#allocation9 + $0x90] sm:$0xff]  }
  0x77   : > { %3026 = vmatmul.mubr.bf16.gmra.mrb[24].mxu1 %v6386_v30  ;;  %v5897_v30 = vld [vmem:[#allocation9 + $0x74] ss:$0 sps:$4 sm:$0x11]  }
  0x78   : > { %3033 = vmatprep.mubr.bf16.mxu1 %v6449_v48  ;;  %5522 = vmatpush3.bf16.msra.mxu1 %v5909_v25  ;;  %v1716_v57 = vshll.u32 %v5897_v30, 16  ;;  %v5911_v25 = vld [vmem:[#allocation9 + $0xa4] ss:$0 sps:$4 sm:$0x11]   ;;  %v1750_v30 = vor.u32 %v1749_v22, %v1745_v10  ;;  %v6557_v10 = vld [vmem:[%s7033_s0 + $0x200] sm:$0xff]   ;;  %v1783_v22 = vshll.u32 %v5917_v21, 16 }
  0x79   : > { %2462 = vmatmul.mubr.bf16.gmra.mrb[24].mxu0 %v6470_v14  ;;  %5523 = vmatprep.subr.bf16.mxu1 %v5916_v36  ;;  %v1764_v24 = vshll.u32 %v5911_v25, 16 }
  0x7a   : > { %2469 = vmatprep.mubr.bf16.mxu0 %v6474_v19  ;;  %v1718_v41 = vrot.slane %v1716_v57, 1  ;;  %v5913_v57 = vld [vmem:[#allocation9 + $0xa8] sm:$0xff]   ;;  %v6534_v33 = vsel %vm1599_vm0, %v1750_v30, %v1754_v15  ;;  %v1781_v30 = vshrl.u32 %v5917_v21, 16  ;;  %v1785_v15 = vrot.slane %v1783_v22, 1  ;;  %v5926_v21 = vld [vmem:[%s7033_s0 + $0x180] sm:$0xff]  }
  0x7b   : > { %v1766_v42 = vrot.slane %v1764_v24, 1  ;;  %v1771_v44 = vshll.u32 %v5913_v57, 16  ;;  %v1769_v59 = vshrl.u32 %v5913_v57, 16  ;;  %v5937_v22 = vld [vmem:[#allocation9 + $0x30] sm:$0xfe]  }
  0x7c   : > { %5524 = vmatpush3.bf16.msra.mxu1 %v5916_v36  ;;  %v6504_v38 = vsel %vm1599_vm0, %v1714_v40, %v1718_v41  ;;  %v1761_v36 = vrot.slane %v1759_v4, 1  ;;  %v1190_v40 = vunpack.c.l.bf16 %v4619_v37  ;;  %v1210_v41 = vunpack.c.h.bf16 %v4619_v37  ;;  %v5920_v37 = vld [vmem:[#allocation9] sm:$0xfe]  }
  0x7d   : > { %5525 = vmatprep.subr.bf16.mxu1 %v5924_v43  ;;  %v1773_v8 = vrot.slane %v1771_v44, 1  ;;  %v1788_v4 = vshll.u32 %v5918_v11, 16  ;;  %v1786_v24 = vor.u32 %v1785_v15, %v1781_v30  ;;  %v5922_v44 = vld [vmem:[#allocation9 + $0xc] sm:$0xfe]  }
  0x7e   : > { %v1193_v9 = vsel %vm307_vm1, %v1190_v40, %v7040_v1  ;;  %v1213_v46 = vsel %vm307_vm1, %v1210_v41, %v1190_v40  ;;  %v1220_v50 = vsel %vm307_vm1, %v7040_v1, %v1210_v41  ;;  %v1762_v51 = vor.u32 %v1761_v36, %v1757_v35  ;;  %v6572_v35 = vld [vmem:[#allocation9 + $0xa8] sm:$0xff]   ;;  %v5938_v30 = vld [vmem:[#allocation9 + $0x38] ss:$0 sps:$4 sm:$0x11]  }
  0x7f   : > { %3034 = vmatmul.mubr.bf16.gmra.mrb[28].mxu1 %v6440_v39  ;;  %v1194_v52 = vrot.slane %v1193_v9, 7  ;;  %v1214_v27 = vrot.slane %v1213_v46, 7  ;;  %v1221_v47 = vrot.slane %v1220_v50, 7  ;;  %v1790_v57 = vrot.slane %v1788_v4, 1  ;;  %v5929_v50 = vld [vmem:[#allocation9 + $0x18] sm:$0xfe]  }
  0x80   : > { %3041 = vmatprep.mubr.bf16.mxu1 %v6454_v56  ;;  %5526 = vmatpush3.bf16.msra.mxu1 %v5924_v43  ;;  %v5914_v43 = vld [vmem:[#allocation9 + $0xb0] ss:$0 sps:$4 sm:$0x11]   ;;  %v6552_v7 = vsel %vm1599_vm0, %v1762_v51, %v1766_v42  ;;  %v5921_v40 = vld [vmem:[#allocation9 + $0x8] ss:$0 sps:$4 sm:$0x11]  }
  0x81   : > { %2470 = vmatmul.mubr.bf16.gmra.mrb[28].mxu0 %v6481_v31  ;;  %5527 = vmatprep.subr.bf16.mxu1 %v5941_v16  ;;  %v1196_v60 = vpack.c.bf16 %v5998_v5, %v1194_v52  ;;  %v1216_v61 = vpack.c.bf16 %v5998_v5, %v1214_v27  ;;  %v4955_v0 = vpack.c.bf16 %v7040_v1, %v1221_v47  ;;  %v1776_v3 = vshll.u32 %v5914_v43, 16  ;;  %v6581_v43 = vld [vmem:[#allocation9 + $0xb4] sm:$0xff]   ;;  %v5930_v51 = vld [vmem:[#allocation9 + $0x20] ss:$0 sps:$4 sm:$0x11]  }
  0x82   : > { %2477 = vmatprep.mubr.bf16.mxu0 %v6486_v32  ;;  %v1774_v5 = vor.u32 %v1773_v8, %v1769_v59  ;;  %v6576_v36 = vsel %vm1599_vm0, %v1786_v24, %v1790_v57  ;;  %v2051_v41 = vrot.slane %v5920_v37, 1  ;;  %v2052_v42 = vrot.slane %v5921_v40, 1  ;;  %v5923_v9 = vld [vmem:[#allocation9 + $0x14] ss:$0 sps:$4 sm:$0x11]   ;;  %v5928_v4 = vld [vmem:[%s7033_s0 + $0x188] sm:$0xff]  }
  0x83   : > { %1198 = vst [vmem:[#allocation9 + $0xc0] sm:$0xf] %v1196_v60  ;;  %1218 = vst [vmem:[#allocation9 + $0xc4] sm:$0xf] %v1216_v61  ;;  %v2054_v52 = vrot.slane %v5922_v44, 1  ;;  %v2055_v27 = vrot.slane %v5923_v9, 1 }
  0x84   : > { %5528 = vmatpush3.bf16.msra.mxu1 %v5941_v16  ;;  %4956 = vst [vmem:[#allocation9 + $0xc8] sm:$0xff] %v4955_v0   ;;  %v1778_v16 = vrot.slane %v1776_v3, 1  ;;  %v2053_v46 = vsel %vm307_vm1, %v2051_v41, %v2052_v42  ;;  %v2057_v59 = vrot.slane %v5929_v50, 1  ;;  %v2058_v60 = vrot.slane %v5930_v51, 1  ;;  %v5931_v61 = vld [vmem:[#allocation9 + $0x24] sm:$0xfe]  }
  0x85   : > { %5561 = vmatprep.subr.bf16.mxu1 %v6557_v10  ;;  %v5932_v0 = vld [vmem:[#allocation9 + $0x2c] ss:$0 sps:$4 sm:$0x11]   ;;  %v6589_v3 = vsel %vm307_vm1, %v2054_v52, %v2055_v27  ;;  %v2060_v15 = vrot.slane %v5931_v61, 1  ;;  %v2063_v42 = vrot.slane %v5937_v22, 1  ;;  %v2064_v44 = vrot.slane %v5938_v30, 1 }
  0x86   : > { %v6567_v25 = vsel %vm1599_vm0, %v1774_v5, %v1778_v16  ;;  %v5927_v5 = vld [vmem:[%s7033_s0 + $0x1c8] sm:$0xff]   ;;  %v6598_v16 = vsel %vm307_vm1, %v2057_v59, %v2058_v60  ;;  %v2061_v24 = vrot.slane %v5932_v0, 1  ;;  %v5933_v41 = vld [vmem:[%s7033_s0 + $0x1d0] sm:$0xff]   ;;  %v5947_v61 = vld [vmem:[#allocation9 + $0x50] ss:$0 sps:$4 sm:$0x11]  }
  0x87   : > { %3042 = vmatmul.mubr.bf16.gmra.mrb[32].mxu1 %v6458_v62  ;;  %v5934_v9 = vld [vmem:[%s7033_s0 + $0x190] sm:$0xff]   ;;  %v5939_v50 = vld [vmem:[#allocation9 + $0x3c] sm:$0xfe]   ;;  %v5940_v51 = vld [vmem:[#allocation9 + $0x44] ss:$0 sps:$4 sm:$0x11]   ;;  %v6620_v59 = vsel %vm307_vm1, %v2063_v42, %v2064_v44 }
  0x88   : > { %3049 = vmatprep.mubr.bf16.mxu1 %v6462_v63  ;;  %v5946_v60 = vld [vmem:[#allocation9 + $0x48] sm:$0xfe]   ;;  %v5936_v0 = vld [vmem:[%s7033_s0 + $0x198] sm:$0xff]   ;;  %v2070_v30 = vrot.slane %v5947_v61, 1  ;;  %v5945_v42 = vld [vmem:[%s7033_s0 + $0x1a8] sm:$0xff]  }
  0x89   : > { %2478 = vmatmul.mubr.bf16.gmra.mrb[32].mxu0 %v6500_v45  ;;  %v2069_v22 = vrot.slane %v5946_v60, 1  ;;  %v5959_v60 = vld [vmem:[%s7033_s0 + $0x210] sm:$0xff]   ;;  %v5972_v61 = vld [vmem:[#allocation9 + $0x18] sm:$0xff]  }
  0x8a   : > { %2485 = vmatprep.mubr.bf16.mxu0 %v6504_v38  ;;  %v5948_v47 = vld [vmem:[#allocation9 + $0xc0] sm:$0xff]  }
  0x8b   : > { %v5949_v8 = vld [vmem:[#allocation9 + $0xc8] ss:$0 sps:$4 sm:$0x11]   ;;  %v1795_v11 = vshll.u32 %v5948_v47, 16  ;;  %v1793_v57 = vshrl.u32 %v5948_v47, 16  ;;  %v5935_v47 = vld [vmem:[%s7033_s0 + $0x1d8] sm:$0xff]  }
  0x8c   : > { %v1800_v40 = vshll.u32 %v5949_v8, 16  ;;  %v2067_v8 = vrot.slane %v5940_v51, 1 }
  0x8d   : > { %v1797_v37 = vrot.slane %v1795_v11, 1 }
  0x8e   : > { %v1802_v27 = vrot.slane %v1800_v40, 1  ;;  %v6645_v40 = vsel %vm307_vm1, %v2069_v22, %v2070_v30 }
  0x8f   : > { %3050 = vmatmul.mubr.bf16.gmra.mrb[36].mxu1 %v6470_v14  ;;  %v1798_v52 = vor.u32 %v1797_v37, %v1793_v57  ;;  %v5951_v57 = vld [vmem:[#allocation9 + $0x5c] ss:$0 sps:$4 sm:$0x11]   ;;  %v5944_v37 = vld [vmem:[%s7033_s0 + $0x1e8] sm:$0xff]  }
  0x90   : > { %3057 = vmatprep.mubr.bf16.mxu1 %v6474_v19 }
  0x91   : > { %2486 = vmatmul.mubr.bf16.gmra.mrb[36].mxu0 %v6508_v58  ;;  %v6628_v11 = vsel %vm1599_vm0, %v1798_v52, %v1802_v27  ;;  %v5954_v52 = vld [vmem:[%s7033_s0 + $0x1b0] sm:$0xff]   ;;  %v5955_v27 = vld [vmem:[%s7033_s0 + $0x1f8] sm:$0xff]  }
  0x92   : > { %2493 = vmatprep.mubr.bf16.mxu0 %v6513_v2 }
  0x97   : > { %3058 = vmatmul.mubr.bf16.gmra.mrb[40].mxu1 %v6481_v31 }
  0x98   : > { %3065 = vmatprep.mubr.bf16.mxu1 %v6486_v32 }
  0x99   : > { %2494 = vmatmul.mubr.bf16.gmra.mrb[40].mxu0 %v6518_v29 }
  0x9a   : > { %2501 = vmatprep.mubr.bf16.mxu0 %v6525_v17 }
  0x9f   : > { %3066 = vmatmul.mubr.bf16.gmra.mrb[44].mxu1 %v6500_v45 }
  0xa0   : > { %3073 = vmatprep.mubr.bf16.mxu1 %v6504_v38 }
  0xa1   : > { %2502 = vmatmul.mubr.bf16.gmra.mrb[44].mxu0 %v6529_v28 }
  0xa2   : > { %2509 = vmatprep.mubr.bf16.mxu0 %v6534_v33 }
  0xa7   : > { %3074 = vmatmul.mubr.bf16.gmra.mrb[48].mxu1 %v6508_v58 }
  0xa8   : > { %3081 = vmatprep.mubr.bf16.mxu1 %v6513_v2 }
  0xa9   : > { %2510 = vmatmul.mubr.bf16.gmra.mrb[48].mxu0 %v6545_v54 }
  0xaa   : > { %2517 = vmatprep.mubr.bf16.mxu0 %v6552_v7 }
  0xaf   : > { %3082 = vmatmul.mubr.bf16.gmra.mrb[52].mxu1 %v6518_v29 }
  0xb0   : > { %3089 = vmatprep.mubr.bf16.mxu1 %v6525_v17 }
  0xb1   : > { %2518 = vmatmul.mubr.bf16.gmra.mrb[52].mxu0 %v6563_v23 }
  0xb2   : > { %2525 = vmatprep.mubr.bf16.mxu0 %v6567_v25 }
  0xb7   : > { %3090 = vmatmul.mubr.bf16.gmra.mrb[56].mxu1 %v6529_v28 }
  0xb8   : > { %3097 = vmatprep.mubr.bf16.mxu1 %v6534_v33 }
  0xb9   : > { %2526 = vmatmul.mubr.bf16.gmra.mrb[56].mxu0 %v6572_v35 }
  0xba   : > { %2533 = vmatprep.mubr.bf16.mxu0 %v6576_v36 }
  0xbf   : > { %3098 = vmatmul.mubr.bf16.gmra.mrb[60].mxu1 %v6545_v54 }
  0xc0   : > { %3105 = vmatprep.mubr.bf16.mxu1 %v6552_v7 }
  0xc1   : > { %2534 = vmatmul.mubr.bf16.gmra.mrb[60].mxu0 %v6581_v43 }
  0xc2   : > { %5481 = vmatprep.mubr.bf16.mxu0 %v2053_v46  ;;  %v6614_v46 = vsel %vm307_vm1, %v2060_v15, %v2061_v24  ;;  %v5950_v24 = vld [vmem:[#allocation9 + $0x54] sm:$0xfe]  }
  0xc3   : > { %v2072_v44 = vrot.slane %v5950_v24, 1 }
  0xc7   : > { %3106 = vmatmul.mubr.bf16.gmra.mrb[64].mxu1 %v6563_v23 }
  0xc8   : > { %3113 = vmatprep.mubr.bf16.mxu1 %v6567_v25 }
  0xc9   : > { %5482 = vmatmul.mubr.bf16.vlgmr.msra.gmra.mrb[64].mxu0 %v6589_v3 }
  0xca   : > { %5330 = vmatpush3.bf16.msra.mxu0 %v5926_v21  ;;  %5485 = vmatprep.mubr.bf16.mxu0 %v6598_v16  ;;  %v2066_v21 = vrot.slane %v5939_v50, 1  ;;  %v5953_v50 = vld [vmem:[%s7033_s0 + $0x1f0] sm:$0xff]  }
  0xcb   : > { %5331 = vmatprep.subr.bf16.mxu0 %v5927_v5  ;;  %v5942_v5 = vld [vmem:[%s7033_s0 + $0x1e0] sm:$0xff]  }
  0xcc   : > { %v6636_v15 = vsel %vm307_vm1, %v2066_v21, %v2067_v8  ;;  %v5963_v21 = vld [vmem:[%s7033_s0 + $0x230] sm:$0xff]  }
  0xce   : > { %5332 = vmatpush3.bf16.msra.mxu0 %v5928_v4  ;;  %v5943_v4 = vld [vmem:[%s7033_s0 + $0x1a0] sm:$0xff]  }
  0xcf   : > { %3114 = vmatmul.mubr.bf16.gmra.mrb[68].mxu1 %v6572_v35  ;;  %5333 = vmatprep.subr.bf16.mxu0 %v5933_v41  ;;  %v6647_v41 = vld [vmem:[#allocation9 + $0xc0] sm:$0xff]  }
  0xd0   : > { %3121 = vmatprep.mubr.bf16.mxu1 %v6576_v36 }
  0xd1   : > { %5486 = vmatmul.mubr.bf16.gmra.mrb[68].mxu0 %v6614_v46 }
  0xd2   : > { %5334 = vmatpush3.bf16.msra.mxu0 %v5934_v9  ;;  %5489 = vmatprep.mubr.bf16.mxu0 %v6620_v59  ;;  %v2073_v9 = vrot.slane %v5951_v57, 1 }
  0xd3   : > { %5335 = vmatprep.subr.bf16.mxu0 %v5935_v47  ;;  %v5958_v47 = vld [vmem:[%s7033_s0 + $0x208] sm:$0xff]  }
  0xd4   : > { %v6660_v51 = vsel %vm307_vm1, %v2072_v44, %v2073_v9 }
  0xd6   : > { %5336 = vmatpush3.bf16.msra.mxu0 %v5936_v0  ;;  %v5973_v0 = vld [vmem:[#allocation9 + $0x24] sm:$0xff]  }
  0xd7   : > { %3122 = vmatmul.mubr.bf16.gmra.mrb[72].mxu1 %v6581_v43  ;;  %5337 = vmatprep.subr.bf16.mxu0 %v5942_v5 }
  0xd8   : > { %3129 = vmatprep.mubr.bf16.mxu1 %v6628_v11 }
  0xd9   : > { %5490 = vmatmul.mubr.bf16.gmra.mrb[72].mxu0 %v6636_v15 }
  0xda   : > { %5338 = vmatpush3.bf16.msra.mxu0 %v5943_v4  ;;  %5493 = vmatprep.mubr.bf16.mxu0 %v6645_v40  ;;  %v5965_v4 = vld [vmem:[#allocation9 + $0xc8] ss:$0 sps:$4 sm:$0x11]  }
  0xdb   : > { %5339 = vmatprep.subr.bf16.mxu0 %v5944_v37  ;;  %v2100_v24 = vrot.slane %v5965_v4, 1 }
  0xde   : > { %5340 = vmatpush3.bf16.msra.mxu0 %v5945_v42 }
  0xdf   : > { %3130 = vmatmul.mubr.bf16.gmra.mrb[76].mxu1 %v6647_v41  ;;  %5341 = vmatprep.subr.bf16.mxu0 %v5953_v50 }
  0xe0   : > { %5529 = vmatprep.mubr.bf16.mxu1 %v6589_v3  ;;  %v5956_v3 = vld [vmem:[%s7033_s0 + $0x1b8] sm:$0xff]  }
  0xe1   : > { %5494 = vmatmul.mubr.bf16.gmra.mrb[76].mxu0 %v6660_v51 }
  0xe2   : > { %5342 = vmatpush3.bf16.msra.mxu0 %v5954_v52  ;;  %3669 = vmatprep.mubr.bf16.mxu0 %v6338_v34  ;;  %v5960_v34 = vld [vmem:[%s7033_s0 + $0x218] sm:$0xff]  }
  0xe3   : > { %5343 = vmatprep.subr.bf16.mxu0 %v5955_v27 }
  0xe6   : > { %5344 = vmatpush3.bf16.msra.mxu0 %v5956_v3 }
  0xe7   : > { %5530 = vmatmul.mubr.bf16.vlgmr.msra.gmra.mrb[80].mxu1 %v6598_v16 }
  0xe8   : > { %5562 = vmatpush3.bf16.msra.mxu1 %v6557_v10  ;;  %5533 = vmatprep.mubr.bf16.mxu1 %v6614_v46  ;;  %v5961_v10 = vld [vmem:[%s7033_s0 + $0x220] sm:$0xff]  }
  0xe9   : > { %5563 = vmatprep.subr.bf16.mxu1 %v5958_v47  ;;  %3670 = vmatmul.mubr.bf16.vlgmr.msra.gmra.mrb[80].mxu0 %v5972_v61 }
  0xea   : > { %3677 = vmatprep.mubr.bf16.mxu0 %v6407_v49  ;;  %v5962_v49 = vld [vmem:[%s7033_s0 + $0x228] sm:$0xff]  }
  0xec   : > { %5564 = vmatpush3.bf16.msra.mxu1 %v5958_v47 }
  0xed   : > { %5565 = vmatprep.subr.bf16.mxu1 %v5959_v60 }
  0xef   : > { %5534 = vmatmul.mubr.bf16.gmra.mrb[84].mxu1 %v6620_v59 }
  0xf0   : > { %5537 = vmatprep.mubr.bf16.mxu1 %v6636_v15  ;;  %5566 = vmatpush3.bf16.msra.mxu1 %v5959_v60 }
  0xf1   : > { %5567 = vmatprep.subr.bf16.mxu1 %v5960_v34  ;;  %3678 = vmatmul.mubr.bf16.gmra.mrb[84].mxu0 %v5973_v0 }
  0xf2   : > { %3685 = vmatprep.mubr.bf16.mxu0 %v6449_v48  ;;  %v5966_v48 = vld [vmem:[%s7033_s0 + $0x238] sm:$0xff]  }
  0xf4   : > { %5568 = vmatpush3.bf16.msra.mxu1 %v5960_v34 }
  0xf5   : > { %5569 = vmatprep.subr.bf16.mxu1 %v5961_v10 }
  0xf7   : > { %5538 = vmatmul.mubr.bf16.gmra.mrb[88].mxu1 %v6645_v40 }
  0xf8   : > { %5541 = vmatprep.mubr.bf16.mxu1 %v6660_v51  ;;  %5570 = vmatpush3.bf16.msra.mxu1 %v5961_v10 }
  0xf9   : > { %5571 = vmatprep.subr.bf16.mxu1 %v5962_v49  ;;  %3686 = vmatmul.mubr.bf16.gmra.mrb[88].mxu0 %v6440_v39 }
  0xfa   : > { %3693 = vmatprep.mubr.bf16.mxu0 %v6454_v56 }
  0xfc   : > { %5572 = vmatpush3.bf16.msra.mxu1 %v5962_v49 }
  0xfd   : > { %5573 = vmatprep.subr.bf16.mxu1 %v5963_v21 }
  0xff   : > { %5542 = vmatmul.mubr.bf16.gmra.mrb[92].mxu1 %v6245_v6 }
 0x100   : > { %5545 = vmatprep.mubr.bf16.mxu1 %v6256_v20  ;;  %5574 = vmatpush3.bf16.msra.mxu1 %v5963_v21 }
 0x101   : > { %5575 = vmatprep.subr.bf16.mxu1 %v5966_v48  ;;  %3694 = vmatmul.mubr.bf16.gmra.mrb[92].mxu0 %v6458_v62  ;;  %v5964_v62 = vld [vmem:[#allocation9 + $0xc0] sm:$0xfe]  }
 0x102   : > { %3701 = vmatprep.mubr.bf16.mxu0 %v6462_v63  ;;  %v2099_v63 = vrot.slane %v5964_v62, 1 }
 0x104   : > { %5576 = vmatpush3.bf16.msra.mxu1 %v5966_v48 }
 0x106   : > { %v5073_v8 = vpop.f32.mrb[0].mxu0 }
 0x107   : > { %v5074_v5 = vpop.f32.mrb[1].mxu0  ;;  %5546 = vmatmul.mubr.bf16.gmra.mrb[0].mxu1 %v6282_v18 }
 0x108   : > { %v6707_v22 = vadd.f32 %v5074_v5, %v5073_v8  ;;  %v5076_v30 = vpop.f32.mrb[2].mxu0  ;;  %5549 = vmatprep.mubr.bf16.mxu1 %v6311_v12 }
 0x109   : > { %v5077_v39 = vpop.f32.mrb[3].mxu0  ;;  %3702 = vmatmul.mubr.bf16.gmra.mrb[96].mxu0 %v6470_v14 }
 0x10a   : > { %v6710_v56 = vadd.f32 %v5077_v39, %v5076_v30  ;;  %3709 = vmatprep.mubr.bf16.mxu0 %v6474_v19 }
 0x10f   : > { %5550 = vmatmul.mubr.bf16.gmra.mrb[4].mxu1 %v6363_v55 }
 0x110   : > { %5553 = vmatprep.mubr.bf16.mxu1 %v6384_v26 }
 0x111   : > { %3710 = vmatmul.mubr.bf16.gmra.mrb[100].mxu0 %v6481_v31  ;;  %v6727_v31 = vsel %vm307_vm1, %v2099_v63, %v2100_v24 }
 0x112   : > { %3717 = vmatprep.mubr.bf16.mxu0 %v6486_v32 }
 0x115   : > { %v5079_v57 = vpop.f32.mrb[4].mxu0 }
 0x116   : > { %v5080_v14 = vpop.f32.mrb[5].mxu0 }
 0x117   : > { %5554 = vmatmul.mubr.bf16.gmra.mrb[8].mxu1 %v6413_v53  ;;  %v6723_v37 = vadd.f32 %v5080_v14, %v5079_v57  ;;  %v5082_v19 = vpop.f32.mrb[6].mxu0 }
 0x118   : > { %5557 = vmatprep.mubr.bf16.mxu1 %v6427_v13  ;;  %v5083_v42 = vpop.f32.mrb[7].mxu0 }
 0x119   : > { %3718 = vmatmul.mubr.bf16.gmra.mrb[104].mxu0 %v6500_v45  ;;  %v6729_v44 = vadd.f32 %v5083_v42, %v5082_v19 }
 0x11a   : > { %3725 = vmatprep.mubr.bf16.mxu0 %v6504_v38 }
 0x11f   : > { %5558 = vmatmul.mubr.bf16.gmra.mrb[12].mxu1 %v6727_v31 }
 0x120   : > { %5577 = vmatprep.mubr.bf16.mxu1 %v6598_v16 }
 0x121   : > { %v5085_v32 = vpop.f32.mrb[8].mxu0  ;;  %3726 = vmatmul.mubr.bf16.gmra.mrb[108].mxu0 %v6508_v58 }
 0x122   : > { %v5086_v9 = vpop.f32.mrb[9].mxu0  ;;  %3733 = vmatprep.mubr.bf16.mxu0 %v6513_v2 }
 0x123   : > { %v6734_v50 = vadd.f32 %v5086_v9, %v5085_v32  ;;  %v5088_v52 = vpop.f32.mrb[10].mxu0 }
 0x124   : > { %v5089_v27 = vpop.f32.mrb[11].mxu0 }
 0x125   : > { %v6737_v45 = vadd.f32 %v5089_v27, %v5088_v52 }
 0x127   : > { %5578 = vmatmul.mubr.bf16.vlgmr.msra.gmra.mrb[80].mxu1 %v6614_v46 }
 0x128   : > { %5581 = vmatprep.mubr.bf16.mxu1 %v6620_v59 }
 0x129   : > { %3734 = vmatmul.mubr.bf16.gmra.mrb[112].mxu0 %v6518_v29 }
 0x12a   : > { %3741 = vmatprep.mubr.bf16.mxu0 %v6525_v17  ;;  %v5091_v38 = vpop.f32.mrb[12].mxu0 }
 0x12b   : > { %v5092_v16 = vpop.f32.mrb[13].mxu0 }
 0x12c   : > { %v6745_v3 = vadd.f32 %v5092_v16, %v5091_v38  ;;  %v5094_v47 = vpop.f32.mrb[14].mxu0 }
 0x12d   : > { %v5095_v58 = vpop.f32.mrb[15].mxu0 }
 0x12e   : > { %v6748_v60 = vadd.f32 %v5095_v58, %v5094_v47  ;;  %v5971_v47 = vld [vmem:[#allocation9 + $0xd4] ss:$0 sps:$4 sm:$0x11]  }
 0x12f   : > { %5582 = vmatmul.mubr.bf16.gmra.mrb[84].mxu1 %v6636_v15 }
 0x130   : > { %5585 = vmatprep.mubr.bf16.mxu1 %v6645_v40 }
 0x131   : > { %3742 = vmatmul.mubr.bf16.gmra.mrb[116].mxu0 %v6529_v28 }
 0x132   : > { %3749 = vmatprep.mubr.bf16.mxu0 %v6534_v33 }
 0x137   : > { %5586 = vmatmul.mubr.bf16.gmra.mrb[88].mxu1 %v6660_v51 }
 0x138   : > { %5589 = vmatprep.mubr.bf16.mxu1 %v6245_v6 }
 0x139   : > { %3750 = vmatmul.mubr.bf16.gmra.mrb[120].mxu0 %v6545_v54 }
 0x13a   : > { %v5209_v2 = vpop.f32.mrb[16].mxu1  ;;  %3757 = vmatprep.mubr.bf16.mxu0 %v6552_v7 }
 0x13b   : > { %v5210_v29 = vpop.f32.mrb[17].mxu1 }
 0x13c   : > { %v6755_v17 = vadd.f32 %v5210_v29, %v5209_v2  ;;  %v5212_v46 = vpop.f32.mrb[18].mxu1  ;;  %v5097_v40 = vpop.f32.mrb[16].mxu0 }
 0x13d   : > { %v5213_v59 = vpop.f32.mrb[19].mxu1  ;;  %v5098_v28 = vpop.f32.mrb[17].mxu0 }
 0x13e   : > { %v6758_v15 = vadd.f32 %v5213_v59, %v5212_v46  ;;  %v6762_v33 = vadd.f32 %v5098_v28, %v5097_v40  ;;  %v5100_v6 = vpop.f32.mrb[18].mxu0 }
 0x13f   : > { %5590 = vmatmul.mubr.bf16.gmra.mrb[92].mxu1 %v6256_v20  ;;  %v5101_v51 = vpop.f32.mrb[19].mxu0 }
 0x140   : > { %5593 = vmatprep.mubr.bf16.mxu1 %v6282_v18  ;;  %v6764_v54 = vadd.f32 %v5101_v51, %v5100_v6 }
 0x141   : > { %3758 = vmatmul.mubr.bf16.gmra.mrb[124].mxu0 %v6563_v23  ;;  %v5967_v23 = vld [vmem:[#allocation9 + $0xcc] sm:$0xff]  }
 0x142   : > { %v5215_v61 = vpop.f32.mrb[20].mxu1  ;;  %3765 = vmatprep.mubr.bf16.mxu0 %v6567_v25  ;;  %v1807_v63 = vshll.u32 %v5967_v23, 16  ;;  %v1805_v32 = vshrl.u32 %v5967_v23, 16 }
 0x143   : > { %v5216_v34 = vpop.f32.mrb[21].mxu1 }
 0x144   : > { %v6767_v10 = vadd.f32 %v5216_v34, %v5215_v61  ;;  %v5218_v7 = vpop.f32.mrb[22].mxu1  ;;  %v5103_v49 = vpop.f32.mrb[20].mxu0  ;;  %v1809_v9 = vrot.slane %v1807_v63, 1 }
 0x145   : > { %v5219_v0 = vpop.f32.mrb[23].mxu1  ;;  %v5104_v18 = vpop.f32.mrb[21].mxu0 }
 0x146   : > { %v6770_v20 = vadd.f32 %v5219_v0, %v5218_v7  ;;  %v6774_v21 = vadd.f32 %v5104_v18, %v5103_v49  ;;  %v5106_v48 = vpop.f32.mrb[22].mxu0  ;;  %v1810_v2 = vor.u32 %v1809_v9, %v1805_v32 }
 0x147   : > { %5594 = vmatmul.mubr.bf16.gmra.mrb[0].mxu1 %v6311_v12  ;;  %v5107_v8 = vpop.f32.mrb[23].mxu0 }
 0x148   : > { %5597 = vmatprep.mubr.bf16.mxu1 %v6363_v55  ;;  %v6776_v30 = vadd.f32 %v5107_v8, %v5106_v48  ;;  %v5968_v55 = vld [vmem:[#allocation9 + $0xd4] ss:$0 sps:$4 sm:$0x11]  }
 0x149   : > { %3766 = vmatmul.mubr.bf16.gmra.mrb[128].mxu0 %v6572_v35  ;;  %v1812_v52 = vshll.u32 %v5968_v55, 16 }
 0x14a   : > { %v5221_v5 = vpop.f32.mrb[24].mxu1  ;;  %3773 = vmatprep.mubr.bf16.mxu0 %v6576_v36 }
 0x14b   : > { %v5222_v39 = vpop.f32.mrb[25].mxu1  ;;  %v1814_v29 = vrot.slane %v1812_v52, 1 }
 0x14c   : > { %v6779_v25 = vadd.f32 %v5222_v39, %v5221_v5  ;;  %v5224_v62 = vpop.f32.mrb[26].mxu1  ;;  %v5109_v24 = vpop.f32.mrb[24].mxu0  ;;  %v5969_v5 = vld [vmem:[#allocation9 + $0xcc] sm:$0xff]  }
 0x14d   : > { %v5225_v4 = vpop.f32.mrb[27].mxu1  ;;  %v5110_v57 = vpop.f32.mrb[25].mxu0  ;;  %v1815_v34 = vsel %vm1599_vm0, %v1810_v2, %v1814_v29 }
 0x14e   : > { %v6782_v12 = vadd.f32 %v5225_v4, %v5224_v62  ;;  %v6786_v14 = vadd.f32 %v5110_v57, %v5109_v24  ;;  %v5112_v19 = vpop.f32.mrb[26].mxu0 }
 0x14f   : > { %5598 = vmatmul.mubr.bf16.gmra.mrb[4].mxu1 %v6384_v26  ;;  %v5113_v35 = vpop.f32.mrb[27].mxu0  ;;  %v5970_v26 = vld [vmem:[#allocation9 + $0xcc] sm:$0xfe]  }
 0x150   : > { %5601 = vmatprep.mubr.bf16.mxu1 %v6413_v53  ;;  %v6788_v27 = vadd.f32 %v5113_v35, %v5112_v19  ;;  %v2102_v40 = vrot.slane %v5970_v26, 1 }
 0x151   : > { %3774 = vmatmul.mubr.bf16.gmra.mrb[132].mxu0 %v6581_v43  ;;  %v2103_v43 = vrot.slane %v5971_v47, 1 }
 0x152   : > { %v5227_v42 = vpop.f32.mrb[28].mxu1  ;;  %3781 = vmatprep.mubr.bf16.mxu0 %v6628_v11 }
 0x153   : > { %v5228_v36 = vpop.f32.mrb[29].mxu1  ;;  %v2104_v49 = vsel %vm307_vm1, %v2102_v40, %v2103_v43 }
 0x154   : > { %v6791_v38 = vadd.f32 %v5228_v36, %v5227_v42  ;;  %v5230_v16 = vpop.f32.mrb[30].mxu1  ;;  %v5115_v46 = vpop.f32.mrb[28].mxu0 }
 0x155   : > { %v5231_v58 = vpop.f32.mrb[31].mxu1  ;;  %v5116_v59 = vpop.f32.mrb[29].mxu0 }
 0x156   : > { %v6794_v53 = vadd.f32 %v5231_v58, %v5230_v16  ;;  %v6798_v28 = vadd.f32 %v5116_v59, %v5115_v46  ;;  %v5118_v6 = vpop.f32.mrb[30].mxu0 }
 0x157   : > { %5602 = vmatmul.mubr.bf16.gmra.mrb[8].mxu1 %v6427_v13  ;;  %v5119_v51 = vpop.f32.mrb[31].mxu0 }
 0x158   : > { %5605 = vmatprep.mubr.bf16.mxu1 %v6727_v31  ;;  %v6801_v11 = vadd.f32 %v5119_v51, %v5118_v6 }
 0x159   : > { %3782 = vmatmul.mubr.bf16.gmra.mrb[136].mxu0 %v6647_v41 }
 0x15a   : > { %v5233_v61 = vpop.f32.mrb[32].mxu1  ;;  %3789 = vmatprep.mubr.bf16.mxu0 %v1815_v34 }
 0x15b   : > { %v5234_v7 = vpop.f32.mrb[33].mxu1 }
 0x15c   : > { %v6804_v0 = vadd.f32 %v5234_v7, %v5233_v61  ;;  %v5236_v13 = vpop.f32.mrb[34].mxu1  ;;  %v5121_v48 = vpop.f32.mrb[32].mxu0 }
 0x15d   : > { %v5237_v31 = vpop.f32.mrb[35].mxu1  ;;  %v5122_v8 = vpop.f32.mrb[33].mxu0 }
 0x15e   : > { %v6807_v18 = vadd.f32 %v5237_v31, %v5236_v13  ;;  %v5123_v23 = vadd.f32 %v5122_v8, %v5121_v48  ;;  %v5124_v39 = vpop.f32.mrb[34].mxu0 }
 0x15f   : > { %5606 = vmatmul.mubr.bf16.gmra.mrb[12].mxu1 %v2104_v49  ;;  %v5125_v62 = vpop.f32.mrb[35].mxu0 }
 0x160   : > { %v5126_v55 = vadd.f32 %v5125_v62, %v5124_v39 }
 0x161   : > { %3790 = vmatmul.mubr.bf16.gmra.mrb[140].mxu0 %v5969_v5 }
 0x162   : > { %v5239_v4 = vpop.f32.mrb[36].mxu1 }
 0x163   : > { %v5240_v63 = vpop.f32.mrb[37].mxu1 }
 0x164   : > { %v6809_v41 = vadd.f32 %v5240_v63, %v5239_v4  ;;  %v5242_v24 = vpop.f32.mrb[38].mxu1  ;;  %v5127_v35 = vpop.f32.mrb[36].mxu0 }
 0x165   : > { %v5243_v57 = vpop.f32.mrb[39].mxu1  ;;  %v5128_v42 = vpop.f32.mrb[37].mxu0 }
 0x166   : > { %v6811_v19 = vadd.f32 %v5243_v57, %v5242_v24  ;;  %v5129_v32 = vadd.f32 %v5128_v42, %v5127_v35  ;;  %v5130_v9 = vpop.f32.mrb[38].mxu0 }
 0x167   : > { %v5131_v52 = vpop.f32.mrb[39].mxu0 }
 0x168   : > { %v5132_v16 = vadd.f32 %v5131_v52, %v5130_v9 }
 0x16a   : > { %v5245_v36 = vpop.f32.mrb[40].mxu1 }
 0x16b   : > { %v5246_v26 = vpop.f32.mrb[41].mxu1 }
 0x16c   : > { %v6813_v47 = vadd.f32 %v5246_v26, %v5245_v36  ;;  %v5248_v58 = vpop.f32.mrb[42].mxu1  ;;  %v5133_v46 = vpop.f32.mrb[40].mxu0 }
 0x16d   : > { %v5249_v2 = vpop.f32.mrb[43].mxu1  ;;  %v5134_v59 = vpop.f32.mrb[41].mxu0 }
 0x16e   : > { %v6815_v29 = vadd.f32 %v5249_v2, %v5248_v58  ;;  %v5135_v40 = vadd.f32 %v5134_v59, %v5133_v46  ;;  %v5136_v43 = vpop.f32.mrb[42].mxu0 }
 0x16f   : > { %v5137_v6 = vpop.f32.mrb[43].mxu0 }
 0x170   : > { %v5138_v61 = vadd.f32 %v5137_v6, %v5136_v43 }
 0x172   : > { %v5251_v51 = vpop.f32.mrb[44].mxu1 }
 0x173   : > { %v5252_v34 = vpop.f32.mrb[45].mxu1 }
 0x174   : > { %v6817_v7 = vadd.f32 %v5252_v34, %v5251_v51  ;;  %v5254_v13 = vpop.f32.mrb[46].mxu1  ;;  %v5139_v48 = vpop.f32.mrb[44].mxu0 }
 0x175   : > { %v5255_v49 = vpop.f32.mrb[47].mxu1  ;;  %v5140_v8 = vpop.f32.mrb[45].mxu0 }
 0x176   : > { %v6819_v31 = vadd.f32 %v5255_v49, %v5254_v13  ;;  %v5141_v5 = vadd.f32 %v5140_v8, %v5139_v48  ;;  %v5142_v39 = vpop.f32.mrb[46].mxu0 }
 0x177   : > { %v5143_v62 = vpop.f32.mrb[47].mxu0 }
 0x178   : > { %v5144_v63 = vadd.f32 %v5143_v62, %v5142_v39 }
 0x17a   : > { %v5257_v4 = vpop.f32.mrb[48].mxu1 }
 0x17b   : > { %v5258_v24 = vpop.f32.mrb[49].mxu1 }
 0x17c   : > { %v5259_v57 = vadd.f32 %v5258_v24, %v5257_v4  ;;  %v5260_v35 = vpop.f32.mrb[50].mxu1  ;;  %v5145_v36 = vpop.f32.mrb[48].mxu0 }
 0x17d   : > { %v5261_v42 = vpop.f32.mrb[51].mxu1  ;;  %v5146_v26 = vpop.f32.mrb[49].mxu0 }
 0x17e   : > { %v6821_v9 = vadd.f32 %v5259_v57, %v5123_v23  ;;  %v5262_v52 = vadd.f32 %v5261_v42, %v5260_v35  ;;  %v5147_v2 = vadd.f32 %v5146_v26, %v5145_v36  ;;  %v5148_v46 = vpop.f32.mrb[50].mxu0 }
 0x17f   : > { %v5149_v59 = vpop.f32.mrb[51].mxu0 }
 0x180   : > { %v6823_v58 = vadd.f32 %v5262_v52, %v5126_v55  ;;  %v5150_v6 = vadd.f32 %v5149_v59, %v5148_v46 }
 0x182   : > { %v5263_v43 = vpop.f32.mrb[52].mxu1 }
 0x183   : > { %v5264_v51 = vpop.f32.mrb[53].mxu1 }
 0x184   : > { %v5265_v34 = vadd.f32 %v5264_v51, %v5263_v43  ;;  %v5266_v13 = vpop.f32.mrb[54].mxu1  ;;  %v5151_v39 = vpop.f32.mrb[52].mxu0 }
 0x185   : > { %v5267_v49 = vpop.f32.mrb[55].mxu1  ;;  %v5152_v23 = vpop.f32.mrb[53].mxu0 }
 0x186   : > { %v6825_v48 = vadd.f32 %v5265_v34, %v5129_v32  ;;  %v5268_v8 = vadd.f32 %v5267_v49, %v5266_v13  ;;  %v5153_v4 = vadd.f32 %v5152_v23, %v5151_v39  ;;  %v5154_v24 = vpop.f32.mrb[54].mxu0 }
 0x187   : > { %v5155_v55 = vpop.f32.mrb[55].mxu0 }
 0x188   : > { %v6827_v62 = vadd.f32 %v5268_v8, %v5132_v16  ;;  %v5156_v35 = vadd.f32 %v5155_v55, %v5154_v24 }
 0x18a   : > { %v5269_v57 = vpop.f32.mrb[56].mxu1 }
 0x18b   : > { %v5270_v42 = vpop.f32.mrb[57].mxu1 }
 0x18c   : > { %v5271_v52 = vadd.f32 %v5270_v42, %v5269_v57  ;;  %v5272_v36 = vpop.f32.mrb[58].mxu1  ;;  %v5157_v43 = vpop.f32.mrb[56].mxu0 }
 0x18d   : > { %v5273_v26 = vpop.f32.mrb[59].mxu1  ;;  %v5158_v32 = vpop.f32.mrb[57].mxu0 }
 0x18e   : > { %v6829_v46 = vadd.f32 %v5271_v52, %v5135_v40  ;;  %v5274_v59 = vadd.f32 %v5273_v26, %v5272_v36  ;;  %v6833_v34 = vadd.f32 %v5158_v32, %v5157_v43  ;;  %v5160_v16 = vpop.f32.mrb[58].mxu0 }
 0x18f   : > { %v5161_v13 = vpop.f32.mrb[59].mxu0 }
 0x190   : > { %v6831_v51 = vadd.f32 %v5274_v59, %v5138_v61  ;;  %v6835_v8 = vadd.f32 %v5161_v13, %v5160_v16 }
 0x192   : > { %v5275_v49 = vpop.f32.mrb[60].mxu1 }
 0x193   : > { %v5276_v39 = vpop.f32.mrb[61].mxu1 }
 0x194   : > { %v5277_v23 = vadd.f32 %v5276_v39, %v5275_v49  ;;  %v5278_v24 = vpop.f32.mrb[62].mxu1  ;;  %v5163_v42 = vpop.f32.mrb[60].mxu0 }
 0x195   : > { %v5279_v55 = vpop.f32.mrb[63].mxu1  ;;  %v5164_v52 = vpop.f32.mrb[61].mxu0 }
 0x196   : > { %v6837_v57 = vadd.f32 %v5277_v23, %v5141_v5  ;;  %v5280_v40 = vadd.f32 %v5279_v55, %v5278_v24  ;;  %v6841_v61 = vadd.f32 %v5164_v52, %v5163_v42  ;;  %v5166_v26 = vpop.f32.mrb[62].mxu0 }
 0x197   : > { %v5167_v59 = vpop.f32.mrb[63].mxu0 }
 0x198   : > { %v6839_v36 = vadd.f32 %v5280_v40, %v5144_v63  ;;  %v6843_v32 = vadd.f32 %v5167_v59, %v5166_v26 }
 0x19a   : > { %v5281_v43 = vpop.f32.mrb[64].mxu1 }
 0x19b   : > { %v5282_v16 = vpop.f32.mrb[65].mxu1 }
 0x19c   : > { %v5283_v13 = vadd.f32 %v5282_v16, %v5281_v43  ;;  %v5284_v1 = vpop.f32.mrb[66].mxu1  ;;  %v5483_v23 = vpop.f32.mrb[64].mxu0 }
 0x19d   : > { %v5285_v49 = vpop.f32.mrb[67].mxu1  ;;  %v2585_v24 = vadd.f32 %v5483_v23, %v6723_v37  ;;  %v2576_v55 = vpop.f32.mrb[65].mxu0 }
 0x19e   : > { %v6845_v39 = vadd.f32 %v5283_v13, %v5147_v2  ;;  %v5286_v5 = vadd.f32 %v5285_v49, %v5284_v1  ;;  %v2577_v40 = vadd.f32 %v6707_v22, %v2576_v55  ;;  %v5484_v42 = vpop.f32.mrb[66].mxu0 }
 0x19f   : > { %v6852_v52 = vadd.f32 %v6767_v10, %v2585_v24  ;;  %v2588_v26 = vadd.f32 %v5484_v42, %v6729_v44  ;;  %v2579_v59 = vpop.f32.mrb[67].mxu0 }
 0x1a0   : > { %v6848_v63 = vadd.f32 %v5286_v5, %v5150_v6  ;;  %v6856_v2 = vadd.f32 %v6755_v17, %v2577_v40  ;;  %v2580_v1 = vadd.f32 %v6710_v56, %v2579_v59 }
 0x1a1   : > { %v6860_v37 = vadd.f32 %v6770_v20, %v2588_v26 }
 0x1a2   : > { %v5287_v43 = vpop.f32.mrb[68].mxu1  ;;  %v6863_v22 = vadd.f32 %v6758_v15, %v2580_v1 }
 0x1a3   : > { %v5288_v16 = vpop.f32.mrb[69].mxu1 }
 0x1a4   : > { %v5289_v6 = vadd.f32 %v5288_v16, %v5287_v43  ;;  %v5290_v13 = vpop.f32.mrb[70].mxu1  ;;  %v5487_v5 = vpop.f32.mrb[68].mxu0 }
 0x1a5   : > { %v5291_v10 = vpop.f32.mrb[71].mxu1  ;;  %v2601_v23 = vadd.f32 %v5487_v5, %v6745_v3  ;;  %v2592_v17 = vpop.f32.mrb[69].mxu0 }
 0x1a6   : > { %v6865_v49 = vadd.f32 %v5289_v6, %v5153_v4  ;;  %v5292_v44 = vadd.f32 %v5291_v10, %v5290_v13  ;;  %v2593_v56 = vadd.f32 %v6734_v50, %v2592_v17  ;;  %v5488_v55 = vpop.f32.mrb[70].mxu0 }
 0x1a7   : > { %v6872_v20 = vadd.f32 %v6791_v38, %v2601_v23  ;;  %v2604_v40 = vadd.f32 %v5488_v55, %v6748_v60  ;;  %v2595_v15 = vpop.f32.mrb[71].mxu0 }
 0x1a8   : > { %v6868_v24 = vadd.f32 %v5292_v44, %v5156_v35  ;;  %v6876_v4 = vadd.f32 %v6779_v25, %v2593_v56  ;;  %v2596_v26 = vadd.f32 %v6737_v45, %v2595_v15 }
 0x1a9   : > { %v6880_v3 = vadd.f32 %v6794_v53, %v2604_v40 }
 0x1aa   : > { %v5293_v42 = vpop.f32.mrb[72].mxu1  ;;  %v5654_v50 = vadd.f32 %v6782_v12, %v2596_v26 }
 0x1ab   : > { %v5294_v59 = vpop.f32.mrb[73].mxu1 }
 0x1ac   : > { %v5295_v35 = vadd.f32 %v5294_v59, %v5293_v42  ;;  %v5296_v43 = vpop.f32.mrb[74].mxu1  ;;  %v5491_v16 = vpop.f32.mrb[72].mxu0 }
 0x1ad   : > { %v5297_v1 = vpop.f32.mrb[75].mxu1  ;;  %v2617_v6 = vadd.f32 %v5491_v16, %v6774_v21  ;;  %v2608_v25 = vpop.f32.mrb[73].mxu0 }
 0x1ae   : > { %v6884_v38 = vadd.f32 %v5295_v35, %v6833_v34  ;;  %v5298_v60 = vadd.f32 %v5297_v1, %v5296_v43  ;;  %v2609_v45 = vadd.f32 %v6762_v33, %v2608_v25  ;;  %v5492_v53 = vpop.f32.mrb[74].mxu0 }
 0x1af   : > { %v6892_v10 = vadd.f32 %v6809_v41, %v2617_v6  ;;  %v2620_v12 = vadd.f32 %v5492_v53, %v6776_v30  ;;  %v2611_v44 = vpop.f32.mrb[75].mxu0 }
 0x1b0   : > { %v6888_v13 = vadd.f32 %v5298_v60, %v6835_v8  ;;  %v5662_v34 = vadd.f32 %v6804_v0, %v2609_v45  ;;  %v2612_v23 = vadd.f32 %v6764_v54, %v2611_v44 }
 0x1b1   : > { %v6898_v21 = vadd.f32 %v6811_v19, %v2620_v12 }
 0x1b2   : > { %v5299_v5 = vpop.f32.mrb[76].mxu1  ;;  %v5670_v33 = vadd.f32 %v6807_v18, %v2612_v23 }
 0x1b3   : > { %v5300_v17 = vpop.f32.mrb[77].mxu1 }
 0x1b4   : > { %v5301_v8 = vadd.f32 %v5300_v17, %v5299_v5  ;;  %v5302_v56 = vpop.f32.mrb[78].mxu1  ;;  %v5495_v30 = vpop.f32.mrb[76].mxu0 }
 0x1b5   : > { %v5303_v55 = vpop.f32.mrb[79].mxu1  ;;  %v2633_v15 = vadd.f32 %v5495_v30, %v6798_v28  ;;  %v2624_v42 = vpop.f32.mrb[77].mxu0 }
 0x1b6   : > { %v6902_v41 = vadd.f32 %v5301_v8, %v6841_v61  ;;  %v5304_v40 = vadd.f32 %v5303_v55, %v5302_v56  ;;  %v2625_v54 = vadd.f32 %v6786_v14, %v2624_v42  ;;  %v5496_v19 = vpop.f32.mrb[78].mxu0 }
 0x1b7   : > { %v6910_v26 = vadd.f32 %v6817_v7, %v2633_v15  ;;  %v2636_v18 = vadd.f32 %v5496_v19, %v6801_v11  ;;  %v2627_v59 = vpop.f32.mrb[79].mxu0 }
 0x1b8   : > { %v6906_v0 = vadd.f32 %v5304_v40, %v6843_v32  ;;  %v5678_v61 = vadd.f32 %v6813_v47, %v2625_v54  ;;  %v2628_v35 = vadd.f32 %v6788_v27, %v2627_v59 }
 0x1b9   : > { %v6916_v43 = vadd.f32 %v6819_v31, %v2636_v18 }
 0x1ba   : > { %v5686_v28 = vadd.f32 %v6815_v29, %v2628_v35 }
 0x1bc   : > { %v5345_v32 = vpop.f32.mrb[80].mxu0 }
 0x1bd   : > { %v5346_v1 = vpop.f32.mrb[81].mxu0 }
 0x1be   : > { %v5347_v60 = vadd.f32 %v5346_v1, %v5345_v32  ;;  %v5348_v14 = vpop.f32.mrb[82].mxu0 }
 0x1bf   : > { %v5349_v16 = vpop.f32.mrb[83].mxu0 }
 0x1c0   : > { %v5350_v6 = vadd.f32 %v5349_v16, %v5348_v14  ;;  %v5631_v7 = vadd.f32 %v6856_v2, %v5347_v60 }
 0x1c2   : > { %v6921_v11 = vadd.f32 %v6863_v22, %v5350_v6 }
 0x1c4   : > { %v5351_v25 = vpop.f32.mrb[84].mxu0 }
 0x1c5   : > { %v5352_v47 = vpop.f32.mrb[85].mxu0 }
 0x1c6   : > { %v5353_v45 = vadd.f32 %v5352_v47, %v5351_v25  ;;  %v5354_v27 = vpop.f32.mrb[86].mxu0 }
 0x1c7   : > { %v5355_v53 = vpop.f32.mrb[87].mxu0 }
 0x1c8   : > { %v5356_v31 = vadd.f32 %v5355_v53, %v5354_v27  ;;  %v5627_v12 = vadd.f32 %v6852_v52, %v5353_v45 }
 0x1ca   : > { %v5635_v29 = vadd.f32 %v6860_v37, %v5356_v31 }
 0x1cc   : > { %v5357_v44 = vpop.f32.mrb[88].mxu0 }
 0x1cd   : > { %v5358_v5 = vpop.f32.mrb[89].mxu0 }
 0x1ce   : > { %v5359_v23 = vadd.f32 %v5358_v5, %v5357_v44  ;;  %v5360_v17 = vpop.f32.mrb[90].mxu0 }
 0x1cf   : > { %v5361_v8 = vpop.f32.mrb[91].mxu0 }
 0x1d0   : > { %v5362_v56 = vadd.f32 %v5361_v8, %v5360_v17  ;;  %v6926_v2 = vadd.f32 %v6876_v4, %v5359_v23 }
 0x1d2   : > { %v6928_v22 = vadd.f32 %v5654_v50, %v5362_v56 }
 0x1d4   : > { %v5363_v55 = vpop.f32.mrb[92].mxu0 }
 0x1d5   : > { %v5364_v40 = vpop.f32.mrb[93].mxu0 }
 0x1d6   : > { %v5365_v30 = vadd.f32 %v5364_v40, %v5363_v55  ;;  %v5366_v15 = vpop.f32.mrb[94].mxu0 }
 0x1d7   : > { %v5367_v42 = vpop.f32.mrb[95].mxu0 }
 0x1d8   : > { %v5368_v54 = vadd.f32 %v5367_v42, %v5366_v15  ;;  %v5643_v52 = vadd.f32 %v6872_v20, %v5365_v30 }
 0x1da   : > { %v6932_v37 = vadd.f32 %v6880_v3, %v5368_v54 }
 0x1dc   : > { %v5369_v19 = vpop.f32.mrb[96].mxu0 }
 0x1dd   : > { %v5370_v18 = vpop.f32.mrb[97].mxu0 }
 0x1de   : > { %v5371_v59 = vadd.f32 %v5370_v18, %v5369_v19  ;;  %v5372_v35 = vpop.f32.mrb[98].mxu0 }
 0x1df   : > { %v5373_v32 = vpop.f32.mrb[99].mxu0 }
 0x1e0   : > { %v5374_v4 = vadd.f32 %v5373_v32, %v5372_v35  ;;  %v6934_v1 = vadd.f32 %v5662_v34, %v5371_v59 }
 0x1e2   : > { %v6936_v50 = vadd.f32 %v5670_v33, %v5374_v4 }
 0x1e4   : > { %v5375_v60 = vpop.f32.mrb[100].mxu0 }
 0x1e5   : > { %v5376_v14 = vpop.f32.mrb[101].mxu0 }
 0x1e6   : > { %v5377_v16 = vadd.f32 %v5376_v14, %v5375_v60  ;;  %v5378_v6 = vpop.f32.mrb[102].mxu0 }
 0x1e7   : > { %v5379_v25 = vpop.f32.mrb[103].mxu0 }
 0x1e8   : > { %v5380_v47 = vadd.f32 %v5379_v25, %v5378_v6  ;;  %v6939_v20 = vadd.f32 %v6892_v10, %v5377_v16 }
 0x1ea   : > { %v6942_v3 = vadd.f32 %v6898_v21, %v5380_v47 }
 0x1ec   : > { %v5381_v45 = vpop.f32.mrb[104].mxu0 }
 0x1ed   : > { %v5382_v27 = vpop.f32.mrb[105].mxu0 }
 0x1ee   : > { %v5383_v53 = vadd.f32 %v5382_v27, %v5381_v45  ;;  %v5384_v31 = vpop.f32.mrb[106].mxu0 }
 0x1ef   : > { %v5385_v34 = vpop.f32.mrb[107].mxu0 }
 0x1f0   : > { %v5386_v44 = vadd.f32 %v5385_v34, %v5384_v31  ;;  %v6944_v33 = vadd.f32 %v5678_v61, %v5383_v53 }
 0x1f2   : > { %v6946_v5 = vadd.f32 %v5686_v28, %v5386_v44 }
 0x1f4   : > { %v5387_v23 = vpop.f32.mrb[108].mxu0 }
 0x1f5   : > { %v5388_v17 = vpop.f32.mrb[109].mxu0 }
 0x1f6   : > { %v5389_v8 = vadd.f32 %v5388_v17, %v5387_v23  ;;  %v5390_v56 = vpop.f32.mrb[110].mxu0 }
 0x1f7   : > { %v5391_v10 = vpop.f32.mrb[111].mxu0 }
 0x1f8   : > { %v5392_v40 = vadd.f32 %v5391_v10, %v5390_v56  ;;  %v6949_v15 = vadd.f32 %v6910_v26, %v5389_v8 }
 0x1fa   : > { %v5579_v55 = vpop.f32.mrb[80].mxu1  ;;  %v6952_v28 = vadd.f32 %v6916_v43, %v5392_v40 }
 0x1fb   : > { %v5628_v21 = vadd.f32 %v5627_v12, %v5579_v55  ;;  %v3832_v30 = vpop.f32.mrb[81].mxu1 }
 0x1fc   : > { %v5632_v42 = vadd.f32 %v5631_v7, %v3832_v30  ;;  %v5580_v54 = vpop.f32.mrb[82].mxu1  ;;  %v5393_v18 = vpop.f32.mrb[112].mxu0 }
 0x1fd   : > { %v5636_v19 = vadd.f32 %v5635_v29, %v5580_v54  ;;  %v3835_v61 = vpop.f32.mrb[83].mxu1  ;;  %v5394_v59 = vpop.f32.mrb[113].mxu0 }
 0x1fe   : > { %v5640_v12 = vadd.f32 %v6921_v11, %v3835_v61  ;;  %v5395_v35 = vadd.f32 %v5394_v59, %v5393_v18  ;;  %v5396_v29 = vpop.f32.mrb[114].mxu0 }
 0x1ff   : > { %v4088_v26 = vpack.c.bf16 %v5636_v19, %v5628_v21  ;;  %v5397_v43 = vpop.f32.mrb[115].mxu0 }
 0x200   : > { %v4087_v7 = vpack.c.bf16 %v5640_v12, %v5632_v42  ;;  %v5398_v6 = vadd.f32 %v5397_v43, %v5396_v29  ;;  %v6967_v23 = vadd.f32 %v6821_v9, %v5395_v35 }
 0x201   : > { %5042 = vst [vmem:[%s6959_s12 + $0x8] sm:$0xff] %v4088_v26   ;;  %v4249_v32 = vunpack.c.l.bf16 %v4088_v26  ;;  %v4250_v16 = vunpack.c.h.bf16 %v4088_v26 }
 0x202   : > { %4966 = vst [vmem:[%s6959_s12] sm:$0xff] %v4087_v7   ;;  %v4247_v4 = vunpack.c.l.bf16 %v4087_v7  ;;  %v4248_v60 = vunpack.c.h.bf16 %v4087_v7  ;;  %v5583_v14 = vpop.f32.mrb[84].mxu1  ;;  %v6970_v17 = vadd.f32 %v6823_v58, %v5398_v6 }
 0x203   : > { %v5644_v25 = vadd.f32 %v5643_v52, %v5583_v14  ;;  %v3848_v47 = vpop.f32.mrb[85].mxu1  ;;  %v4318_v8 = vmul.f32 %v4249_v32, %v4249_v32 }
 0x204   : > { %v4279_v45 = vadd.f32 %v4248_v60, %v4247_v4  ;;  %v4316_v27 = vmul.f32 %v4247_v4, %v4247_v4  ;;  %v4317_v11 = vmul.f32 %v4248_v60, %v4248_v60  ;;  %v5648_v53 = vadd.f32 %v6926_v2, %v3848_v47  ;;  %v5584_v31 = vpop.f32.mrb[86].mxu1  ;;  %v5399_v55 = vpop.f32.mrb[116].mxu0 }
 0x205   : > { %v5652_v34 = vadd.f32 %v6932_v37, %v5584_v31  ;;  %v3851_v44 = vpop.f32.mrb[87].mxu1  ;;  %v4319_v2 = vmul.f32 %v4250_v16, %v4250_v16  ;;  %v5400_v30 = vpop.f32.mrb[117].mxu0 }
 0x206   : > { %v4280_v52 = vadd.f32 %v4279_v45, %v4249_v32  ;;  %v4348_v56 = vadd.f32 %v4317_v11, %v4316_v27  ;;  %v5656_v10 = vadd.f32 %v6928_v22, %v3851_v44  ;;  %v5401_v54 = vadd.f32 %v5400_v30, %v5399_v55  ;;  %v5402_v19 = vpop.f32.mrb[118].mxu0 }
 0x207   : > { %v4090_v40 = vpack.c.bf16 %v5652_v34, %v5644_v25  ;;  %v5403_v9 = vpop.f32.mrb[119].mxu0 }
 0x208   : > { %v4349_v21 = vadd.f32 %v4348_v56, %v4318_v8  ;;  %v4089_v37 = vpack.c.bf16 %v5656_v10, %v5648_v53  ;;  %v4281_v42 = vadd.f32 %v4280_v52, %v4250_v16  ;;  %v5404_v26 = vadd.f32 %v5403_v9, %v5402_v19 }
 0x209   : > { %5044 = vst [vmem:[%s6959_s12 + $0x18] sm:$0xff] %v4090_v40   ;;  %v4253_v7 = vunpack.c.l.bf16 %v4090_v40  ;;  %v4254_v4 = vunpack.c.h.bf16 %v4090_v40  ;;  %v5690_v16 = vadd.f32 %v6825_v48, %v5401_v54 }
 0x20a   : > { %5043 = vst [vmem:[%s6959_s12 + $0x10] sm:$0xff] %v4089_v37   ;;  %v4251_v58 = vunpack.c.l.bf16 %v4089_v37  ;;  %v4252_v61 = vunpack.c.h.bf16 %v4089_v37  ;;  %v4350_v12 = vadd.f32 %v4349_v21, %v4319_v2  ;;  %v5587_v18 = vpop.f32.mrb[88].mxu1  ;;  %v6980_v6 = vadd.f32 %v6827_v62, %v5404_v26 }
 0x20b   : > { %v5660_v59 = vadd.f32 %v6939_v20, %v5587_v18  ;;  %v3864_v22 = vpop.f32.mrb[89].mxu1  ;;  %v4323_v44 = vmul.f32 %v4254_v4, %v4254_v4 }
 0x20c   : > { %v4282_v35 = vadd.f32 %v4281_v42, %v4251_v58  ;;  %v4320_v29 = vmul.f32 %v4251_v58, %v4251_v58  ;;  %v5664_v32 = vadd.f32 %v6934_v1, %v3864_v22  ;;  %v5588_v43 = vpop.f32.mrb[90].mxu1  ;;  %v4321_v47 = vmul.f32 %v4252_v61, %v4252_v61  ;;  %v5405_v27 = vpop.f32.mrb[120].mxu0 }
 0x20d   : > { %v5668_v60 = vadd.f32 %v6942_v3, %v5588_v43  ;;  %v3867_v14 = vpop.f32.mrb[91].mxu1  ;;  %v4322_v1 = vmul.f32 %v4253_v7, %v4253_v7  ;;  %v5406_v34 = vpop.f32.mrb[121].mxu0 }
 0x20e   : > { %v4283_v25 = vadd.f32 %v4282_v35, %v4252_v61  ;;  %v4351_v20 = vadd.f32 %v4350_v12, %v4320_v29  ;;  %v5672_v45 = vadd.f32 %v6936_v50, %v3867_v14  ;;  %v5407_v8 = vadd.f32 %v5406_v34, %v5405_v27  ;;  %v5408_v48 = vpop.f32.mrb[122].mxu0 }
 0x20f   : > { %v4092_v11 = vpack.c.bf16 %v5668_v60, %v5660_v59  ;;  %v5409_v62 = vpop.f32.mrb[123].mxu0 }
 0x210   : > { %v4284_v53 = vadd.f32 %v4283_v25, %v4253_v7  ;;  %v4352_v31 = vadd.f32 %v4351_v20, %v4321_v47  ;;  %v4091_v3 = vpack.c.bf16 %v5672_v45, %v5664_v32  ;;  %v5410_v50 = vadd.f32 %v5409_v62, %v5408_v48 }
 0x211   : > { %5046 = vst [vmem:[%s6959_s12 + $0x28] sm:$0xff] %v4092_v11   ;;  %v4257_v2 = vunpack.c.l.bf16 %v4092_v11  ;;  %v4258_v37 = vunpack.c.h.bf16 %v4092_v11  ;;  %v6989_v18 = vadd.f32 %v6829_v46, %v5407_v8 }
 0x212   : > { %v4353_v52 = vadd.f32 %v4352_v31, %v4322_v1  ;;  %5045 = vst [vmem:[%s6959_s12 + $0x20] sm:$0xff] %v4091_v3   ;;  %v4255_v56 = vunpack.c.l.bf16 %v4091_v3  ;;  %v4256_v10 = vunpack.c.h.bf16 %v4091_v3  ;;  %v4285_v55 = vadd.f32 %v4284_v53, %v4254_v4  ;;  %v5591_v40 = vpop.f32.mrb[92].mxu1 }
 0x213   : > { %v5676_v21 = vadd.f32 %v6949_v15, %v5591_v40  ;;  %v3880_v30 = vpop.f32.mrb[93].mxu1  ;;  %v6992_v26 = vadd.f32 %v6831_v51, %v5410_v50  ;;  %v4326_v32 = vmul.f32 %v4257_v2, %v4257_v2  ;;  %v4327_v60 = vmul.f32 %v4258_v37, %v4258_v37 }
 0x214   : > { %v4286_v42 = vadd.f32 %v4285_v55, %v4255_v56  ;;  %v4324_v54 = vmul.f32 %v4255_v56, %v4255_v56  ;;  %v4354_v19 = vadd.f32 %v4353_v52, %v4323_v44  ;;  %v5592_v9 = vpop.f32.mrb[94].mxu1  ;;  %v5680_v58 = vadd.f32 %v6944_v33, %v3880_v30  ;;  %v5411_v35 = vpop.f32.mrb[124].mxu0 }
 0x215   : > { %v5684_v61 = vadd.f32 %v6952_v28, %v5592_v9  ;;  %v3883_v12 = vpop.f32.mrb[95].mxu1  ;;  %v4325_v15 = vmul.f32 %v4256_v10, %v4256_v10  ;;  %v5412_v28 = vpop.f32.mrb[125].mxu0 }
 0x216   : > { %v4287_v59 = vadd.f32 %v4286_v42, %v4256_v10  ;;  %v4355_v22 = vadd.f32 %v4354_v19, %v4324_v54  ;;  %v5688_v7 = vadd.f32 %v6946_v5, %v3883_v12  ;;  %v5413_v46 = vadd.f32 %v5412_v28, %v5411_v35  ;;  %v5414_v14 = vpop.f32.mrb[126].mxu0 }
 0x217   : > { %v4094_v29 = vpack.c.bf16 %v5684_v61, %v5676_v21  ;;  %v5415_v51 = vpop.f32.mrb[127].mxu0 }
 0x218   : > { %v4288_v33 = vadd.f32 %v4287_v59, %v4257_v2  ;;  %v4356_v43 = vadd.f32 %v4355_v22, %v4325_v15  ;;  %v4093_v4 = vpack.c.bf16 %v5688_v7, %v5680_v58  ;;  %v5416_v5 = vadd.f32 %v5415_v51, %v5414_v14 }
 0x219   : > { %5048 = vst [vmem:[%s6959_s12 + $0x38] sm:$0xff] %v4094_v29   ;;  %v4261_v11 = vunpack.c.l.bf16 %v4094_v29  ;;  %v4262_v31 = vunpack.c.h.bf16 %v4094_v29  ;;  %v5702_v56 = vadd.f32 %v6837_v57, %v5413_v46 }
 0x21a   : > { %v4357_v25 = vadd.f32 %v4356_v43, %v4326_v32  ;;  %5047 = vst [vmem:[%s6959_s12 + $0x30] sm:$0xff] %v4093_v4   ;;  %v4259_v47 = vunpack.c.l.bf16 %v4093_v4  ;;  %v4260_v20 = vunpack.c.h.bf16 %v4093_v4  ;;  %v4289_v45 = vadd.f32 %v4288_v33, %v4258_v37  ;;  %v5595_v27 = vpop.f32.mrb[0].mxu1 }
 0x21b   : > { %v5691_v1 = vadd.f32 %v5690_v16, %v5595_v27  ;;  %v3896_v53 = vpop.f32.mrb[1].mxu1  ;;  %v5708_v10 = vadd.f32 %v6839_v36, %v5416_v5  ;;  %v4330_v30 = vmul.f32 %v4261_v11, %v4261_v11 }
 0x21c   : > { %v4290_v34 = vadd.f32 %v4289_v45, %v4259_v47  ;;  %v4328_v3 = vmul.f32 %v4259_v47, %v4259_v47  ;;  %v4358_v44 = vadd.f32 %v4357_v25, %v4327_v60  ;;  %v5596_v8 = vpop.f32.mrb[2].mxu1  ;;  %v5694_v48 = vadd.f32 %v6967_v23, %v3896_v53  ;;  %v5417_v50 = vpop.f32.mrb[128].mxu0 }
 0x21d   : > { %v5697_v52 = vadd.f32 %v6980_v6, %v5596_v8  ;;  %v3899_v62 = vpop.f32.mrb[3].mxu1  ;;  %v4329_v40 = vmul.f32 %v4260_v20, %v4260_v20  ;;  %v5418_v23 = vpop.f32.mrb[129].mxu0  ;;  %v4331_v6 = vmul.f32 %v4262_v31, %v4262_v31 }
 0x21e   : > { %v4291_v55 = vadd.f32 %v4290_v34, %v4260_v20  ;;  %v4359_v16 = vadd.f32 %v4358_v44, %v4328_v3  ;;  %v5700_v2 = vadd.f32 %v6970_v17, %v3899_v62  ;;  %v5419_v19 = vadd.f32 %v5418_v23, %v5417_v50  ;;  %v5420_v9 = vpop.f32.mrb[130].mxu0 }
 0x21f   : > { %v4096_v21 = vpack.c.bf16 %v5697_v52, %v5691_v1  ;;  %v5421_v58 = vpop.f32.mrb[131].mxu0 }
 0x220   : > { %v4292_v37 = vadd.f32 %v4291_v55, %v4261_v11  ;;  %v4360_v42 = vadd.f32 %v4359_v16, %v4329_v40  ;;  %v4095_v54 = vpack.c.bf16 %v5700_v2, %v5694_v48  ;;  %v5422_v17 = vadd.f32 %v5421_v58, %v5420_v9 }
 0x221   : > { %5050 = vst [vmem:[%s6959_s12 + $0x48] sm:$0xff] %v4096_v21   ;;  %v4265_v15 = vunpack.c.l.bf16 %v4096_v21  ;;  %v4266_v35 = vunpack.c.h.bf16 %v4096_v21  ;;  %v5717_v46 = vadd.f32 %v6845_v39, %v5419_v19 }
 0x222   : > { %v4361_v57 = vadd.f32 %v4360_v42, %v4330_v30  ;;  %5049 = vst [vmem:[%s6959_s12 + $0x40] sm:$0xff] %v4095_v54   ;;  %v4263_v36 = vunpack.c.l.bf16 %v4095_v54  ;;  %v4264_v61 = vunpack.c.h.bf16 %v4095_v54  ;;  %v4293_v12 = vadd.f32 %v4292_v37, %v4262_v31  ;;  %v5599_v59 = vpop.f32.mrb[4].mxu1 }
 0x223   : > { %v5703_v22 = vadd.f32 %v5702_v56, %v5599_v59  ;;  %v3912_v7 = vpop.f32.mrb[5].mxu1  ;;  %v5723_v14 = vadd.f32 %v6848_v63, %v5422_v17  ;;  %v4334_v11 = vmul.f32 %v4265_v15, %v4265_v15  ;;  %v4335_v31 = vmul.f32 %v4266_v35, %v4266_v35 }
 0x224   : > { %v4294_v29 = vadd.f32 %v4293_v12, %v4263_v36  ;;  %v4332_v32 = vmul.f32 %v4263_v36, %v4263_v36  ;;  %v4362_v33 = vadd.f32 %v4361_v57, %v4331_v6  ;;  %v5600_v43 = vpop.f32.mrb[6].mxu1  ;;  %v5706_v28 = vadd.f32 %v6989_v18, %v3912_v7  ;;  %v5423_v45 = vpop.f32.mrb[132].mxu0 }
 0x225   : > { %v5709_v4 = vadd.f32 %v5708_v10, %v5600_v43  ;;  %v3915_v60 = vpop.f32.mrb[7].mxu1  ;;  %v4333_v51 = vmul.f32 %v4264_v61, %v4264_v61  ;;  %v5424_v53 = vpop.f32.mrb[133].mxu0 }
 0x226   : > { %v4295_v25 = vadd.f32 %v4294_v29, %v4264_v61  ;;  %v4363_v47 = vadd.f32 %v4362_v33, %v4332_v32  ;;  %v5712_v20 = vadd.f32 %v6992_v26, %v3915_v60  ;;  %v5425_v34 = vadd.f32 %v5424_v53, %v5423_v45  ;;  %v5426_v3 = vpop.f32.mrb[134].mxu0 }
 0x227   : > { %v4098_v27 = vpack.c.bf16 %v5709_v4, %v5703_v22  ;;  %v5427_v44 = vpop.f32.mrb[135].mxu0 }
 0x228   : > { %v4296_v5 = vadd.f32 %v4295_v25, %v4265_v15  ;;  %v4364_v1 = vadd.f32 %v4363_v47, %v4333_v51  ;;  %v4097_v18 = vpack.c.bf16 %v5712_v20, %v5706_v28  ;;  %v5428_v62 = vadd.f32 %v5427_v44, %v5426_v3 }
 0x229   : > { %5052 = vst [vmem:[%s6959_s12 + $0x58] sm:$0xff] %v4098_v27   ;;  %v5714_v26 = vadd.f32 %v6865_v49, %v5425_v34  ;;  %v4269_v10 = vunpack.c.l.bf16 %v4098_v27  ;;  %v4270_v50 = vunpack.c.h.bf16 %v4098_v27 }
 0x22a   : > { %v4365_v39 = vadd.f32 %v4364_v1, %v4334_v11  ;;  %5051 = vst [vmem:[%s6959_s12 + $0x50] sm:$0xff] %v4097_v18   ;;  %v4267_v63 = vunpack.c.l.bf16 %v4097_v18  ;;  %v4268_v8 = vunpack.c.h.bf16 %v4097_v18  ;;  %v4297_v48 = vadd.f32 %v4296_v5, %v4266_v35  ;;  %v5603_v52 = vpop.f32.mrb[8].mxu1 }
 0x22b   : > { %v3928_v56 = vpop.f32.mrb[9].mxu1  ;;  %v5715_v21 = vadd.f32 %v5714_v26, %v5603_v52  ;;  %v5720_v37 = vadd.f32 %v6868_v24, %v5428_v62  ;;  %v4338_v49 = vmul.f32 %v4269_v10, %v4269_v10  ;;  %v4339_v59 = vmul.f32 %v4270_v50, %v4270_v50 }
 0x22c   : > { %v4298_v55 = vadd.f32 %v4297_v48, %v4267_v63  ;;  %v4336_v40 = vmul.f32 %v4267_v63, %v4267_v63  ;;  %v4366_v16 = vadd.f32 %v4365_v39, %v4335_v31  ;;  %v5604_v2 = vpop.f32.mrb[10].mxu1  ;;  %v5718_v30 = vadd.f32 %v5717_v46, %v3928_v56  ;;  %v5429_v9 = vpop.f32.mrb[136].mxu0 }
 0x22d   : > { %v3931_v42 = vpop.f32.mrb[11].mxu1  ;;  %v4337_v54 = vmul.f32 %v4268_v8, %v4268_v8  ;;  %v5721_v57 = vadd.f32 %v5720_v37, %v5604_v2  ;;  %v5430_v61 = vpop.f32.mrb[137].mxu0 }
 0x22e   : > { %v4299_v23 = vadd.f32 %v4298_v55, %v4268_v8  ;;  %v4367_v6 = vadd.f32 %v4366_v16, %v4336_v40  ;;  %v5724_v19 = vadd.f32 %v5723_v14, %v3931_v42  ;;  %v5431_v15 = vadd.f32 %v5430_v61, %v5429_v9  ;;  %v5432_v17 = vpop.f32.mrb[138].mxu0 }
 0x22f   : > { %v4100_v22 = vpack.c.bf16 %v5721_v57, %v5715_v21  ;;  %v5433_v24 = vpop.f32.mrb[139].mxu0 }
 0x230   : > { %v4300_v58 = vadd.f32 %v4299_v23, %v4269_v10  ;;  %v4368_v36 = vadd.f32 %v4367_v6, %v4337_v54  ;;  %v4099_v12 = vpack.c.bf16 %v5724_v19, %v5718_v30  ;;  %v5434_v43 = vadd.f32 %v5433_v24, %v5432_v17 }
 0x231   : > { %5054 = vst [vmem:[%s6959_s12 + $0x68] sm:$0xff] %v4100_v22   ;;  %v5729_v4 = vadd.f32 %v6884_v38, %v5431_v15  ;;  %v4273_v60 = vunpack.c.l.bf16 %v4100_v22  ;;  %v4274_v27 = vunpack.c.h.bf16 %v4100_v22 }
 0x232   : > { %v4369_v7 = vadd.f32 %v4368_v36, %v4338_v49  ;;  %5053 = vst [vmem:[%s6959_s12 + $0x60] sm:$0xff] %v4099_v12   ;;  %v4271_v35 = vunpack.c.l.bf16 %v4099_v12  ;;  %v4272_v29 = vunpack.c.h.bf16 %v4099_v12  ;;  %v4301_v32 = vadd.f32 %v4300_v58, %v4270_v50  ;;  %v5607_v33 = vpop.f32.mrb[12].mxu1 }
 0x233   : > { %v3944_v28 = vpop.f32.mrb[13].mxu1  ;;  %v5735_v45 = vadd.f32 %v6888_v13, %v5434_v43  ;;  %v4342_v31 = vmul.f32 %v4273_v60, %v4273_v60  ;;  %v4343_v8 = vmul.f32 %v4274_v27, %v4274_v27 }
 0x234   : > { %v4302_v46 = vadd.f32 %v4301_v32, %v4271_v35  ;;  %v4340_v14 = vmul.f32 %v4271_v35, %v4271_v35  ;;  %v4370_v25 = vadd.f32 %v4369_v7, %v4339_v59  ;;  %v5608_v51 = vpop.f32.mrb[14].mxu1  ;;  %v5730_v47 = vadd.f32 %v5729_v4, %v3944_v28  ;;  %v5435_v53 = vpop.f32.mrb[140].mxu0 }
 0x235   : > { %v3947_v20 = vpop.f32.mrb[15].mxu1  ;;  %v4341_v5 = vmul.f32 %v4272_v29, %v4272_v29  ;;  %v5436_v38 = vpop.f32.mrb[141].mxu0 }
 0x236   : > { %v4303_v11 = vadd.f32 %v4302_v46, %v4272_v29  ;;  %v4371_v1 = vadd.f32 %v4370_v25, %v4340_v14  ;;  %v5736_v18 = vadd.f32 %v5735_v45, %v3947_v20  ;;  %v5437_v39 = vadd.f32 %v5436_v38, %v5435_v53  ;;  %v5438_v44 = vpop.f32.mrb[142].mxu0 }
 0x237   : > { %v5439_v52 = vpop.f32.mrb[143].mxu0 }
 0x238   : > { %v4304_v34 = vadd.f32 %v4303_v11, %v4273_v60  ;;  %v4372_v3 = vadd.f32 %v4371_v1, %v4341_v5  ;;  %v4101_v63 = vpack.c.bf16 %v5736_v18, %v5730_v47  ;;  %v5726_v13 = vadd.f32 %v6902_v41, %v5437_v39 }
 0x239   : > { %v5440_v26 = vadd.f32 %v5439_v52, %v5438_v44 }
 0x23a   : > { %v4373_v48 = vadd.f32 %v4372_v3, %v4342_v31  ;;  %v4305_v62 = vadd.f32 %v4304_v34, %v4274_v27  ;;  %5055 = vst [vmem:[%s6959_s12 + $0x70] sm:$0xff] %v4101_v63   ;;  %v4275_v56 = vunpack.c.l.bf16 %v4101_v63  ;;  %v4276_v10 = vunpack.c.h.bf16 %v4101_v63 }
 0x23b   : > { %v5727_v40 = vadd.f32 %v5726_v13, %v5607_v33  ;;  %v5732_v16 = vadd.f32 %v6906_v0, %v5440_v26 }
 0x23c   : > { %v4374_v55 = vadd.f32 %v4373_v48, %v4343_v8  ;;  %v4306_v2 = vadd.f32 %v4305_v62, %v4275_v56  ;;  %v4344_v50 = vmul.f32 %v4275_v56, %v4275_v56  ;;  %v4345_v37 = vmul.f32 %v4276_v10, %v4276_v10 }
 0x23d   : > { %v5733_v21 = vadd.f32 %v5732_v16, %v5608_v51 }
 0x23e   : > { %v4307_v30 = vadd.f32 %v4306_v2, %v4276_v10  ;;  %v4375_v42 = vadd.f32 %v4374_v55, %v4344_v50 }
 0x23f   : > { %v4102_v23 = vpack.c.bf16 %v5733_v21, %v5727_v40 }
 0x240   : > { %v4376_v54 = vadd.f32 %v4375_v42, %v4345_v37 }
 0x241   : > { %5056 = vst [vmem:[%s6959_s12 + $0x78] sm:$0xff] %v4102_v23   ;;  %v4277_v6 = vunpack.c.l.bf16 %v4102_v23  ;;  %v4278_v41 = vunpack.c.h.bf16 %v4102_v23 }
 0x243   : > { %v4346_v19 = vmul.f32 %v4277_v6, %v4277_v6  ;;  %v4308_v9 = vadd.f32 %v4307_v30, %v4277_v6  ;;  %v4347_v57 = vmul.f32 %v4278_v41, %v4278_v41 }
 0x245   : > { %v4309_v49 = vadd.f32 %v4308_v9, %v4278_v41  ;;  %v4377_v58 = vadd.f32 %v4376_v54, %v4346_v19 }
 0x247   : > { %v4310_v36 = vrot.slane %v4309_v49, 4  ;;  %v4378_v61 = vadd.f32 %v4377_v58, %v4347_v57 }
 0x249   : > { %v4311_v0 = vadd.f32 %v4310_v36, %v4309_v49  ;;  %v4379_v12 = vrot.slane %v4378_v61, 4 }
 0x24b   : > { %v4312_v59 = vrot.slane %v4311_v0, 2  ;;  %v4380_v15 = vadd.f32 %v4379_v12, %v4378_v61 }
 0x24d   : > { %v4313_v17 = vadd.f32 %v4312_v59, %v4311_v0  ;;  %v4381_v22 = vrot.slane %v4380_v15, 2 }
 0x24f   : > { %v4314_v7 = vrot.slane %v4313_v17, 1  ;;  %v4382_v24 = vadd.f32 %v4381_v22, %v4380_v15 }
 0x251   : > { %v4383_v35 = vrot.slane %v4382_v24, 1  ;;  %v4315_v29 = vadd.f32 %v4314_v7, %v4313_v17 }
 0x253   : > { %v4384_v32 = vadd.f32 %v4383_v35, %v4382_v24 }
 0x255   : > { %v4386_v33 = vsel %vm4385_vm2, %v4315_v29, %v4384_v32 }
 0x256   : > { %4387 = vst [vmem:[%s235_s15] sm:$0x3] %v4386_v33 }
 0x257 PF: > { %s20_s19 = sadd.s32 1, %s5996_s19   ;;  %s7041_s17 = smov %s5992_s18 }
 0x258   : > { %p17_p5 = scmp.ge.s32.totalorder %s20_s19, 4   ;;  %s7042_s18 = smov %s7044_s2 }
 0x25a   :  { %19 = sbr.rel (!%p17_p5) target bundleno = 5 (0x5), region = 180 }

</bundles_post_ra>
